<compile_context>
chip_gen: v5e
topology: v5e:2x2
jax: 0.10.0
libtpu: 0.0.40
codegen_flags: <defaults>
</compile_context>

<pallas_src>
import math
import functools

import jax
import jax.numpy as jnp
from jax import lax
from jax.experimental import pallas as pl
from jax.experimental.pallas import tpu as pltpu


# ----------------------------- in-kernel helpers -----------------------------
def _mat(a, b):
    return jnp.dot(a, b, preferred_element_type=jnp.float32)


def _matT(a, b):
    # a @ b.T (contract the last dim of both), f32 accumulation on the MXU.
    return lax.dot_general(a, b, dimension_numbers=(((1,), (1,)), ((), ())),
                           preferred_element_type=jnp.float32)


def _softmax(s):
    m = jnp.max(s, axis=-1, keepdims=True)
    e = jnp.exp(s - m)
    # EUP approximate reciprocal keeps the divide off the VALU critical path.
    return e * pl.reciprocal(jnp.sum(e, axis=-1, keepdims=True), approx=True)


# --------------------------------- the kernel --------------------------------
def _nystrom_kernel(inv_gmax_ref,                       # scalar prefetch (SMEM)
                    x_ref, qland_ref, kland_ref,        # per-batch inputs
                    wq_ref, bq_ref, wk_ref, bk_ref,     # broadcast weights
                    wv_ref, bv_ref, wo_ref, bo_ref,
                    o_ref,                              # output
                    comb_ref, *,                        # VMEM scratch (L, qkv)
                    full_len, num_heads, head_dim, num_landmarks, n_iter):
    f32 = jnp.float32
    m = num_landmarks
    hd = head_dim
    scale = 1.0 / math.sqrt(math.sqrt(head_dim))
    use_full_attn = (m == full_len)

    xb = x_ref[0]                                       # (L, emb)  bf16
    wq, wk, wv, wo = wq_ref[...], wk_ref[...], wv_ref[...], wo_ref[...]
    bq, bk, bv, bo = bq_ref[...], bk_ref[...], bv_ref[...], bo_ref[...]

    # One big projection matmul each: (L, emb) @ (emb, qkv), bf16 in, f32 acc.
    q = (_mat(xb, wq) + bq) * scale                     # (L, qkv) f32
    k = (_mat(xb, wk) + bk) * scale
    v = _mat(xb, wv) + bv

    if not use_full_attn:
        q_land = qland_ref[0]                           # (m, qkv) f32 (pre-scaled)
        k_land = kland_ref[0]
        eye = (lax.broadcasted_iota(jnp.int32, (m, m), 0)
               == lax.broadcasted_iota(jnp.int32, (m, m), 1)).astype(f32)
        inv_gmax = inv_gmax_ref[0]                      # global 1/max(colsum(k2))

    for h in range(num_heads):                          # heads processed in one group
        sl = slice(h * hd, (h + 1) * hd)
        qh, kh, vh = q[:, sl], k[:, sl], v[:, sl]       # (L, hd)
        if use_full_attn:
            out_h = _mat(_softmax(_matT(qh, kh)), vh)   # plain softmax attention
        else:
            qlh, klh = q_land[:, sl], k_land[:, sl]     # (m, hd)
            k1 = _softmax(_matT(qh, klh))               # (L, m)
            k2 = _softmax(_matT(qlh, klh))              # (m, m)
            k3v = _mat(_softmax(_matT(qlh, kh)), vh)    # (m, hd)
            # Iterative Moore-Penrose pseudo-inverse, 'original' init scaled by
            # the GLOBAL reciprocal supplied by the prologue.
            V = k2.T * inv_gmax
            for _ in range(n_iter):
                KV = _mat(k2, V)
                t1 = 7.0 * eye - KV
                t2 = 15.0 * eye - _mat(KV, t1)
                t3 = 13.0 * eye - _mat(KV, t2)
                V = _mat(V, t3) * 0.25
            out_h = _mat(_mat(k1, V), k3v)              # (L, hd)
        comb_ref[:, sl] = out_h                         # assemble combined heads

    # Single combined output projection: (L, qkv) @ (qkv, emb) + bo.
    o_ref[0] = _mat(comb_ref[...].astype(wo.dtype), wo) + bo


# ------------------------------ plain-JAX prologue ----------------------------
def _landmark_prologue(x_pad, wq, bq, wk, bk, *,
                       num_heads, head_dim, num_landmarks, scale):
    """Tiny pre-pass over landmark-sized data only.

    The projection is linear, so landmark(q) == (segment_mean(x) @ Wq + bq)*scale.
    Returns scaled q/k landmarks (bs, m, qkv) and the global 1/max(colsum(k2))
    needed for the pseudo-inverse initialisation (the only cross-(b,h) value).
    """
    bs, L, E = x_pad.shape
    m = num_landmarks
    seg = L // m
    with jax.default_matmul_precision("highest"):
        x_land = x_pad.reshape(bs, m, seg, E).mean(axis=2)        # (bs, m, emb)
        q_land = (jnp.matmul(x_land, wq) + bq) * scale            # (bs, m, qkv)
        k_land = (jnp.matmul(x_land, wk) + bk) * scale
        qlh = q_land.reshape(bs, m, num_heads, head_dim)
        klh = k_land.reshape(bs, m, num_heads, head_dim)
        k2 = jax.nn.softmax(jnp.einsum("bmhd,bnhd->bhmn", qlh, klh), axis=-1)
        inv_gmax = 1.0 / jnp.max(jnp.sum(k2, axis=-2))
    return q_land, k_land, inv_gmax.reshape(1).astype(jnp.float32)


# ---------------------------------- wrapper -----------------------------------
def nystrom_attention(x, params, *, num_heads, num_landmarks, n_iter=6,
                      compute_dtype=jnp.bfloat16):
    bs, seqlen, emb_dim = x.shape
    qkv_dim = params["wq"].shape[1]
    head_dim = qkv_dim // num_heads
    assert head_dim * num_heads == qkv_dim, "qkv_dim must be divisible by num_heads"

    if seqlen % num_landmarks > 0:
        pad_len = num_landmarks - seqlen % num_landmarks
        x = jnp.pad(x, ((0, 0), (0, pad_len), (0, 0)))   # == pad_tensor (zeros at end)
    full_len = x.shape[1]
    scale = 1.0 / math.sqrt(math.sqrt(head_dim))
    f32 = jnp.float32

    # bf16 MXU inputs (halves HBM traffic / VMEM); biases stay f32.
    x_c = x.astype(compute_dtype)
    wq_c = params["wq"].astype(compute_dtype)
    wk_c = params["wk"].astype(compute_dtype)
    wv_c = params["wv"].astype(compute_dtype)
    wo_c = params["wo"].astype(compute_dtype)
    bq, bk = params["bq"].astype(f32), params["bk"].astype(f32)
    bv, bo = params["bv"].astype(f32), params["bo"].astype(f32)

    if num_landmarks == full_len:
        # Full softmax-attention path: landmarks / gmax are unused in-kernel.
        q_land = jnp.zeros((bs, num_landmarks, qkv_dim), f32)
        k_land = jnp.zeros((bs, num_landmarks, qkv_dim), f32)
        inv_gmax = jnp.ones((1,), f32)
    else:
        q_land, k_land, inv_gmax = _landmark_prologue(
            x_c.astype(f32), wq_c.astype(f32), bq, wk_c.astype(f32), bk,
            num_heads=num_heads, head_dim=head_dim,
            num_landmarks=num_landmarks, scale=scale)

    kernel = functools.partial(
        _nystrom_kernel, full_len=full_len, num_heads=num_heads,
        head_dim=head_dim, num_landmarks=num_landmarks, n_iter=n_iter)

    per_b3 = lambda b, s: (b, 0, 0)   # one batch element per grid step
    bcast2 = lambda b, s: (0, 0)      # weights: same block every step (no re-DMA)

    grid_spec = pltpu.PrefetchScalarGridSpec(
        num_scalar_prefetch=1,                       # inv_gmax -> SMEM scalar
        grid=(bs,),
        in_specs=[
            pl.BlockSpec((1, full_len, emb_dim), per_b3),        # x
            pl.BlockSpec((1, num_landmarks, qkv_dim), per_b3),   # q landmarks
            pl.BlockSpec((1, num_landmarks, qkv_dim), per_b3),   # k landmarks
            pl.BlockSpec((emb_dim, qkv_dim), bcast2),            # wq
            pl.BlockSpec((1, qkv_dim), bcast2),                  # bq
            pl.BlockSpec((emb_dim, qkv_dim), bcast2),            # wk
            pl.BlockSpec((1, qkv_dim), bcast2),                  # bk
            pl.BlockSpec((emb_dim, qkv_dim), bcast2),            # wv
            pl.BlockSpec((1, qkv_dim), bcast2),                  # bv
            pl.BlockSpec((qkv_dim, emb_dim), bcast2),            # wo
            pl.BlockSpec((1, emb_dim), bcast2),                  # bo
        ],
        out_specs=pl.BlockSpec((1, full_len, emb_dim), per_b3),
        scratch_shapes=[pltpu.VMEM((full_len, qkv_dim), jnp.float32)],
    )

    out_padded = pl.pallas_call(
        kernel,
        grid_spec=grid_spec,
        out_shape=jax.ShapeDtypeStruct((bs, full_len, emb_dim), jnp.float32),
        compiler_params=pltpu.CompilerParams(
            dimension_semantics=("parallel",)),      # megacore-shardable batch axis
    )(inv_gmax, x_c, q_land, k_land, wq_c, bq, wk_c, bk, wv_c, bv, wo_c, bo)

    # Kernel writes the padded (multiple-of-m) length; slice to seqlen here so
    # the in-kernel stores stay unmasked / lane-dense.
    return out_padded[:, :seqlen, :]


# ----------------- plain-JAX reference (mirrors the PyTorch forward) ----------
def nystrom_reference(x, params, *, num_heads, num_landmarks, n_iter=6):
    with jax.default_matmul_precision("highest"):
        bs, seqlen, emb_dim = x.shape
        qkv_dim = params["wq"].shape[1]
        head_dim = qkv_dim // num_heads
        if seqlen % num_landmarks > 0:
            pad_len = num_landmarks - seqlen % num_landmarks
            x = jnp.pad(x, ((0, 0), (0, pad_len), (0, 0)))
        full_len = x.shape[1]

        def split_heads(t):
            t = t.reshape(bs, full_len, num_heads, head_dim)
            return jnp.transpose(t, (0, 2, 1, 3))

        q = split_heads(x @ params["wq"] + params["bq"])
        k = split_heads(x @ params["wk"] + params["bk"])
        v = split_heads(x @ params["wv"] + params["bv"])
        scale = 1.0 / math.sqrt(math.sqrt(head_dim))
        q = q * scale
        k = k * scale

        if num_landmarks == full_len:
            attn = jax.nn.softmax(q @ jnp.swapaxes(k, -1, -2), axis=-1)
            out = attn @ v
        else:
            seg = full_len // num_landmarks
            q_land = q.reshape(bs, num_heads, num_landmarks, seg, head_dim).mean(axis=-2)
            k_land = k.reshape(bs, num_heads, num_landmarks, seg, head_dim).mean(axis=-2)
            k1 = jax.nn.softmax(q @ jnp.swapaxes(k_land, -1, -2), axis=-1)
            k2 = jax.nn.softmax(q_land @ jnp.swapaxes(k_land, -1, -2), axis=-1)
            k3 = jax.nn.softmax(q_land @ jnp.swapaxes(k, -1, -2), axis=-1)
            eye = jnp.eye(num_landmarks, dtype=jnp.float32)
            K = k2
            V = (1.0 / jnp.max(jnp.sum(K, axis=-2))) * jnp.swapaxes(K, -1, -2)
            for _ in range(n_iter):
                KV = K @ V
                V = (0.25 * V) @ (13.0 * eye - KV @ (15.0 * eye - KV @ (7.0 * eye - KV)))
            out = (k1 @ V) @ (k3 @ v)

        out = out[:, :, :seqlen]
        out = jnp.transpose(out, (0, 2, 1, 3)).reshape(bs, seqlen, qkv_dim)
        return out @ params["wo"] + params["bo"]


if __name__ == "__main__":
    # Small shapes consistent with the module; seqlen=10 exercises padding.
    bs, seqlen, emb_dim = 2, 10, 32
    qkv_dim, num_heads, num_landmarks = 32, 4, 4   # head_dim = 8

    key = jax.random.PRNGKey(0)
    ks = jax.random.split(key, 9)

    def init_linear(kw, kb, fan_in, fan_out):
        bound = 1.0 / math.sqrt(fan_in)
        w = jax.random.uniform(kw, (fan_in, fan_out), jnp.float32, -bound, bound)
        b = jax.random.uniform(kb, (1, fan_out), jnp.float32, -bound, bound)
        return w, b

    wq, bq = init_linear(ks[0], ks[1], emb_dim, qkv_dim)
    wk, bk = init_linear(ks[2], ks[3], emb_dim, qkv_dim)
    wv, bv = init_linear(ks[4], ks[5], emb_dim, qkv_dim)
    wo, bo = init_linear(ks[6], ks[7], qkv_dim, emb_dim)
    params = dict(wq=wq, bq=bq, wk=wk, bk=bk, wv=wv, bv=bv, wo=wo, bo=bo)

    x = jax.random.normal(ks[8], (bs, seqlen, emb_dim), dtype=jnp.float32)

    out = nystrom_attention(x, params, num_heads=num_heads,
                            num_landmarks=num_landmarks, n_iter=6)
    out = jax.block_until_ready(out)

    # Reference is given the same bf16 rounding of x / weights that the kernel's
    # MXU inputs see (all subsequent math in f32), so the comparison checks the
    # kernel implementation rather than the mixed-precision input cast.
    def _r(a):
        return a.astype(jnp.bfloat16).astype(jnp.float32)

    params_r = dict(params)
    for name in ("wq", "wk", "wv", "wo"):
        params_r[name] = _r(params[name])
    ref = nystrom_reference(_r(x), params_r, num_heads=num_heads,
                            num_landmarks=num_landmarks, n_iter=6)

    assert out.shape == (bs, seqlen, emb_dim)
    assert bool(jnp.all(jnp.isfinite(out)))
    max_err = float(jnp.max(jnp.abs(out - ref)))
    assert bool(jnp.allclose(out, ref, atol=2e-2, rtol=2e-2)), f"max_abs_err={max_err}"
    # TODO(synk): use_conv=True path raises NotImplementedError in the PyTorch
    # __init__ itself (kernel_size is an empty tuple), so it is not modeled here.
    print("KERNEL_OK")
</pallas_src>

<mosaic_0001>
module attributes {stable_mosaic.version = 11 : i64} {
  func.func @_nystrom_kernel(%arg0: i32, %arg1: memref<1xf32, #tpu.memory_space<smem>>, %arg2: memref<1x12x32xbf16, #tpu.memory_space<vmem>>, %arg3: memref<1x4x32xf32, #tpu.memory_space<vmem>>, %arg4: memref<1x4x32xf32, #tpu.memory_space<vmem>>, %arg5: memref<32x32xbf16, #tpu.memory_space<vmem>>, %arg6: memref<1x32xf32, #tpu.memory_space<vmem>>, %arg7: memref<32x32xbf16, #tpu.memory_space<vmem>>, %arg8: memref<1x32xf32, #tpu.memory_space<vmem>>, %arg9: memref<32x32xbf16, #tpu.memory_space<vmem>>, %arg10: memref<1x32xf32, #tpu.memory_space<vmem>>, %arg11: memref<32x32xbf16, #tpu.memory_space<vmem>>, %arg12: memref<1x32xf32, #tpu.memory_space<vmem>>, %arg13: memref<1x12x32xf32, #tpu.memory_space<vmem>>, %arg14: memref<12x32xf32, #tpu.memory_space<vmem>>) attributes {dimension_semantics = [#tpu.dimension_semantics<parallel>], iteration_bounds = array<i64: 2>, scalar_prefetch = 1 : i64, scratch_operands = 1 : i64, tpu.core_type = #tpu.core_type<tc>, window_params = [{transform_indices = @transform_0, window_bounds = array<i64: 1, 12, 32>}, {transform_indices = @transform_1, window_bounds = array<i64: 1, 4, 32>}, {transform_indices = @transform_2, window_bounds = array<i64: 1, 4, 32>}, {pipeline_mode = #tpu.pipeline_mode<synchronous>, transform_indices = @transform_3, window_bounds = array<i64: 32, 32>}, {pipeline_mode = #tpu.pipeline_mode<synchronous>, transform_indices = @transform_4, window_bounds = array<i64: 1, 32>}, {pipeline_mode = #tpu.pipeline_mode<synchronous>, transform_indices = @transform_5, window_bounds = array<i64: 32, 32>}, {pipeline_mode = #tpu.pipeline_mode<synchronous>, transform_indices = @transform_6, window_bounds = array<i64: 1, 32>}, {pipeline_mode = #tpu.pipeline_mode<synchronous>, transform_indices = @transform_7, window_bounds = array<i64: 32, 32>}, {pipeline_mode = #tpu.pipeline_mode<synchronous>, transform_indices = @transform_8, window_bounds = array<i64: 1, 32>}, {pipeline_mode = #tpu.pipeline_mode<synchronous>, transform_indices = @transform_9, window_bounds = array<i64: 32, 32>}, {pipeline_mode = #tpu.pipeline_mode<synchronous>, transform_indices = @transform_10, window_bounds = array<i64: 1, 32>}, {transform_indices = @transform_11, window_bounds = array<i64: 1, 12, 32>}]} {
    %c0 = arith.constant 0 : index
    %c0_0 = arith.constant 0 : index
    %c0_1 = arith.constant 0 : index
    %0 = vector.load %arg2[%c0, %c0_0, %c0_1] : memref<1x12x32xbf16, #tpu.memory_space<vmem>>, vector<1x12x32xbf16>
    %1 = vector.shape_cast %0 : vector<1x12x32xbf16> to vector<12x32xbf16>
    %c0_2 = arith.constant 0 : index
    %c0_3 = arith.constant 0 : index
    %2 = vector.load %arg5[%c0_2, %c0_3] : memref<32x32xbf16, #tpu.memory_space<vmem>>, vector<32x32xbf16>
    %c0_4 = arith.constant 0 : index
    %c0_5 = arith.constant 0 : index
    %3 = vector.load %arg7[%c0_4, %c0_5] : memref<32x32xbf16, #tpu.memory_space<vmem>>, vector<32x32xbf16>
    %c0_6 = arith.constant 0 : index
    %c0_7 = arith.constant 0 : index
    %4 = vector.load %arg9[%c0_6, %c0_7] : memref<32x32xbf16, #tpu.memory_space<vmem>>, vector<32x32xbf16>
    %c0_8 = arith.constant 0 : index
    %c0_9 = arith.constant 0 : index
    %5 = vector.load %arg11[%c0_8, %c0_9] : memref<32x32xbf16, #tpu.memory_space<vmem>>, vector<32x32xbf16>
    %c0_10 = arith.constant 0 : index
    %c0_11 = arith.constant 0 : index
    %6 = vector.load %arg6[%c0_10, %c0_11] : memref<1x32xf32, #tpu.memory_space<vmem>>, vector<1x32xf32>
    %c0_12 = arith.constant 0 : index
    %c0_13 = arith.constant 0 : index
    %7 = vector.load %arg8[%c0_12, %c0_13] : memref<1x32xf32, #tpu.memory_space<vmem>>, vector<1x32xf32>
    %c0_14 = arith.constant 0 : index
    %c0_15 = arith.constant 0 : index
    %8 = vector.load %arg10[%c0_14, %c0_15] : memref<1x32xf32, #tpu.memory_space<vmem>>, vector<1x32xf32>
    %c0_16 = arith.constant 0 : index
    %c0_17 = arith.constant 0 : index
    %9 = vector.load %arg12[%c0_16, %c0_17] : memref<1x32xf32, #tpu.memory_space<vmem>>, vector<1x32xf32>
    %cst = arith.constant dense<0.000000e+00> : vector<12x32xf32>
    %10 = tpu.matmul %1, %2, %cst {dimension_numbers = #tpu.dot_dimension_numbers<[1], [0], [0], [1], [0, 0, 1, 1], [], []>} : vector<12x32xbf16>, vector<32x32xbf16>, vector<12x32xf32> -> vector<12x32xf32>
    %11 = vector.broadcast %6 : vector<1x32xf32> to vector<12x32xf32>
    %12 = arith.addf %10, %11 : vector<12x32xf32>
    %cst_18 = arith.constant 0.594603539 : f32
    %13 = vector.broadcast %cst_18 : f32 to vector<12x32xf32>
    %14 = arith.mulf %12, %13 : vector<12x32xf32>
    %cst_19 = arith.constant dense<0.000000e+00> : vector<12x32xf32>
    %15 = tpu.matmul %1, %3, %cst_19 {dimension_numbers = #tpu.dot_dimension_numbers<[1], [0], [0], [1], [0, 0, 1, 1], [], []>} : vector<12x32xbf16>, vector<32x32xbf16>, vector<12x32xf32> -> vector<12x32xf32>
    %16 = vector.broadcast %7 : vector<1x32xf32> to vector<12x32xf32>
    %17 = arith.addf %15, %16 : vector<12x32xf32>
    %cst_20 = arith.constant 0.594603539 : f32
    %18 = vector.broadcast %cst_20 : f32 to vector<12x32xf32>
    %19 = arith.mulf %17, %18 : vector<12x32xf32>
    %cst_21 = arith.constant dense<0.000000e+00> : vector<12x32xf32>
    %20 = tpu.matmul %1, %4, %cst_21 {dimension_numbers = #tpu.dot_dimension_numbers<[1], [0], [0], [1], [0, 0, 1, 1], [], []>} : vector<12x32xbf16>, vector<32x32xbf16>, vector<12x32xf32> -> vector<12x32xf32>
    %21 = vector.broadcast %8 : vector<1x32xf32> to vector<12x32xf32>
    %22 = arith.addf %20, %21 : vector<12x32xf32>
    %c0_22 = arith.constant 0 : index
    %c0_23 = arith.constant 0 : index
    %c0_24 = arith.constant 0 : index
    %23 = vector.load %arg3[%c0_22, %c0_23, %c0_24] : memref<1x4x32xf32, #tpu.memory_space<vmem>>, vector<1x4x32xf32>
    %24 = vector.shape_cast %23 : vector<1x4x32xf32> to vector<4x32xf32>
    %c0_25 = arith.constant 0 : index
    %c0_26 = arith.constant 0 : index
    %c0_27 = arith.constant 0 : index
    %25 = vector.load %arg4[%c0_25, %c0_26, %c0_27] : memref<1x4x32xf32, #tpu.memory_space<vmem>>, vector<1x4x32xf32>
    %26 = vector.shape_cast %25 : vector<1x4x32xf32> to vector<4x32xf32>
    %27 = tpu.iota {dimensions = array<i32: 0>} : vector<4x4xi32>
    %28 = tpu.iota {dimensions = array<i32: 1>} : vector<4x4xi32>
    %29 = arith.cmpi eq, %27, %28 : vector<4x4xi32>
    %30 = arith.extui %29 : vector<4x4xi1> to vector<4x4xi32>
    %31 = arith.sitofp %30 : vector<4x4xi32> to vector<4x4xf32>
    %c0_28 = arith.constant 0 : index
    %32 = memref.load %arg1[%c0_28] : memref<1xf32, #tpu.memory_space<smem>>
    %33 = vector.extract_strided_slice %14 {offsets = [0, 0], sizes = [12, 8], strides = [1, 1]} : vector<12x32xf32> to vector<12x8xf32>
    %34 = vector.extract_strided_slice %19 {offsets = [0, 0], sizes = [12, 8], strides = [1, 1]} : vector<12x32xf32> to vector<12x8xf32>
    %35 = vector.extract_strided_slice %22 {offsets = [0, 0], sizes = [12, 8], strides = [1, 1]} : vector<12x32xf32> to vector<12x8xf32>
    %36 = vector.extract_strided_slice %24 {offsets = [0, 0], sizes = [4, 8], strides = [1, 1]} : vector<4x32xf32> to vector<4x8xf32>
    %37 = vector.extract_strided_slice %26 {offsets = [0, 0], sizes = [4, 8], strides = [1, 1]} : vector<4x32xf32> to vector<4x8xf32>
    %cst_29 = arith.constant dense<0.000000e+00> : vector<12x4xf32>
    %38 = tpu.matmul %33, %37, %cst_29 {dimension_numbers = #tpu.dot_dimension_numbers<[1], [1], [0], [0], [0, 0, 1, 0], [], []>} : vector<12x8xf32>, vector<4x8xf32>, vector<12x4xf32> -> vector<12x4xf32>
    %cst_30 = arith.constant dense<0xFF800000> : vector<12xf32>
    %39 = vector.multi_reduction <maximumf>, %38, %cst_30 [1] : vector<12x4xf32> to vector<12xf32>
    %40 = vector.shape_cast %39 : vector<12xf32> to vector<12x1xf32>
    %41 = vector.broadcast %40 : vector<12x1xf32> to vector<12x4xf32>
    %42 = arith.subf %38, %41 : vector<12x4xf32>
    %43 = math.exp %42 : vector<12x4xf32>
    %cst_31 = arith.constant dense<0.000000e+00> : vector<12xf32>
    %44 = vector.multi_reduction <add>, %43, %cst_31 [1] : vector<12x4xf32> to vector<12xf32>
    %45 = vector.shape_cast %44 : vector<12xf32> to vector<12x1xf32>
    %46 = tpu.reciprocal %45 {approx = true} : vector<12x1xf32> -> vector<12x1xf32>
    %47 = vector.broadcast %46 : vector<12x1xf32> to vector<12x4xf32>
    %48 = arith.mulf %43, %47 : vector<12x4xf32>
    %cst_32 = arith.constant dense<0.000000e+00> : vector<4x4xf32>
    %49 = tpu.matmul %36, %37, %cst_32 {dimension_numbers = #tpu.dot_dimension_numbers<[1], [1], [0], [0], [0, 0, 1, 0], [], []>} : vector<4x8xf32>, vector<4x8xf32>, vector<4x4xf32> -> vector<4x4xf32>
    %cst_33 = arith.constant dense<0xFF800000> : vector<4xf32>
    %50 = vector.multi_reduction <maximumf>, %49, %cst_33 [1] : vector<4x4xf32> to vector<4xf32>
    %51 = vector.shape_cast %50 : vector<4xf32> to vector<4x1xf32>
    %52 = vector.broadcast %51 : vector<4x1xf32> to vector<4x4xf32>
    %53 = arith.subf %49, %52 : vector<4x4xf32>
    %54 = math.exp %53 : vector<4x4xf32>
    %cst_34 = arith.constant dense<0.000000e+00> : vector<4xf32>
    %55 = vector.multi_reduction <add>, %54, %cst_34 [1] : vector<4x4xf32> to vector<4xf32>
    %56 = vector.shape_cast %55 : vector<4xf32> to vector<4x1xf32>
    %57 = tpu.reciprocal %56 {approx = true} : vector<4x1xf32> -> vector<4x1xf32>
    %58 = vector.broadcast %57 : vector<4x1xf32> to vector<4x4xf32>
    %59 = arith.mulf %54, %58 : vector<4x4xf32>
    %cst_35 = arith.constant dense<0.000000e+00> : vector<4x12xf32>
    %60 = tpu.matmul %36, %34, %cst_35 {dimension_numbers = #tpu.dot_dimension_numbers<[1], [1], [0], [0], [0, 0, 1, 0], [], []>} : vector<4x8xf32>, vector<12x8xf32>, vector<4x12xf32> -> vector<4x12xf32>
    %cst_36 = arith.constant dense<0xFF800000> : vector<4xf32>
    %61 = vector.multi_reduction <maximumf>, %60, %cst_36 [1] : vector<4x12xf32> to vector<4xf32>
    %62 = vector.shape_cast %61 : vector<4xf32> to vector<4x1xf32>
    %63 = vector.broadcast %62 : vector<4x1xf32> to vector<4x12xf32>
    %64 = arith.subf %60, %63 : vector<4x12xf32>
    %65 = math.exp %64 : vector<4x12xf32>
    %cst_37 = arith.constant dense<0.000000e+00> : vector<4xf32>
    %66 = vector.multi_reduction <add>, %65, %cst_37 [1] : vector<4x12xf32> to vector<4xf32>
    %67 = vector.shape_cast %66 : vector<4xf32> to vector<4x1xf32>
    %68 = tpu.reciprocal %67 {approx = true} : vector<4x1xf32> -> vector<4x1xf32>
    %69 = vector.broadcast %68 : vector<4x1xf32> to vector<4x12xf32>
    %70 = arith.mulf %65, %69 : vector<4x12xf32>
    %cst_38 = arith.constant dense<0.000000e+00> : vector<4x8xf32>
    %71 = tpu.matmul %70, %35, %cst_38 {dimension_numbers = #tpu.dot_dimension_numbers<[1], [0], [0], [1], [0, 0, 1, 1], [], []>} : vector<4x12xf32>, vector<12x8xf32>, vector<4x8xf32> -> vector<4x8xf32>
    %72 = tpu.transpose %59, [1, 0] : vector<4x4xf32> -> vector<4x4xf32>
    %73 = vector.broadcast %32 : f32 to vector<4x4xf32>
    %74 = arith.mulf %72, %73 : vector<4x4xf32>
    %cst_39 = arith.constant dense<0.000000e+00> : vector<4x4xf32>
    %75 = tpu.matmul %59, %74, %cst_39 {dimension_numbers = #tpu.dot_dimension_numbers<[1], [0], [0], [1], [0, 0, 1, 1], [], []>} : vector<4x4xf32>, vector<4x4xf32>, vector<4x4xf32> -> vector<4x4xf32>
    %cst_40 = arith.constant 7.000000e+00 : f32
    %76 = vector.broadcast %cst_40 : f32 to vector<4x4xf32>
    %77 = arith.mulf %76, %31 : vector<4x4xf32>
    %78 = arith.subf %77, %75 : vector<4x4xf32>
    %cst_41 = arith.constant 1.500000e+01 : f32
    %79 = vector.broadcast %cst_41 : f32 to vector<4x4xf32>
    %80 = arith.mulf %79, %31 : vector<4x4xf32>
    %cst_42 = arith.constant dense<0.000000e+00> : vector<4x4xf32>
    %81 = tpu.matmul %75, %78, %cst_42 {dimension_numbers = #tpu.dot_dimension_numbers<[1], [0], [0], [1], [0, 0, 1, 1], [], []>} : vector<4x4xf32>, vector<4x4xf32>, vector<4x4xf32> -> vector<4x4xf32>
    %82 = arith.subf %80, %81 : vector<4x4xf32>
    %cst_43 = arith.constant 1.300000e+01 : f32
    %83 = vector.broadcast %cst_43 : f32 to vector<4x4xf32>
    %84 = arith.mulf %83, %31 : vector<4x4xf32>
    %cst_44 = arith.constant dense<0.000000e+00> : vector<4x4xf32>
    %85 = tpu.matmul %75, %82, %cst_44 {dimension_numbers = #tpu.dot_dimension_numbers<[1], [0], [0], [1], [0, 0, 1, 1], [], []>} : vector<4x4xf32>, vector<4x4xf32>, vector<4x4xf32> -> vector<4x4xf32>
    %86 = arith.subf %84, %85 : vector<4x4xf32>
    %cst_45 = arith.constant dense<0.000000e+00> : vector<4x4xf32>
    %87 = tpu.matmul %74, %86, %cst_45 {dimension_numbers = #tpu.dot_dimension_numbers<[1], [0], [0], [1], [0, 0, 1, 1], [], []>} : vector<4x4xf32>, vector<4x4xf32>, vector<4x4xf32> -> vector<4x4xf32>
    %cst_46 = arith.constant 2.500000e-01 : f32
    %88 = vector.broadcast %cst_46 : f32 to vector<4x4xf32>
    %89 = arith.mulf %87, %88 : vector<4x4xf32>
    %cst_47 = arith.constant dense<0.000000e+00> : vector<4x4xf32>
    %90 = tpu.matmul %59, %89, %cst_47 {dimension_numbers = #tpu.dot_dimension_numbers<[1], [0], [0], [1], [0, 0, 1, 1], [], []>} : vector<4x4xf32>, vector<4x4xf32>, vector<4x4xf32> -> vector<4x4xf32>
    %cst_48 = arith.constant 7.000000e+00 : f32
    %91 = vector.broadcast %cst_48 : f32 to vector<4x4xf32>
    %92 = arith.mulf %91, %31 : vector<4x4xf32>
    %93 = arith.subf %92, %90 : vector<4x4xf32>
    %cst_49 = arith.constant 1.500000e+01 : f32
    %94 = vector.broadcast %cst_49 : f32 to vector<4x4xf32>
    %95 = arith.mulf %94, %31 : vector<4x4xf32>
    %cst_50 = arith.constant dense<0.000000e+00> : vector<4x4xf32>
    %96 = tpu.matmul %90, %93, %cst_50 {dimension_numbers = #tpu.dot_dimension_numbers<[1], [0], [0], [1], [0, 0, 1, 1], [], []>} : vector<4x4xf32>, vector<4x4xf32>, vector<4x4xf32> -> vector<4x4xf32>
    %97 = arith.subf %95, %96 : vector<4x4xf32>
    %cst_51 = arith.constant 1.300000e+01 : f32
    %98 = vector.broadcast %cst_51 : f32 to vector<4x4xf32>
    %99 = arith.mulf %98, %31 : vector<4x4xf32>
    %cst_52 = arith.constant dense<0.000000e+00> : vector<4x4xf32>
    %100 = tpu.matmul %90, %97, %cst_52 {dimension_numbers = #tpu.dot_dimension_numbers<[1], [0], [0], [1], [0, 0, 1, 1], [], []>} : vector<4x4xf32>, vector<4x4xf32>, vector<4x4xf32> -> vector<4x4xf32>
    %101 = arith.subf %99, %100 : vector<4x4xf32>
    %cst_53 = arith.constant dense<0.000000e+00> : vector<4x4xf32>
    %102 = tpu.matmul %89, %101, %cst_53 {dimension_numbers = #tpu.dot_dimension_numbers<[1], [0], [0], [1], [0, 0, 1, 1], [], []>} : vector<4x4xf32>, vector<4x4xf32>, vector<4x4xf32> -> vector<4x4xf32>
    %cst_54 = arith.constant 2.500000e-01 : f32
    %103 = vector.broadcast %cst_54 : f32 to vector<4x4xf32>
    %104 = arith.mulf %102, %103 : vector<4x4xf32>
    %cst_55 = arith.constant dense<0.000000e+00> : vector<4x4xf32>
    %105 = tpu.matmul %59, %104, %cst_55 {dimension_numbers = #tpu.dot_dimension_numbers<[1], [0], [0], [1], [0, 0, 1, 1], [], []>} : vector<4x4xf32>, vector<4x4xf32>, vector<4x4xf32> -> vector<4x4xf32>
    %cst_56 = arith.constant 7.000000e+00 : f32
    %106 = vector.broadcast %cst_56 : f32 to vector<4x4xf32>
    %107 = arith.mulf %106, %31 : vector<4x4xf32>
    %108 = arith.subf %107, %105 : vector<4x4xf32>
    %cst_57 = arith.constant 1.500000e+01 : f32
    %109 = vector.broadcast %cst_57 : f32 to vector<4x4xf32>
    %110 = arith.mulf %109, %31 : vector<4x4xf32>
    %cst_58 = arith.constant dense<0.000000e+00> : vector<4x4xf32>
    %111 = tpu.matmul %105, %108, %cst_58 {dimension_numbers = #tpu.dot_dimension_numbers<[1], [0], [0], [1], [0, 0, 1, 1], [], []>} : vector<4x4xf32>, vector<4x4xf32>, vector<4x4xf32> -> vector<4x4xf32>
    %112 = arith.subf %110, %111 : vector<4x4xf32>
    %cst_59 = arith.constant 1.300000e+01 : f32
    %113 = vector.broadcast %cst_59 : f32 to vector<4x4xf32>
    %114 = arith.mulf %113, %31 : vector<4x4xf32>
    %cst_60 = arith.constant dense<0.000000e+00> : vector<4x4xf32>
    %115 = tpu.matmul %105, %112, %cst_60 {dimension_numbers = #tpu.dot_dimension_numbers<[1], [0], [0], [1], [0, 0, 1, 1], [], []>} : vector<4x4xf32>, vector<4x4xf32>, vector<4x4xf32> -> vector<4x4xf32>
    %116 = arith.subf %114, %115 : vector<4x4xf32>
    %cst_61 = arith.constant dense<0.000000e+00> : vector<4x4xf32>
    %117 = tpu.matmul %104, %116, %cst_61 {dimension_numbers = #tpu.dot_dimension_numbers<[1], [0], [0], [1], [0, 0, 1, 1], [], []>} : vector<4x4xf32>, vector<4x4xf32>, vector<4x4xf32> -> vector<4x4xf32>
    %cst_62 = arith.constant 2.500000e-01 : f32
    %118 = vector.broadcast %cst_62 : f32 to vector<4x4xf32>
    %119 = arith.mulf %117, %118 : vector<4x4xf32>
    %cst_63 = arith.constant dense<0.000000e+00> : vector<4x4xf32>
    %120 = tpu.matmul %59, %119, %cst_63 {dimension_numbers = #tpu.dot_dimension_numbers<[1], [0], [0], [1], [0, 0, 1, 1], [], []>} : vector<4x4xf32>, vector<4x4xf32>, vector<4x4xf32> -> vector<4x4xf32>
    %cst_64 = arith.constant 7.000000e+00 : f32
    %121 = vector.broadcast %cst_64 : f32 to vector<4x4xf32>
    %122 = arith.mulf %121, %31 : vector<4x4xf32>
    %123 = arith.subf %122, %120 : vector<4x4xf32>
    %cst_65 = arith.constant 1.500000e+01 : f32
    %124 = vector.broadcast %cst_65 : f32 to vector<4x4xf32>
    %125 = arith.mulf %124, %31 : vector<4x4xf32>
    %cst_66 = arith.constant dense<0.000000e+00> : vector<4x4xf32>
    %126 = tpu.matmul %120, %123, %cst_66 {dimension_numbers = #tpu.dot_dimension_numbers<[1], [0], [0], [1], [0, 0, 1, 1], [], []>} : vector<4x4xf32>, vector<4x4xf32>, vector<4x4xf32> -> vector<4x4xf32>
    %127 = arith.subf %125, %126 : vector<4x4xf32>
    %cst_67 = arith.constant 1.300000e+01 : f32
    %128 = vector.broadcast %cst_67 : f32 to vector<4x4xf32>
    %129 = arith.mulf %128, %31 : vector<4x4xf32>
    %cst_68 = arith.constant dense<0.000000e+00> : vector<4x4xf32>
    %130 = tpu.matmul %120, %127, %cst_68 {dimension_numbers = #tpu.dot_dimension_numbers<[1], [0], [0], [1], [0, 0, 1, 1], [], []>} : vector<4x4xf32>, vector<4x4xf32>, vector<4x4xf32> -> vector<4x4xf32>
    %131 = arith.subf %129, %130 : vector<4x4xf32>
    %cst_69 = arith.constant dense<0.000000e+00> : vector<4x4xf32>
    %132 = tpu.matmul %119, %131, %cst_69 {dimension_numbers = #tpu.dot_dimension_numbers<[1], [0], [0], [1], [0, 0, 1, 1], [], []>} : vector<4x4xf32>, vector<4x4xf32>, vector<4x4xf32> -> vector<4x4xf32>
    %cst_70 = arith.constant 2.500000e-01 : f32
    %133 = vector.broadcast %cst_70 : f32 to vector<4x4xf32>
    %134 = arith.mulf %132, %133 : vector<4x4xf32>
    %cst_71 = arith.constant dense<0.000000e+00> : vector<4x4xf32>
    %135 = tpu.matmul %59, %134, %cst_71 {dimension_numbers = #tpu.dot_dimension_numbers<[1], [0], [0], [1], [0, 0, 1, 1], [], []>} : vector<4x4xf32>, vector<4x4xf32>, vector<4x4xf32> -> vector<4x4xf32>
    %cst_72 = arith.constant 7.000000e+00 : f32
    %136 = vector.broadcast %cst_72 : f32 to vector<4x4xf32>
    %137 = arith.mulf %136, %31 : vector<4x4xf32>
    %138 = arith.subf %137, %135 : vector<4x4xf32>
    %cst_73 = arith.constant 1.500000e+01 : f32
    %139 = vector.broadcast %cst_73 : f32 to vector<4x4xf32>
    %140 = arith.mulf %139, %31 : vector<4x4xf32>
    %cst_74 = arith.constant dense<0.000000e+00> : vector<4x4xf32>
    %141 = tpu.matmul %135, %138, %cst_74 {dimension_numbers = #tpu.dot_dimension_numbers<[1], [0], [0], [1], [0, 0, 1, 1], [], []>} : vector<4x4xf32>, vector<4x4xf32>, vector<4x4xf32> -> vector<4x4xf32>
    %142 = arith.subf %140, %141 : vector<4x4xf32>
    %cst_75 = arith.constant 1.300000e+01 : f32
    %143 = vector.broadcast %cst_75 : f32 to vector<4x4xf32>
    %144 = arith.mulf %143, %31 : vector<4x4xf32>
    %cst_76 = arith.constant dense<0.000000e+00> : vector<4x4xf32>
    %145 = tpu.matmul %135, %142, %cst_76 {dimension_numbers = #tpu.dot_dimension_numbers<[1], [0], [0], [1], [0, 0, 1, 1], [], []>} : vector<4x4xf32>, vector<4x4xf32>, vector<4x4xf32> -> vector<4x4xf32>
    %146 = arith.subf %144, %145 : vector<4x4xf32>
    %cst_77 = arith.constant dense<0.000000e+00> : vector<4x4xf32>
    %147 = tpu.matmul %134, %146, %cst_77 {dimension_numbers = #tpu.dot_dimension_numbers<[1], [0], [0], [1], [0, 0, 1, 1], [], []>} : vector<4x4xf32>, vector<4x4xf32>, vector<4x4xf32> -> vector<4x4xf32>
    %cst_78 = arith.constant 2.500000e-01 : f32
    %148 = vector.broadcast %cst_78 : f32 to vector<4x4xf32>
    %149 = arith.mulf %147, %148 : vector<4x4xf32>
    %cst_79 = arith.constant dense<0.000000e+00> : vector<4x4xf32>
    %150 = tpu.matmul %59, %149, %cst_79 {dimension_numbers = #tpu.dot_dimension_numbers<[1], [0], [0], [1], [0, 0, 1, 1], [], []>} : vector<4x4xf32>, vector<4x4xf32>, vector<4x4xf32> -> vector<4x4xf32>
    %cst_80 = arith.constant 7.000000e+00 : f32
    %151 = vector.broadcast %cst_80 : f32 to vector<4x4xf32>
    %152 = arith.mulf %151, %31 : vector<4x4xf32>
    %153 = arith.subf %152, %150 : vector<4x4xf32>
    %cst_81 = arith.constant 1.500000e+01 : f32
    %154 = vector.broadcast %cst_81 : f32 to vector<4x4xf32>
    %155 = arith.mulf %154, %31 : vector<4x4xf32>
    %cst_82 = arith.constant dense<0.000000e+00> : vector<4x4xf32>
    %156 = tpu.matmul %150, %153, %cst_82 {dimension_numbers = #tpu.dot_dimension_numbers<[1], [0], [0], [1], [0, 0, 1, 1], [], []>} : vector<4x4xf32>, vector<4x4xf32>, vector<4x4xf32> -> vector<4x4xf32>
    %157 = arith.subf %155, %156 : vector<4x4xf32>
    %cst_83 = arith.constant 1.300000e+01 : f32
    %158 = vector.broadcast %cst_83 : f32 to vector<4x4xf32>
    %159 = arith.mulf %158, %31 : vector<4x4xf32>
    %cst_84 = arith.constant dense<0.000000e+00> : vector<4x4xf32>
    %160 = tpu.matmul %150, %157, %cst_84 {dimension_numbers = #tpu.dot_dimension_numbers<[1], [0], [0], [1], [0, 0, 1, 1], [], []>} : vector<4x4xf32>, vector<4x4xf32>, vector<4x4xf32> -> vector<4x4xf32>
    %161 = arith.subf %159, %160 : vector<4x4xf32>
    %cst_85 = arith.constant dense<0.000000e+00> : vector<4x4xf32>
    %162 = tpu.matmul %149, %161, %cst_85 {dimension_numbers = #tpu.dot_dimension_numbers<[1], [0], [0], [1], [0, 0, 1, 1], [], []>} : vector<4x4xf32>, vector<4x4xf32>, vector<4x4xf32> -> vector<4x4xf32>
    %cst_86 = arith.constant 2.500000e-01 : f32
    %163 = vector.broadcast %cst_86 : f32 to vector<4x4xf32>
    %164 = arith.mulf %162, %163 : vector<4x4xf32>
    %cst_87 = arith.constant dense<0.000000e+00> : vector<12x4xf32>
    %165 = tpu.matmul %48, %164, %cst_87 {dimension_numbers = #tpu.dot_dimension_numbers<[1], [0], [0], [1], [0, 0, 1, 1], [], []>} : vector<12x4xf32>, vector<4x4xf32>, vector<12x4xf32> -> vector<12x4xf32>
    %cst_88 = arith.constant dense<0.000000e+00> : vector<12x8xf32>
    %166 = tpu.matmul %165, %71, %cst_88 {dimension_numbers = #tpu.dot_dimension_numbers<[1], [0], [0], [1], [0, 0, 1, 1], [], []>} : vector<12x4xf32>, vector<4x8xf32>, vector<12x8xf32> -> vector<12x8xf32>
    %c0_89 = arith.constant 0 : index
    %c0_90 = arith.constant 0 : index
    %167 = vector.load %arg14[%c0_89, %c0_90] : memref<12x32xf32, #tpu.memory_space<vmem>>, vector<12x8xf32>
    tpu.vector_store %arg14[%c0_89, %c0_90], %166 {strides = array<i32>} : memref<12x32xf32, #tpu.memory_space<vmem>>, vector<12x8xf32>,
    %168 = vector.extract_strided_slice %14 {offsets = [0, 8], sizes = [12, 8], strides = [1, 1]} : vector<12x32xf32> to vector<12x8xf32>
    %169 = vector.extract_strided_slice %19 {offsets = [0, 8], sizes = [12, 8], strides = [1, 1]} : vector<12x32xf32> to vector<12x8xf32>
    %170 = vector.extract_strided_slice %22 {offsets = [0, 8], sizes = [12, 8], strides = [1, 1]} : vector<12x32xf32> to vector<12x8xf32>
    %171 = vector.extract_strided_slice %24 {offsets = [0, 8], sizes = [4, 8], strides = [1, 1]} : vector<4x32xf32> to vector<4x8xf32>
    %172 = vector.extract_strided_slice %26 {offsets = [0, 8], sizes = [4, 8], strides = [1, 1]} : vector<4x32xf32> to vector<4x8xf32>
    %cst_91 = arith.constant dense<0.000000e+00> : vector<12x4xf32>
    %173 = tpu.matmul %168, %172, %cst_91 {dimension_numbers = #tpu.dot_dimension_numbers<[1], [1], [0], [0], [0, 0, 1, 0], [], []>} : vector<12x8xf32>, vector<4x8xf32>, vector<12x4xf32> -> vector<12x4xf32>
    %cst_92 = arith.constant dense<0xFF800000> : vector<12xf32>
    %174 = vector.multi_reduction <maximumf>, %173, %cst_92 [1] : vector<12x4xf32> to vector<12xf32>
    %175 = vector.shape_cast %174 : vector<12xf32> to vector<12x1xf32>
    %176 = vector.broadcast %175 : vector<12x1xf32> to vector<12x4xf32>
    %177 = arith.subf %173, %176 : vector<12x4xf32>
    %178 = math.exp %177 : vector<12x4xf32>
    %cst_93 = arith.constant dense<0.000000e+00> : vector<12xf32>
    %179 = vector.multi_reduction <add>, %178, %cst_93 [1] : vector<12x4xf32> to vector<12xf32>
    %180 = vector.shape_cast %179 : vector<12xf32> to vector<12x1xf32>
    %181 = tpu.reciprocal %180 {approx = true} : vector<12x1xf32> -> vector<12x1xf32>
    %182 = vector.broadcast %181 : vector<12x1xf32> to vector<12x4xf32>
    %183 = arith.mulf %178, %182 : vector<12x4xf32>
    %cst_94 = arith.constant dense<0.000000e+00> : vector<4x4xf32>
    %184 = tpu.matmul %171, %172, %cst_94 {dimension_numbers = #tpu.dot_dimension_numbers<[1], [1], [0], [0], [0, 0, 1, 0], [], []>} : vector<4x8xf32>, vector<4x8xf32>, vector<4x4xf32> -> vector<4x4xf32>
    %cst_95 = arith.constant dense<0xFF800000> : vector<4xf32>
    %185 = vector.multi_reduction <maximumf>, %184, %cst_95 [1] : vector<4x4xf32> to vector<4xf32>
    %186 = vector.shape_cast %185 : vector<4xf32> to vector<4x1xf32>
    %187 = vector.broadcast %186 : vector<4x1xf32> to vector<4x4xf32>
    %188 = arith.subf %184, %187 : vector<4x4xf32>
    %189 = math.exp %188 : vector<4x4xf32>
    %cst_96 = arith.constant dense<0.000000e+00> : vector<4xf32>
    %190 = vector.multi_reduction <add>, %189, %cst_96 [1] : vector<4x4xf32> to vector<4xf32>
    %191 = vector.shape_cast %190 : vector<4xf32> to vector<4x1xf32>
    %192 = tpu.reciprocal %191 {approx = true} : vector<4x1xf32> -> vector<4x1xf32>
    %193 = vector.broadcast %192 : vector<4x1xf32> to vector<4x4xf32>
    %194 = arith.mulf %189, %193 : vector<4x4xf32>
    %cst_97 = arith.constant dense<0.000000e+00> : vector<4x12xf32>
    %195 = tpu.matmul %171, %169, %cst_97 {dimension_numbers = #tpu.dot_dimension_numbers<[1], [1], [0], [0], [0, 0, 1, 0], [], []>} : vector<4x8xf32>, vector<12x8xf32>, vector<4x12xf32> -> vector<4x12xf32>
    %cst_98 = arith.constant dense<0xFF800000> : vector<4xf32>
    %196 = vector.multi_reduction <maximumf>, %195, %cst_98 [1] : vector<4x12xf32> to vector<4xf32>
    %197 = vector.shape_cast %196 : vector<4xf32> to vector<4x1xf32>
    %198 = vector.broadcast %197 : vector<4x1xf32> to vector<4x12xf32>
    %199 = arith.subf %195, %198 : vector<4x12xf32>
    %200 = math.exp %199 : vector<4x12xf32>
    %cst_99 = arith.constant dense<0.000000e+00> : vector<4xf32>
    %201 = vector.multi_reduction <add>, %200, %cst_99 [1] : vector<4x12xf32> to vector<4xf32>
    %202 = vector.shape_cast %201 : vector<4xf32> to vector<4x1xf32>
    %203 = tpu.reciprocal %202 {approx = true} : vector<4x1xf32> -> vector<4x1xf32>
    %204 = vector.broadcast %203 : vector<4x1xf32> to vector<4x12xf32>
    %205 = arith.mulf %200, %204 : vector<4x12xf32>
    %cst_100 = arith.constant dense<0.000000e+00> : vector<4x8xf32>
    %206 = tpu.matmul %205, %170, %cst_100 {dimension_numbers = #tpu.dot_dimension_numbers<[1], [0], [0], [1], [0, 0, 1, 1], [], []>} : vector<4x12xf32>, vector<12x8xf32>, vector<4x8xf32> -> vector<4x8xf32>
    %207 = tpu.transpose %194, [1, 0] : vector<4x4xf32> -> vector<4x4xf32>
    %208 = vector.broadcast %32 : f32 to vector<4x4xf32>
    %209 = arith.mulf %207, %208 : vector<4x4xf32>
    %cst_101 = arith.constant dense<0.000000e+00> : vector<4x4xf32>
    %210 = tpu.matmul %194, %209, %cst_101 {dimension_numbers = #tpu.dot_dimension_numbers<[1], [0], [0], [1], [0, 0, 1, 1], [], []>} : vector<4x4xf32>, vector<4x4xf32>, vector<4x4xf32> -> vector<4x4xf32>
    %cst_102 = arith.constant 7.000000e+00 : f32
    %211 = vector.broadcast %cst_102 : f32 to vector<4x4xf32>
    %212 = arith.mulf %211, %31 : vector<4x4xf32>
    %213 = arith.subf %212, %210 : vector<4x4xf32>
    %cst_103 = arith.constant 1.500000e+01 : f32
    %214 = vector.broadcast %cst_103 : f32 to vector<4x4xf32>
    %215 = arith.mulf %214, %31 : vector<4x4xf32>
    %cst_104 = arith.constant dense<0.000000e+00> : vector<4x4xf32>
    %216 = tpu.matmul %210, %213, %cst_104 {dimension_numbers = #tpu.dot_dimension_numbers<[1], [0], [0], [1], [0, 0, 1, 1], [], []>} : vector<4x4xf32>, vector<4x4xf32>, vector<4x4xf32> -> vector<4x4xf32>
    %217 = arith.subf %215, %216 : vector<4x4xf32>
    %cst_105 = arith.constant 1.300000e+01 : f32
    %218 = vector.broadcast %cst_105 : f32 to vector<4x4xf32>
    %219 = arith.mulf %218, %31 : vector<4x4xf32>
    %cst_106 = arith.constant dense<0.000000e+00> : vector<4x4xf32>
    %220 = tpu.matmul %210, %217, %cst_106 {dimension_numbers = #tpu.dot_dimension_numbers<[1], [0], [0], [1], [0, 0, 1, 1], [], []>} : vector<4x4xf32>, vector<4x4xf32>, vector<4x4xf32> -> vector<4x4xf32>
    %221 = arith.subf %219, %220 : vector<4x4xf32>
    %cst_107 = arith.constant dense<0.000000e+00> : vector<4x4xf32>
    %222 = tpu.matmul %209, %221, %cst_107 {dimension_numbers = #tpu.dot_dimension_numbers<[1], [0], [0], [1], [0, 0, 1, 1], [], []>} : vector<4x4xf32>, vector<4x4xf32>, vector<4x4xf32> -> vector<4x4xf32>
    %cst_108 = arith.constant 2.500000e-01 : f32
    %223 = vector.broadcast %cst_108 : f32 to vector<4x4xf32>
    %224 = arith.mulf %222, %223 : vector<4x4xf32>
    %cst_109 = arith.constant dense<0.000000e+00> : vector<4x4xf32>
    %225 = tpu.matmul %194, %224, %cst_109 {dimension_numbers = #tpu.dot_dimension_numbers<[1], [0], [0], [1], [0, 0, 1, 1], [], []>} : vector<4x4xf32>, vector<4x4xf32>, vector<4x4xf32> -> vector<4x4xf32>
    %cst_110 = arith.constant 7.000000e+00 : f32
    %226 = vector.broadcast %cst_110 : f32 to vector<4x4xf32>
    %227 = arith.mulf %226, %31 : vector<4x4xf32>
    %228 = arith.subf %227, %225 : vector<4x4xf32>
    %cst_111 = arith.constant 1.500000e+01 : f32
    %229 = vector.broadcast %cst_111 : f32 to vector<4x4xf32>
    %230 = arith.mulf %229, %31 : vector<4x4xf32>
    %cst_112 = arith.constant dense<0.000000e+00> : vector<4x4xf32>
    %231 = tpu.matmul %225, %228, %cst_112 {dimension_numbers = #tpu.dot_dimension_numbers<[1], [0], [0], [1], [0, 0, 1, 1], [], []>} : vector<4x4xf32>, vector<4x4xf32>, vector<4x4xf32> -> vector<4x4xf32>
    %232 = arith.subf %230, %231 : vector<4x4xf32>
    %cst_113 = arith.constant 1.300000e+01 : f32
    %233 = vector.broadcast %cst_113 : f32 to vector<4x4xf32>
    %234 = arith.mulf %233, %31 : vector<4x4xf32>
    %cst_114 = arith.constant dense<0.000000e+00> : vector<4x4xf32>
    %235 = tpu.matmul %225, %232, %cst_114 {dimension_numbers = #tpu.dot_dimension_numbers<[1], [0], [0], [1], [0, 0, 1, 1], [], []>} : vector<4x4xf32>, vector<4x4xf32>, vector<4x4xf32> -> vector<4x4xf32>
    %236 = arith.subf %234, %235 : vector<4x4xf32>
    %cst_115 = arith.constant dense<0.000000e+00> : vector<4x4xf32>
    %237 = tpu.matmul %224, %236, %cst_115 {dimension_numbers = #tpu.dot_dimension_numbers<[1], [0], [0], [1], [0, 0, 1, 1], [], []>} : vector<4x4xf32>, vector<4x4xf32>, vector<4x4xf32> -> vector<4x4xf32>
    %cst_116 = arith.constant 2.500000e-01 : f32
    %238 = vector.broadcast %cst_116 : f32 to vector<4x4xf32>
    %239 = arith.mulf %237, %238 : vector<4x4xf32>
    %cst_117 = arith.constant dense<0.000000e+00> : vector<4x4xf32>
    %240 = tpu.matmul %194, %239, %cst_117 {dimension_numbers = #tpu.dot_dimension_numbers<[1], [0], [0], [1], [0, 0, 1, 1], [], []>} : vector<4x4xf32>, vector<4x4xf32>, vector<4x4xf32> -> vector<4x4xf32>
    %cst_118 = arith.constant 7.000000e+00 : f32
    %241 = vector.broadcast %cst_118 : f32 to vector<4x4xf32>
    %242 = arith.mulf %241, %31 : vector<4x4xf32>
    %243 = arith.subf %242, %240 : vector<4x4xf32>
    %cst_119 = arith.constant 1.500000e+01 : f32
    %244 = vector.broadcast %cst_119 : f32 to vector<4x4xf32>
    %245 = arith.mulf %244, %31 : vector<4x4xf32>
    %cst_120 = arith.constant dense<0.000000e+00> : vector<4x4xf32>
    %246 = tpu.matmul %240, %243, %cst_120 {dimension_numbers = #tpu.dot_dimension_numbers<[1], [0], [0], [1], [0, 0, 1, 1], [], []>} : vector<4x4xf32>, vector<4x4xf32>, vector<4x4xf32> -> vector<4x4xf32>
    %247 = arith.subf %245, %246 : vector<4x4xf32>
    %cst_121 = arith.constant 1.300000e+01 : f32
    %248 = vector.broadcast %cst_121 : f32 to vector<4x4xf32>
    %249 = arith.mulf %248, %31 : vector<4x4xf32>
    %cst_122 = arith.constant dense<0.000000e+00> : vector<4x4xf32>
    %250 = tpu.matmul %240, %247, %cst_122 {dimension_numbers = #tpu.dot_dimension_numbers<[1], [0], [0], [1], [0, 0, 1, 1], [], []>} : vector<4x4xf32>, vector<4x4xf32>, vector<4x4xf32> -> vector<4x4xf32>
    %251 = arith.subf %249, %250 : vector<4x4xf32>
    %cst_123 = arith.constant dense<0.000000e+00> : vector<4x4xf32>
    %252 = tpu.matmul %239, %251, %cst_123 {dimension_numbers = #tpu.dot_dimension_numbers<[1], [0], [0], [1], [0, 0, 1, 1], [], []>} : vector<4x4xf32>, vector<4x4xf32>, vector<4x4xf32> -> vector<4x4xf32>
    %cst_124 = arith.constant 2.500000e-01 : f32
    %253 = vector.broadcast %cst_124 : f32 to vector<4x4xf32>
    %254 = arith.mulf %252, %253 : vector<4x4xf32>
    %cst_125 = arith.constant dense<0.000000e+00> : vector<4x4xf32>
    %255 = tpu.matmul %194, %254, %cst_125 {dimension_numbers = #tpu.dot_dimension_numbers<[1], [0], [0], [1], [0, 0, 1, 1], [], []>} : vector<4x4xf32>, vector<4x4xf32>, vector<4x4xf32> -> vector<4x4xf32>
    %cst_126 = arith.constant 7.000000e+00 : f32
    %256 = vector.broadcast %cst_126 : f32 to vector<4x4xf32>
    %257 = arith.mulf %256, %31 : vector<4x4xf32>
    %258 = arith.subf %257, %255 : vector<4x4xf32>
    %cst_127 = arith.constant 1.500000e+01 : f32
    %259 = vector.broadcast %cst_127 : f32 to vector<4x4xf32>
    %260 = arith.mulf %259, %31 : vector<4x4xf32>
    %cst_128 = arith.constant dense<0.000000e+00> : vector<4x4xf32>
    %261 = tpu.matmul %255, %258, %cst_128 {dimension_numbers = #tpu.dot_dimension_numbers<[1], [0], [0], [1], [0, 0, 1, 1], [], []>} : vector<4x4xf32>, vector<4x4xf32>, vector<4x4xf32> -> vector<4x4xf32>
    %262 = arith.subf %260, %261 : vector<4x4xf32>
    %cst_129 = arith.constant 1.300000e+01 : f32
    %263 = vector.broadcast %cst_129 : f32 to vector<4x4xf32>
    %264 = arith.mulf %263, %31 : vector<4x4xf32>
    %cst_130 = arith.constant dense<0.000000e+00> : vector<4x4xf32>
    %265 = tpu.matmul %255, %262, %cst_130 {dimension_numbers = #tpu.dot_dimension_numbers<[1], [0], [0], [1], [0, 0, 1, 1], [], []>} : vector<4x4xf32>, vector<4x4xf32>, vector<4x4xf32> -> vector<4x4xf32>
    %266 = arith.subf %264, %265 : vector<4x4xf32>
    %cst_131 = arith.constant dense<0.000000e+00> : vector<4x4xf32>
    %267 = tpu.matmul %254, %266, %cst_131 {dimension_numbers = #tpu.dot_dimension_numbers<[1], [0], [0], [1], [0, 0, 1, 1], [], []>} : vector<4x4xf32>, vector<4x4xf32>, vector<4x4xf32> -> vector<4x4xf32>
    %cst_132 = arith.constant 2.500000e-01 : f32
    %268 = vector.broadcast %cst_132 : f32 to vector<4x4xf32>
    %269 = arith.mulf %267, %268 : vector<4x4xf32>
    %cst_133 = arith.constant dense<0.000000e+00> : vector<4x4xf32>
    %270 = tpu.matmul %194, %269, %cst_133 {dimension_numbers = #tpu.dot_dimension_numbers<[1], [0], [0], [1], [0, 0, 1, 1], [], []>} : vector<4x4xf32>, vector<4x4xf32>, vector<4x4xf32> -> vector<4x4xf32>
    %cst_134 = arith.constant 7.000000e+00 : f32
    %271 = vector.broadcast %cst_134 : f32 to vector<4x4xf32>
    %272 = arith.mulf %271, %31 : vector<4x4xf32>
    %273 = arith.subf %272, %270 : vector<4x4xf32>
    %cst_135 = arith.constant 1.500000e+01 : f32
    %274 = vector.broadcast %cst_135 : f32 to vector<4x4xf32>
    %275 = arith.mulf %274, %31 : vector<4x4xf32>
    %cst_136 = arith.constant dense<0.000000e+00> : vector<4x4xf32>
    %276 = tpu.matmul %270, %273, %cst_136 {dimension_numbers = #tpu.dot_dimension_numbers<[1], [0], [0], [1], [0, 0, 1, 1], [], []>} : vector<4x4xf32>, vector<4x4xf32>, vector<4x4xf32> -> vector<4x4xf32>
    %277 = arith.subf %275, %276 : vector<4x4xf32>
    %cst_137 = arith.constant 1.300000e+01 : f32
    %278 = vector.broadcast %cst_137 : f32 to vector<4x4xf32>
    %279 = arith.mulf %278, %31 : vector<4x4xf32>
    %cst_138 = arith.constant dense<0.000000e+00> : vector<4x4xf32>
    %280 = tpu.matmul %270, %277, %cst_138 {dimension_numbers = #tpu.dot_dimension_numbers<[1], [0], [0], [1], [0, 0, 1, 1], [], []>} : vector<4x4xf32>, vector<4x4xf32>, vector<4x4xf32> -> vector<4x4xf32>
    %281 = arith.subf %279, %280 : vector<4x4xf32>
    %cst_139 = arith.constant dense<0.000000e+00> : vector<4x4xf32>
    %282 = tpu.matmul %269, %281, %cst_139 {dimension_numbers = #tpu.dot_dimension_numbers<[1], [0], [0], [1], [0, 0, 1, 1], [], []>} : vector<4x4xf32>, vector<4x4xf32>, vector<4x4xf32> -> vector<4x4xf32>
    %cst_140 = arith.constant 2.500000e-01 : f32
    %283 = vector.broadcast %cst_140 : f32 to vector<4x4xf32>
    %284 = arith.mulf %282, %283 : vector<4x4xf32>
    %cst_141 = arith.constant dense<0.000000e+00> : vector<4x4xf32>
    %285 = tpu.matmul %194, %284, %cst_141 {dimension_numbers = #tpu.dot_dimension_numbers<[1], [0], [0], [1], [0, 0, 1, 1], [], []>} : vector<4x4xf32>, vector<4x4xf32>, vector<4x4xf32> -> vector<4x4xf32>
    %cst_142 = arith.constant 7.000000e+00 : f32
    %286 = vector.broadcast %cst_142 : f32 to vector<4x4xf32>
    %287 = arith.mulf %286, %31 : vector<4x4xf32>
    %288 = arith.subf %287, %285 : vector<4x4xf32>
    %cst_143 = arith.constant 1.500000e+01 : f32
    %289 = vector.broadcast %cst_143 : f32 to vector<4x4xf32>
    %290 = arith.mulf %289, %31 : vector<4x4xf32>
    %cst_144 = arith.constant dense<0.000000e+00> : vector<4x4xf32>
    %291 = tpu.matmul %285, %288, %cst_144 {dimension_numbers = #tpu.dot_dimension_numbers<[1], [0], [0], [1], [0, 0, 1, 1], [], []>} : vector<4x4xf32>, vector<4x4xf32>, vector<4x4xf32> -> vector<4x4xf32>
    %292 = arith.subf %290, %291 : vector<4x4xf32>
    %cst_145 = arith.constant 1.300000e+01 : f32
    %293 = vector.broadcast %cst_145 : f32 to vector<4x4xf32>
    %294 = arith.mulf %293, %31 : vector<4x4xf32>
    %cst_146 = arith.constant dense<0.000000e+00> : vector<4x4xf32>
    %295 = tpu.matmul %285, %292, %cst_146 {dimension_numbers = #tpu.dot_dimension_numbers<[1], [0], [0], [1], [0, 0, 1, 1], [], []>} : vector<4x4xf32>, vector<4x4xf32>, vector<4x4xf32> -> vector<4x4xf32>
    %296 = arith.subf %294, %295 : vector<4x4xf32>
    %cst_147 = arith.constant dense<0.000000e+00> : vector<4x4xf32>
    %297 = tpu.matmul %284, %296, %cst_147 {dimension_numbers = #tpu.dot_dimension_numbers<[1], [0], [0], [1], [0, 0, 1, 1], [], []>} : vector<4x4xf32>, vector<4x4xf32>, vector<4x4xf32> -> vector<4x4xf32>
    %cst_148 = arith.constant 2.500000e-01 : f32
    %298 = vector.broadcast %cst_148 : f32 to vector<4x4xf32>
    %299 = arith.mulf %297, %298 : vector<4x4xf32>
    %cst_149 = arith.constant dense<0.000000e+00> : vector<12x4xf32>
    %300 = tpu.matmul %183, %299, %cst_149 {dimension_numbers = #tpu.dot_dimension_numbers<[1], [0], [0], [1], [0, 0, 1, 1], [], []>} : vector<12x4xf32>, vector<4x4xf32>, vector<12x4xf32> -> vector<12x4xf32>
    %cst_150 = arith.constant dense<0.000000e+00> : vector<12x8xf32>
    %301 = tpu.matmul %300, %206, %cst_150 {dimension_numbers = #tpu.dot_dimension_numbers<[1], [0], [0], [1], [0, 0, 1, 1], [], []>} : vector<12x4xf32>, vector<4x8xf32>, vector<12x8xf32> -> vector<12x8xf32>
    %c0_151 = arith.constant 0 : index
    %c8 = arith.constant 8 : index
    %302 = vector.load %arg14[%c0_151, %c8] : memref<12x32xf32, #tpu.memory_space<vmem>>, vector<12x8xf32>
    tpu.vector_store %arg14[%c0_151, %c8], %301 {strides = array<i32>} : memref<12x32xf32, #tpu.memory_space<vmem>>, vector<12x8xf32>,
    %303 = vector.extract_strided_slice %14 {offsets = [0, 16], sizes = [12, 8], strides = [1, 1]} : vector<12x32xf32> to vector<12x8xf32>
    %304 = vector.extract_strided_slice %19 {offsets = [0, 16], sizes = [12, 8], strides = [1, 1]} : vector<12x32xf32> to vector<12x8xf32>
    %305 = vector.extract_strided_slice %22 {offsets = [0, 16], sizes = [12, 8], strides = [1, 1]} : vector<12x32xf32> to vector<12x8xf32>
    %306 = vector.extract_strided_slice %24 {offsets = [0, 16], sizes = [4, 8], strides = [1, 1]} : vector<4x32xf32> to vector<4x8xf32>
    %307 = vector.extract_strided_slice %26 {offsets = [0, 16], sizes = [4, 8], strides = [1, 1]} : vector<4x32xf32> to vector<4x8xf32>
    %cst_152 = arith.constant dense<0.000000e+00> : vector<12x4xf32>
    %308 = tpu.matmul %303, %307, %cst_152 {dimension_numbers = #tpu.dot_dimension_numbers<[1], [1], [0], [0], [0, 0, 1, 0], [], []>} : vector<12x8xf32>, vector<4x8xf32>, vector<12x4xf32> -> vector<12x4xf32>
    %cst_153 = arith.constant dense<0xFF800000> : vector<12xf32>
    %309 = vector.multi_reduction <maximumf>, %308, %cst_153 [1] : vector<12x4xf32> to vector<12xf32>
    %310 = vector.shape_cast %309 : vector<12xf32> to vector<12x1xf32>
    %311 = vector.broadcast %310 : vector<12x1xf32> to vector<12x4xf32>
    %312 = arith.subf %308, %311 : vector<12x4xf32>
    %313 = math.exp %312 : vector<12x4xf32>
    %cst_154 = arith.constant dense<0.000000e+00> : vector<12xf32>
    %314 = vector.multi_reduction <add>, %313, %cst_154 [1] : vector<12x4xf32> to vector<12xf32>
    %315 = vector.shape_cast %314 : vector<12xf32> to vector<12x1xf32>
    %316 = tpu.reciprocal %315 {approx = true} : vector<12x1xf32> -> vector<12x1xf32>
    %317 = vector.broadcast %316 : vector<12x1xf32> to vector<12x4xf32>
    %318 = arith.mulf %313, %317 : vector<12x4xf32>
    %cst_155 = arith.constant dense<0.000000e+00> : vector<4x4xf32>
    %319 = tpu.matmul %306, %307, %cst_155 {dimension_numbers = #tpu.dot_dimension_numbers<[1], [1], [0], [0], [0, 0, 1, 0], [], []>} : vector<4x8xf32>, vector<4x8xf32>, vector<4x4xf32> -> vector<4x4xf32>
    %cst_156 = arith.constant dense<0xFF800000> : vector<4xf32>
    %320 = vector.multi_reduction <maximumf>, %319, %cst_156 [1] : vector<4x4xf32> to vector<4xf32>
    %321 = vector.shape_cast %320 : vector<4xf32> to vector<4x1xf32>
    %322 = vector.broadcast %321 : vector<4x1xf32> to vector<4x4xf32>
    %323 = arith.subf %319, %322 : vector<4x4xf32>
    %324 = math.exp %323 : vector<4x4xf32>
    %cst_157 = arith.constant dense<0.000000e+00> : vector<4xf32>
    %325 = vector.multi_reduction <add>, %324, %cst_157 [1] : vector<4x4xf32> to vector<4xf32>
    %326 = vector.shape_cast %325 : vector<4xf32> to vector<4x1xf32>
    %327 = tpu.reciprocal %326 {approx = true} : vector<4x1xf32> -> vector<4x1xf32>
    %328 = vector.broadcast %327 : vector<4x1xf32> to vector<4x4xf32>
    %329 = arith.mulf %324, %328 : vector<4x4xf32>
    %cst_158 = arith.constant dense<0.000000e+00> : vector<4x12xf32>
    %330 = tpu.matmul %306, %304, %cst_158 {dimension_numbers = #tpu.dot_dimension_numbers<[1], [1], [0], [0], [0, 0, 1, 0], [], []>} : vector<4x8xf32>, vector<12x8xf32>, vector<4x12xf32> -> vector<4x12xf32>
    %cst_159 = arith.constant dense<0xFF800000> : vector<4xf32>
    %331 = vector.multi_reduction <maximumf>, %330, %cst_159 [1] : vector<4x12xf32> to vector<4xf32>
    %332 = vector.shape_cast %331 : vector<4xf32> to vector<4x1xf32>
    %333 = vector.broadcast %332 : vector<4x1xf32> to vector<4x12xf32>
    %334 = arith.subf %330, %333 : vector<4x12xf32>
    %335 = math.exp %334 : vector<4x12xf32>
    %cst_160 = arith.constant dense<0.000000e+00> : vector<4xf32>
    %336 = vector.multi_reduction <add>, %335, %cst_160 [1] : vector<4x12xf32> to vector<4xf32>
    %337 = vector.shape_cast %336 : vector<4xf32> to vector<4x1xf32>
    %338 = tpu.reciprocal %337 {approx = true} : vector<4x1xf32> -> vector<4x1xf32>
    %339 = vector.broadcast %338 : vector<4x1xf32> to vector<4x12xf32>
    %340 = arith.mulf %335, %339 : vector<4x12xf32>
    %cst_161 = arith.constant dense<0.000000e+00> : vector<4x8xf32>
    %341 = tpu.matmul %340, %305, %cst_161 {dimension_numbers = #tpu.dot_dimension_numbers<[1], [0], [0], [1], [0, 0, 1, 1], [], []>} : vector<4x12xf32>, vector<12x8xf32>, vector<4x8xf32> -> vector<4x8xf32>
    %342 = tpu.transpose %329, [1, 0] : vector<4x4xf32> -> vector<4x4xf32>
    %343 = vector.broadcast %32 : f32 to vector<4x4xf32>
    %344 = arith.mulf %342, %343 : vector<4x4xf32>
    %cst_162 = arith.constant dense<0.000000e+00> : vector<4x4xf32>
    %345 = tpu.matmul %329, %344, %cst_162 {dimension_numbers = #tpu.dot_dimension_numbers<[1], [0], [0], [1], [0, 0, 1, 1], [], []>} : vector<4x4xf32>, vector<4x4xf32>, vector<4x4xf32> -> vector<4x4xf32>
    %cst_163 = arith.constant 7.000000e+00 : f32
    %346 = vector.broadcast %cst_163 : f32 to vector<4x4xf32>
    %347 = arith.mulf %346, %31 : vector<4x4xf32>
    %348 = arith.subf %347, %345 : vector<4x4xf32>
    %cst_164 = arith.constant 1.500000e+01 : f32
    %349 = vector.broadcast %cst_164 : f32 to vector<4x4xf32>
    %350 = arith.mulf %349, %31 : vector<4x4xf32>
    %cst_165 = arith.constant dense<0.000000e+00> : vector<4x4xf32>
    %351 = tpu.matmul %345, %348, %cst_165 {dimension_numbers = #tpu.dot_dimension_numbers<[1], [0], [0], [1], [0, 0, 1, 1], [], []>} : vector<4x4xf32>, vector<4x4xf32>, vector<4x4xf32> -> vector<4x4xf32>
    %352 = arith.subf %350, %351 : vector<4x4xf32>
    %cst_166 = arith.constant 1.300000e+01 : f32
    %353 = vector.broadcast %cst_166 : f32 to vector<4x4xf32>
    %354 = arith.mulf %353, %31 : vector<4x4xf32>
    %cst_167 = arith.constant dense<0.000000e+00> : vector<4x4xf32>
    %355 = tpu.matmul %345, %352, %cst_167 {dimension_numbers = #tpu.dot_dimension_numbers<[1], [0], [0], [1], [0, 0, 1, 1], [], []>} : vector<4x4xf32>, vector<4x4xf32>, vector<4x4xf32> -> vector<4x4xf32>
    %356 = arith.subf %354, %355 : vector<4x4xf32>
    %cst_168 = arith.constant dense<0.000000e+00> : vector<4x4xf32>
    %357 = tpu.matmul %344, %356, %cst_168 {dimension_numbers = #tpu.dot_dimension_numbers<[1], [0], [0], [1], [0, 0, 1, 1], [], []>} : vector<4x4xf32>, vector<4x4xf32>, vector<4x4xf32> -> vector<4x4xf32>
    %cst_169 = arith.constant 2.500000e-01 : f32
    %358 = vector.broadcast %cst_169 : f32 to vector<4x4xf32>
    %359 = arith.mulf %357, %358 : vector<4x4xf32>
    %cst_170 = arith.constant dense<0.000000e+00> : vector<4x4xf32>
    %360 = tpu.matmul %329, %359, %cst_170 {dimension_numbers = #tpu.dot_dimension_numbers<[1], [0], [0], [1], [0, 0, 1, 1], [], []>} : vector<4x4xf32>, vector<4x4xf32>, vector<4x4xf32> -> vector<4x4xf32>
    %cst_171 = arith.constant 7.000000e+00 : f32
    %361 = vector.broadcast %cst_171 : f32 to vector<4x4xf32>
    %362 = arith.mulf %361, %31 : vector<4x4xf32>
    %363 = arith.subf %362, %360 : vector<4x4xf32>
    %cst_172 = arith.constant 1.500000e+01 : f32
    %364 = vector.broadcast %cst_172 : f32 to vector<4x4xf32>
    %365 = arith.mulf %364, %31 : vector<4x4xf32>
    %cst_173 = arith.constant dense<0.000000e+00> : vector<4x4xf32>
    %366 = tpu.matmul %360, %363, %cst_173 {dimension_numbers = #tpu.dot_dimension_numbers<[1], [0], [0], [1], [0, 0, 1, 1], [], []>} : vector<4x4xf32>, vector<4x4xf32>, vector<4x4xf32> -> vector<4x4xf32>
    %367 = arith.subf %365, %366 : vector<4x4xf32>
    %cst_174 = arith.constant 1.300000e+01 : f32
    %368 = vector.broadcast %cst_174 : f32 to vector<4x4xf32>
    %369 = arith.mulf %368, %31 : vector<4x4xf32>
    %cst_175 = arith.constant dense<0.000000e+00> : vector<4x4xf32>
    %370 = tpu.matmul %360, %367, %cst_175 {dimension_numbers = #tpu.dot_dimension_numbers<[1], [0], [0], [1], [0, 0, 1, 1], [], []>} : vector<4x4xf32>, vector<4x4xf32>, vector<4x4xf32> -> vector<4x4xf32>
    %371 = arith.subf %369, %370 : vector<4x4xf32>
    %cst_176 = arith.constant dense<0.000000e+00> : vector<4x4xf32>
    %372 = tpu.matmul %359, %371, %cst_176 {dimension_numbers = #tpu.dot_dimension_numbers<[1], [0], [0], [1], [0, 0, 1, 1], [], []>} : vector<4x4xf32>, vector<4x4xf32>, vector<4x4xf32> -> vector<4x4xf32>
    %cst_177 = arith.constant 2.500000e-01 : f32
    %373 = vector.broadcast %cst_177 : f32 to vector<4x4xf32>
    %374 = arith.mulf %372, %373 : vector<4x4xf32>
    %cst_178 = arith.constant dense<0.000000e+00> : vector<4x4xf32>
    %375 = tpu.matmul %329, %374, %cst_178 {dimension_numbers = #tpu.dot_dimension_numbers<[1], [0], [0], [1], [0, 0, 1, 1], [], []>} : vector<4x4xf32>, vector<4x4xf32>, vector<4x4xf32> -> vector<4x4xf32>
    %cst_179 = arith.constant 7.000000e+00 : f32
    %376 = vector.broadcast %cst_179 : f32 to vector<4x4xf32>
    %377 = arith.mulf %376, %31 : vector<4x4xf32>
    %378 = arith.subf %377, %375 : vector<4x4xf32>
    %cst_180 = arith.constant 1.500000e+01 : f32
    %379 = vector.broadcast %cst_180 : f32 to vector<4x4xf32>
    %380 = arith.mulf %379, %31 : vector<4x4xf32>
    %cst_181 = arith.constant dense<0.000000e+00> : vector<4x4xf32>
    %381 = tpu.matmul %375, %378, %cst_181 {dimension_numbers = #tpu.dot_dimension_numbers<[1], [0], [0], [1], [0, 0, 1, 1], [], []>} : vector<4x4xf32>, vector<4x4xf32>, vector<4x4xf32> -> vector<4x4xf32>
    %382 = arith.subf %380, %381 : vector<4x4xf32>
    %cst_182 = arith.constant 1.300000e+01 : f32
    %383 = vector.broadcast %cst_182 : f32 to vector<4x4xf32>
    %384 = arith.mulf %383, %31 : vector<4x4xf32>
    %cst_183 = arith.constant dense<0.000000e+00> : vector<4x4xf32>
    %385 = tpu.matmul %375, %382, %cst_183 {dimension_numbers = #tpu.dot_dimension_numbers<[1], [0], [0], [1], [0, 0, 1, 1], [], []>} : vector<4x4xf32>, vector<4x4xf32>, vector<4x4xf32> -> vector<4x4xf32>
    %386 = arith.subf %384, %385 : vector<4x4xf32>
    %cst_184 = arith.constant dense<0.000000e+00> : vector<4x4xf32>
    %387 = tpu.matmul %374, %386, %cst_184 {dimension_numbers = #tpu.dot_dimension_numbers<[1], [0], [0], [1], [0, 0, 1, 1], [], []>} : vector<4x4xf32>, vector<4x4xf32>, vector<4x4xf32> -> vector<4x4xf32>
    %cst_185 = arith.constant 2.500000e-01 : f32
    %388 = vector.broadcast %cst_185 : f32 to vector<4x4xf32>
    %389 = arith.mulf %387, %388 : vector<4x4xf32>
    %cst_186 = arith.constant dense<0.000000e+00> : vector<4x4xf32>
    %390 = tpu.matmul %329, %389, %cst_186 {dimension_numbers = #tpu.dot_dimension_numbers<[1], [0], [0], [1], [0, 0, 1, 1], [], []>} : vector<4x4xf32>, vector<4x4xf32>, vector<4x4xf32> -> vector<4x4xf32>
    %cst_187 = arith.constant 7.000000e+00 : f32
    %391 = vector.broadcast %cst_187 : f32 to vector<4x4xf32>
    %392 = arith.mulf %391, %31 : vector<4x4xf32>
    %393 = arith.subf %392, %390 : vector<4x4xf32>
    %cst_188 = arith.constant 1.500000e+01 : f32
    %394 = vector.broadcast %cst_188 : f32 to vector<4x4xf32>
    %395 = arith.mulf %394, %31 : vector<4x4xf32>
    %cst_189 = arith.constant dense<0.000000e+00> : vector<4x4xf32>
    %396 = tpu.matmul %390, %393, %cst_189 {dimension_numbers = #tpu.dot_dimension_numbers<[1], [0], [0], [1], [0, 0, 1, 1], [], []>} : vector<4x4xf32>, vector<4x4xf32>, vector<4x4xf32> -> vector<4x4xf32>
    %397 = arith.subf %395, %396 : vector<4x4xf32>
    %cst_190 = arith.constant 1.300000e+01 : f32
    %398 = vector.broadcast %cst_190 : f32 to vector<4x4xf32>
    %399 = arith.mulf %398, %31 : vector<4x4xf32>
    %cst_191 = arith.constant dense<0.000000e+00> : vector<4x4xf32>
    %400 = tpu.matmul %390, %397, %cst_191 {dimension_numbers = #tpu.dot_dimension_numbers<[1], [0], [0], [1], [0, 0, 1, 1], [], []>} : vector<4x4xf32>, vector<4x4xf32>, vector<4x4xf32> -> vector<4x4xf32>
    %401 = arith.subf %399, %400 : vector<4x4xf32>
    %cst_192 = arith.constant dense<0.000000e+00> : vector<4x4xf32>
    %402 = tpu.matmul %389, %401, %cst_192 {dimension_numbers = #tpu.dot_dimension_numbers<[1], [0], [0], [1], [0, 0, 1, 1], [], []>} : vector<4x4xf32>, vector<4x4xf32>, vector<4x4xf32> -> vector<4x4xf32>
    %cst_193 = arith.constant 2.500000e-01 : f32
    %403 = vector.broadcast %cst_193 : f32 to vector<4x4xf32>
    %404 = arith.mulf %402, %403 : vector<4x4xf32>
    %cst_194 = arith.constant dense<0.000000e+00> : vector<4x4xf32>
    %405 = tpu.matmul %329, %404, %cst_194 {dimension_numbers = #tpu.dot_dimension_numbers<[1], [0], [0], [1], [0, 0, 1, 1], [], []>} : vector<4x4xf32>, vector<4x4xf32>, vector<4x4xf32> -> vector<4x4xf32>
    %cst_195 = arith.constant 7.000000e+00 : f32
    %406 = vector.broadcast %cst_195 : f32 to vector<4x4xf32>
    %407 = arith.mulf %406, %31 : vector<4x4xf32>
    %408 = arith.subf %407, %405 : vector<4x4xf32>
    %cst_196 = arith.constant 1.500000e+01 : f32
    %409 = vector.broadcast %cst_196 : f32 to vector<4x4xf32>
    %410 = arith.mulf %409, %31 : vector<4x4xf32>
    %cst_197 = arith.constant dense<0.000000e+00> : vector<4x4xf32>
    %411 = tpu.matmul %405, %408, %cst_197 {dimension_numbers = #tpu.dot_dimension_numbers<[1], [0], [0], [1], [0, 0, 1, 1], [], []>} : vector<4x4xf32>, vector<4x4xf32>, vector<4x4xf32> -> vector<4x4xf32>
    %412 = arith.subf %410, %411 : vector<4x4xf32>
    %cst_198 = arith.constant 1.300000e+01 : f32
    %413 = vector.broadcast %cst_198 : f32 to vector<4x4xf32>
    %414 = arith.mulf %413, %31 : vector<4x4xf32>
    %cst_199 = arith.constant dense<0.000000e+00> : vector<4x4xf32>
    %415 = tpu.matmul %405, %412, %cst_199 {dimension_numbers = #tpu.dot_dimension_numbers<[1], [0], [0], [1], [0, 0, 1, 1], [], []>} : vector<4x4xf32>, vector<4x4xf32>, vector<4x4xf32> -> vector<4x4xf32>
    %416 = arith.subf %414, %415 : vector<4x4xf32>
    %cst_200 = arith.constant dense<0.000000e+00> : vector<4x4xf32>
    %417 = tpu.matmul %404, %416, %cst_200 {dimension_numbers = #tpu.dot_dimension_numbers<[1], [0], [0], [1], [0, 0, 1, 1], [], []>} : vector<4x4xf32>, vector<4x4xf32>, vector<4x4xf32> -> vector<4x4xf32>
    %cst_201 = arith.constant 2.500000e-01 : f32
    %418 = vector.broadcast %cst_201 : f32 to vector<4x4xf32>
    %419 = arith.mulf %417, %418 : vector<4x4xf32>
    %cst_202 = arith.constant dense<0.000000e+00> : vector<4x4xf32>
    %420 = tpu.matmul %329, %419, %cst_202 {dimension_numbers = #tpu.dot_dimension_numbers<[1], [0], [0], [1], [0, 0, 1, 1], [], []>} : vector<4x4xf32>, vector<4x4xf32>, vector<4x4xf32> -> vector<4x4xf32>
    %cst_203 = arith.constant 7.000000e+00 : f32
    %421 = vector.broadcast %cst_203 : f32 to vector<4x4xf32>
    %422 = arith.mulf %421, %31 : vector<4x4xf32>
    %423 = arith.subf %422, %420 : vector<4x4xf32>
    %cst_204 = arith.constant 1.500000e+01 : f32
    %424 = vector.broadcast %cst_204 : f32 to vector<4x4xf32>
    %425 = arith.mulf %424, %31 : vector<4x4xf32>
    %cst_205 = arith.constant dense<0.000000e+00> : vector<4x4xf32>
    %426 = tpu.matmul %420, %423, %cst_205 {dimension_numbers = #tpu.dot_dimension_numbers<[1], [0], [0], [1], [0, 0, 1, 1], [], []>} : vector<4x4xf32>, vector<4x4xf32>, vector<4x4xf32> -> vector<4x4xf32>
    %427 = arith.subf %425, %426 : vector<4x4xf32>
    %cst_206 = arith.constant 1.300000e+01 : f32
    %428 = vector.broadcast %cst_206 : f32 to vector<4x4xf32>
    %429 = arith.mulf %428, %31 : vector<4x4xf32>
    %cst_207 = arith.constant dense<0.000000e+00> : vector<4x4xf32>
    %430 = tpu.matmul %420, %427, %cst_207 {dimension_numbers = #tpu.dot_dimension_numbers<[1], [0], [0], [1], [0, 0, 1, 1], [], []>} : vector<4x4xf32>, vector<4x4xf32>, vector<4x4xf32> -> vector<4x4xf32>
    %431 = arith.subf %429, %430 : vector<4x4xf32>
    %cst_208 = arith.constant dense<0.000000e+00> : vector<4x4xf32>
    %432 = tpu.matmul %419, %431, %cst_208 {dimension_numbers = #tpu.dot_dimension_numbers<[1], [0], [0], [1], [0, 0, 1, 1], [], []>} : vector<4x4xf32>, vector<4x4xf32>, vector<4x4xf32> -> vector<4x4xf32>
    %cst_209 = arith.constant 2.500000e-01 : f32
    %433 = vector.broadcast %cst_209 : f32 to vector<4x4xf32>
    %434 = arith.mulf %432, %433 : vector<4x4xf32>
    %cst_210 = arith.constant dense<0.000000e+00> : vector<12x4xf32>
    %435 = tpu.matmul %318, %434, %cst_210 {dimension_numbers = #tpu.dot_dimension_numbers<[1], [0], [0], [1], [0, 0, 1, 1], [], []>} : vector<12x4xf32>, vector<4x4xf32>, vector<12x4xf32> -> vector<12x4xf32>
    %cst_211 = arith.constant dense<0.000000e+00> : vector<12x8xf32>
    %436 = tpu.matmul %435, %341, %cst_211 {dimension_numbers = #tpu.dot_dimension_numbers<[1], [0], [0], [1], [0, 0, 1, 1], [], []>} : vector<12x4xf32>, vector<4x8xf32>, vector<12x8xf32> -> vector<12x8xf32>
    %c0_212 = arith.constant 0 : index
    %c16 = arith.constant 16 : index
    %437 = vector.load %arg14[%c0_212, %c16] : memref<12x32xf32, #tpu.memory_space<vmem>>, vector<12x8xf32>
    tpu.vector_store %arg14[%c0_212, %c16], %436 {strides = array<i32>} : memref<12x32xf32, #tpu.memory_space<vmem>>, vector<12x8xf32>,
    %438 = vector.extract_strided_slice %14 {offsets = [0, 24], sizes = [12, 8], strides = [1, 1]} : vector<12x32xf32> to vector<12x8xf32>
    %439 = vector.extract_strided_slice %19 {offsets = [0, 24], sizes = [12, 8], strides = [1, 1]} : vector<12x32xf32> to vector<12x8xf32>
    %440 = vector.extract_strided_slice %22 {offsets = [0, 24], sizes = [12, 8], strides = [1, 1]} : vector<12x32xf32> to vector<12x8xf32>
    %441 = vector.extract_strided_slice %24 {offsets = [0, 24], sizes = [4, 8], strides = [1, 1]} : vector<4x32xf32> to vector<4x8xf32>
    %442 = vector.extract_strided_slice %26 {offsets = [0, 24], sizes = [4, 8], strides = [1, 1]} : vector<4x32xf32> to vector<4x8xf32>
    %cst_213 = arith.constant dense<0.000000e+00> : vector<12x4xf32>
    %443 = tpu.matmul %438, %442, %cst_213 {dimension_numbers = #tpu.dot_dimension_numbers<[1], [1], [0], [0], [0, 0, 1, 0], [], []>} : vector<12x8xf32>, vector<4x8xf32>, vector<12x4xf32> -> vector<12x4xf32>
    %cst_214 = arith.constant dense<0xFF800000> : vector<12xf32>
    %444 = vector.multi_reduction <maximumf>, %443, %cst_214 [1] : vector<12x4xf32> to vector<12xf32>
    %445 = vector.shape_cast %444 : vector<12xf32> to vector<12x1xf32>
    %446 = vector.broadcast %445 : vector<12x1xf32> to vector<12x4xf32>
    %447 = arith.subf %443, %446 : vector<12x4xf32>
    %448 = math.exp %447 : vector<12x4xf32>
    %cst_215 = arith.constant dense<0.000000e+00> : vector<12xf32>
    %449 = vector.multi_reduction <add>, %448, %cst_215 [1] : vector<12x4xf32> to vector<12xf32>
    %450 = vector.shape_cast %449 : vector<12xf32> to vector<12x1xf32>
    %451 = tpu.reciprocal %450 {approx = true} : vector<12x1xf32> -> vector<12x1xf32>
    %452 = vector.broadcast %451 : vector<12x1xf32> to vector<12x4xf32>
    %453 = arith.mulf %448, %452 : vector<12x4xf32>
    %cst_216 = arith.constant dense<0.000000e+00> : vector<4x4xf32>
    %454 = tpu.matmul %441, %442, %cst_216 {dimension_numbers = #tpu.dot_dimension_numbers<[1], [1], [0], [0], [0, 0, 1, 0], [], []>} : vector<4x8xf32>, vector<4x8xf32>, vector<4x4xf32> -> vector<4x4xf32>
    %cst_217 = arith.constant dense<0xFF800000> : vector<4xf32>
    %455 = vector.multi_reduction <maximumf>, %454, %cst_217 [1] : vector<4x4xf32> to vector<4xf32>
    %456 = vector.shape_cast %455 : vector<4xf32> to vector<4x1xf32>
    %457 = vector.broadcast %456 : vector<4x1xf32> to vector<4x4xf32>
    %458 = arith.subf %454, %457 : vector<4x4xf32>
    %459 = math.exp %458 : vector<4x4xf32>
    %cst_218 = arith.constant dense<0.000000e+00> : vector<4xf32>
    %460 = vector.multi_reduction <add>, %459, %cst_218 [1] : vector<4x4xf32> to vector<4xf32>
    %461 = vector.shape_cast %460 : vector<4xf32> to vector<4x1xf32>
    %462 = tpu.reciprocal %461 {approx = true} : vector<4x1xf32> -> vector<4x1xf32>
    %463 = vector.broadcast %462 : vector<4x1xf32> to vector<4x4xf32>
    %464 = arith.mulf %459, %463 : vector<4x4xf32>
    %cst_219 = arith.constant dense<0.000000e+00> : vector<4x12xf32>
    %465 = tpu.matmul %441, %439, %cst_219 {dimension_numbers = #tpu.dot_dimension_numbers<[1], [1], [0], [0], [0, 0, 1, 0], [], []>} : vector<4x8xf32>, vector<12x8xf32>, vector<4x12xf32> -> vector<4x12xf32>
    %cst_220 = arith.constant dense<0xFF800000> : vector<4xf32>
    %466 = vector.multi_reduction <maximumf>, %465, %cst_220 [1] : vector<4x12xf32> to vector<4xf32>
    %467 = vector.shape_cast %466 : vector<4xf32> to vector<4x1xf32>
    %468 = vector.broadcast %467 : vector<4x1xf32> to vector<4x12xf32>
    %469 = arith.subf %465, %468 : vector<4x12xf32>
    %470 = math.exp %469 : vector<4x12xf32>
    %cst_221 = arith.constant dense<0.000000e+00> : vector<4xf32>
    %471 = vector.multi_reduction <add>, %470, %cst_221 [1] : vector<4x12xf32> to vector<4xf32>
    %472 = vector.shape_cast %471 : vector<4xf32> to vector<4x1xf32>
    %473 = tpu.reciprocal %472 {approx = true} : vector<4x1xf32> -> vector<4x1xf32>
    %474 = vector.broadcast %473 : vector<4x1xf32> to vector<4x12xf32>
    %475 = arith.mulf %470, %474 : vector<4x12xf32>
    %cst_222 = arith.constant dense<0.000000e+00> : vector<4x8xf32>
    %476 = tpu.matmul %475, %440, %cst_222 {dimension_numbers = #tpu.dot_dimension_numbers<[1], [0], [0], [1], [0, 0, 1, 1], [], []>} : vector<4x12xf32>, vector<12x8xf32>, vector<4x8xf32> -> vector<4x8xf32>
    %477 = tpu.transpose %464, [1, 0] : vector<4x4xf32> -> vector<4x4xf32>
    %478 = vector.broadcast %32 : f32 to vector<4x4xf32>
    %479 = arith.mulf %477, %478 : vector<4x4xf32>
    %cst_223 = arith.constant dense<0.000000e+00> : vector<4x4xf32>
    %480 = tpu.matmul %464, %479, %cst_223 {dimension_numbers = #tpu.dot_dimension_numbers<[1], [0], [0], [1], [0, 0, 1, 1], [], []>} : vector<4x4xf32>, vector<4x4xf32>, vector<4x4xf32> -> vector<4x4xf32>
    %cst_224 = arith.constant 7.000000e+00 : f32
    %481 = vector.broadcast %cst_224 : f32 to vector<4x4xf32>
    %482 = arith.mulf %481, %31 : vector<4x4xf32>
    %483 = arith.subf %482, %480 : vector<4x4xf32>
    %cst_225 = arith.constant 1.500000e+01 : f32
    %484 = vector.broadcast %cst_225 : f32 to vector<4x4xf32>
    %485 = arith.mulf %484, %31 : vector<4x4xf32>
    %cst_226 = arith.constant dense<0.000000e+00> : vector<4x4xf32>
    %486 = tpu.matmul %480, %483, %cst_226 {dimension_numbers = #tpu.dot_dimension_numbers<[1], [0], [0], [1], [0, 0, 1, 1], [], []>} : vector<4x4xf32>, vector<4x4xf32>, vector<4x4xf32> -> vector<4x4xf32>
    %487 = arith.subf %485, %486 : vector<4x4xf32>
    %cst_227 = arith.constant 1.300000e+01 : f32
    %488 = vector.broadcast %cst_227 : f32 to vector<4x4xf32>
    %489 = arith.mulf %488, %31 : vector<4x4xf32>
    %cst_228 = arith.constant dense<0.000000e+00> : vector<4x4xf32>
    %490 = tpu.matmul %480, %487, %cst_228 {dimension_numbers = #tpu.dot_dimension_numbers<[1], [0], [0], [1], [0, 0, 1, 1], [], []>} : vector<4x4xf32>, vector<4x4xf32>, vector<4x4xf32> -> vector<4x4xf32>
    %491 = arith.subf %489, %490 : vector<4x4xf32>
    %cst_229 = arith.constant dense<0.000000e+00> : vector<4x4xf32>
    %492 = tpu.matmul %479, %491, %cst_229 {dimension_numbers = #tpu.dot_dimension_numbers<[1], [0], [0], [1], [0, 0, 1, 1], [], []>} : vector<4x4xf32>, vector<4x4xf32>, vector<4x4xf32> -> vector<4x4xf32>
    %cst_230 = arith.constant 2.500000e-01 : f32
    %493 = vector.broadcast %cst_230 : f32 to vector<4x4xf32>
    %494 = arith.mulf %492, %493 : vector<4x4xf32>
    %cst_231 = arith.constant dense<0.000000e+00> : vector<4x4xf32>
    %495 = tpu.matmul %464, %494, %cst_231 {dimension_numbers = #tpu.dot_dimension_numbers<[1], [0], [0], [1], [0, 0, 1, 1], [], []>} : vector<4x4xf32>, vector<4x4xf32>, vector<4x4xf32> -> vector<4x4xf32>
    %cst_232 = arith.constant 7.000000e+00 : f32
    %496 = vector.broadcast %cst_232 : f32 to vector<4x4xf32>
    %497 = arith.mulf %496, %31 : vector<4x4xf32>
    %498 = arith.subf %497, %495 : vector<4x4xf32>
    %cst_233 = arith.constant 1.500000e+01 : f32
    %499 = vector.broadcast %cst_233 : f32 to vector<4x4xf32>
    %500 = arith.mulf %499, %31 : vector<4x4xf32>
    %cst_234 = arith.constant dense<0.000000e+00> : vector<4x4xf32>
    %501 = tpu.matmul %495, %498, %cst_234 {dimension_numbers = #tpu.dot_dimension_numbers<[1], [0], [0], [1], [0, 0, 1, 1], [], []>} : vector<4x4xf32>, vector<4x4xf32>, vector<4x4xf32> -> vector<4x4xf32>
    %502 = arith.subf %500, %501 : vector<4x4xf32>
    %cst_235 = arith.constant 1.300000e+01 : f32
    %503 = vector.broadcast %cst_235 : f32 to vector<4x4xf32>
    %504 = arith.mulf %503, %31 : vector<4x4xf32>
    %cst_236 = arith.constant dense<0.000000e+00> : vector<4x4xf32>
    %505 = tpu.matmul %495, %502, %cst_236 {dimension_numbers = #tpu.dot_dimension_numbers<[1], [0], [0], [1], [0, 0, 1, 1], [], []>} : vector<4x4xf32>, vector<4x4xf32>, vector<4x4xf32> -> vector<4x4xf32>
    %506 = arith.subf %504, %505 : vector<4x4xf32>
    %cst_237 = arith.constant dense<0.000000e+00> : vector<4x4xf32>
    %507 = tpu.matmul %494, %506, %cst_237 {dimension_numbers = #tpu.dot_dimension_numbers<[1], [0], [0], [1], [0, 0, 1, 1], [], []>} : vector<4x4xf32>, vector<4x4xf32>, vector<4x4xf32> -> vector<4x4xf32>
    %cst_238 = arith.constant 2.500000e-01 : f32
    %508 = vector.broadcast %cst_238 : f32 to vector<4x4xf32>
    %509 = arith.mulf %507, %508 : vector<4x4xf32>
    %cst_239 = arith.constant dense<0.000000e+00> : vector<4x4xf32>
    %510 = tpu.matmul %464, %509, %cst_239 {dimension_numbers = #tpu.dot_dimension_numbers<[1], [0], [0], [1], [0, 0, 1, 1], [], []>} : vector<4x4xf32>, vector<4x4xf32>, vector<4x4xf32> -> vector<4x4xf32>
    %cst_240 = arith.constant 7.000000e+00 : f32
    %511 = vector.broadcast %cst_240 : f32 to vector<4x4xf32>
    %512 = arith.mulf %511, %31 : vector<4x4xf32>
    %513 = arith.subf %512, %510 : vector<4x4xf32>
    %cst_241 = arith.constant 1.500000e+01 : f32
    %514 = vector.broadcast %cst_241 : f32 to vector<4x4xf32>
    %515 = arith.mulf %514, %31 : vector<4x4xf32>
    %cst_242 = arith.constant dense<0.000000e+00> : vector<4x4xf32>
    %516 = tpu.matmul %510, %513, %cst_242 {dimension_numbers = #tpu.dot_dimension_numbers<[1], [0], [0], [1], [0, 0, 1, 1], [], []>} : vector<4x4xf32>, vector<4x4xf32>, vector<4x4xf32> -> vector<4x4xf32>
    %517 = arith.subf %515, %516 : vector<4x4xf32>
    %cst_243 = arith.constant 1.300000e+01 : f32
    %518 = vector.broadcast %cst_243 : f32 to vector<4x4xf32>
    %519 = arith.mulf %518, %31 : vector<4x4xf32>
    %cst_244 = arith.constant dense<0.000000e+00> : vector<4x4xf32>
    %520 = tpu.matmul %510, %517, %cst_244 {dimension_numbers = #tpu.dot_dimension_numbers<[1], [0], [0], [1], [0, 0, 1, 1], [], []>} : vector<4x4xf32>, vector<4x4xf32>, vector<4x4xf32> -> vector<4x4xf32>
    %521 = arith.subf %519, %520 : vector<4x4xf32>
    %cst_245 = arith.constant dense<0.000000e+00> : vector<4x4xf32>
    %522 = tpu.matmul %509, %521, %cst_245 {dimension_numbers = #tpu.dot_dimension_numbers<[1], [0], [0], [1], [0, 0, 1, 1], [], []>} : vector<4x4xf32>, vector<4x4xf32>, vector<4x4xf32> -> vector<4x4xf32>
    %cst_246 = arith.constant 2.500000e-01 : f32
    %523 = vector.broadcast %cst_246 : f32 to vector<4x4xf32>
    %524 = arith.mulf %522, %523 : vector<4x4xf32>
    %cst_247 = arith.constant dense<0.000000e+00> : vector<4x4xf32>
    %525 = tpu.matmul %464, %524, %cst_247 {dimension_numbers = #tpu.dot_dimension_numbers<[1], [0], [0], [1], [0, 0, 1, 1], [], []>} : vector<4x4xf32>, vector<4x4xf32>, vector<4x4xf32> -> vector<4x4xf32>
    %cst_248 = arith.constant 7.000000e+00 : f32
    %526 = vector.broadcast %cst_248 : f32 to vector<4x4xf32>
    %527 = arith.mulf %526, %31 : vector<4x4xf32>
    %528 = arith.subf %527, %525 : vector<4x4xf32>
    %cst_249 = arith.constant 1.500000e+01 : f32
    %529 = vector.broadcast %cst_249 : f32 to vector<4x4xf32>
    %530 = arith.mulf %529, %31 : vector<4x4xf32>
    %cst_250 = arith.constant dense<0.000000e+00> : vector<4x4xf32>
    %531 = tpu.matmul %525, %528, %cst_250 {dimension_numbers = #tpu.dot_dimension_numbers<[1], [0], [0], [1], [0, 0, 1, 1], [], []>} : vector<4x4xf32>, vector<4x4xf32>, vector<4x4xf32> -> vector<4x4xf32>
    %532 = arith.subf %530, %531 : vector<4x4xf32>
    %cst_251 = arith.constant 1.300000e+01 : f32
    %533 = vector.broadcast %cst_251 : f32 to vector<4x4xf32>
    %534 = arith.mulf %533, %31 : vector<4x4xf32>
    %cst_252 = arith.constant dense<0.000000e+00> : vector<4x4xf32>
    %535 = tpu.matmul %525, %532, %cst_252 {dimension_numbers = #tpu.dot_dimension_numbers<[1], [0], [0], [1], [0, 0, 1, 1], [], []>} : vector<4x4xf32>, vector<4x4xf32>, vector<4x4xf32> -> vector<4x4xf32>
    %536 = arith.subf %534, %535 : vector<4x4xf32>
    %cst_253 = arith.constant dense<0.000000e+00> : vector<4x4xf32>
    %537 = tpu.matmul %524, %536, %cst_253 {dimension_numbers = #tpu.dot_dimension_numbers<[1], [0], [0], [1], [0, 0, 1, 1], [], []>} : vector<4x4xf32>, vector<4x4xf32>, vector<4x4xf32> -> vector<4x4xf32>
    %cst_254 = arith.constant 2.500000e-01 : f32
    %538 = vector.broadcast %cst_254 : f32 to vector<4x4xf32>
    %539 = arith.mulf %537, %538 : vector<4x4xf32>
    %cst_255 = arith.constant dense<0.000000e+00> : vector<4x4xf32>
    %540 = tpu.matmul %464, %539, %cst_255 {dimension_numbers = #tpu.dot_dimension_numbers<[1], [0], [0], [1], [0, 0, 1, 1], [], []>} : vector<4x4xf32>, vector<4x4xf32>, vector<4x4xf32> -> vector<4x4xf32>
    %cst_256 = arith.constant 7.000000e+00 : f32
    %541 = vector.broadcast %cst_256 : f32 to vector<4x4xf32>
    %542 = arith.mulf %541, %31 : vector<4x4xf32>
    %543 = arith.subf %542, %540 : vector<4x4xf32>
    %cst_257 = arith.constant 1.500000e+01 : f32
    %544 = vector.broadcast %cst_257 : f32 to vector<4x4xf32>
    %545 = arith.mulf %544, %31 : vector<4x4xf32>
    %cst_258 = arith.constant dense<0.000000e+00> : vector<4x4xf32>
    %546 = tpu.matmul %540, %543, %cst_258 {dimension_numbers = #tpu.dot_dimension_numbers<[1], [0], [0], [1], [0, 0, 1, 1], [], []>} : vector<4x4xf32>, vector<4x4xf32>, vector<4x4xf32> -> vector<4x4xf32>
    %547 = arith.subf %545, %546 : vector<4x4xf32>
    %cst_259 = arith.constant 1.300000e+01 : f32
    %548 = vector.broadcast %cst_259 : f32 to vector<4x4xf32>
    %549 = arith.mulf %548, %31 : vector<4x4xf32>
    %cst_260 = arith.constant dense<0.000000e+00> : vector<4x4xf32>
    %550 = tpu.matmul %540, %547, %cst_260 {dimension_numbers = #tpu.dot_dimension_numbers<[1], [0], [0], [1], [0, 0, 1, 1], [], []>} : vector<4x4xf32>, vector<4x4xf32>, vector<4x4xf32> -> vector<4x4xf32>
    %551 = arith.subf %549, %550 : vector<4x4xf32>
    %cst_261 = arith.constant dense<0.000000e+00> : vector<4x4xf32>
    %552 = tpu.matmul %539, %551, %cst_261 {dimension_numbers = #tpu.dot_dimension_numbers<[1], [0], [0], [1], [0, 0, 1, 1], [], []>} : vector<4x4xf32>, vector<4x4xf32>, vector<4x4xf32> -> vector<4x4xf32>
    %cst_262 = arith.constant 2.500000e-01 : f32
    %553 = vector.broadcast %cst_262 : f32 to vector<4x4xf32>
    %554 = arith.mulf %552, %553 : vector<4x4xf32>
    %cst_263 = arith.constant dense<0.000000e+00> : vector<4x4xf32>
    %555 = tpu.matmul %464, %554, %cst_263 {dimension_numbers = #tpu.dot_dimension_numbers<[1], [0], [0], [1], [0, 0, 1, 1], [], []>} : vector<4x4xf32>, vector<4x4xf32>, vector<4x4xf32> -> vector<4x4xf32>
    %cst_264 = arith.constant 7.000000e+00 : f32
    %556 = vector.broadcast %cst_264 : f32 to vector<4x4xf32>
    %557 = arith.mulf %556, %31 : vector<4x4xf32>
    %558 = arith.subf %557, %555 : vector<4x4xf32>
    %cst_265 = arith.constant 1.500000e+01 : f32
    %559 = vector.broadcast %cst_265 : f32 to vector<4x4xf32>
    %560 = arith.mulf %559, %31 : vector<4x4xf32>
    %cst_266 = arith.constant dense<0.000000e+00> : vector<4x4xf32>
    %561 = tpu.matmul %555, %558, %cst_266 {dimension_numbers = #tpu.dot_dimension_numbers<[1], [0], [0], [1], [0, 0, 1, 1], [], []>} : vector<4x4xf32>, vector<4x4xf32>, vector<4x4xf32> -> vector<4x4xf32>
    %562 = arith.subf %560, %561 : vector<4x4xf32>
    %cst_267 = arith.constant 1.300000e+01 : f32
    %563 = vector.broadcast %cst_267 : f32 to vector<4x4xf32>
    %564 = arith.mulf %563, %31 : vector<4x4xf32>
    %cst_268 = arith.constant dense<0.000000e+00> : vector<4x4xf32>
    %565 = tpu.matmul %555, %562, %cst_268 {dimension_numbers = #tpu.dot_dimension_numbers<[1], [0], [0], [1], [0, 0, 1, 1], [], []>} : vector<4x4xf32>, vector<4x4xf32>, vector<4x4xf32> -> vector<4x4xf32>
    %566 = arith.subf %564, %565 : vector<4x4xf32>
    %cst_269 = arith.constant dense<0.000000e+00> : vector<4x4xf32>
    %567 = tpu.matmul %554, %566, %cst_269 {dimension_numbers = #tpu.dot_dimension_numbers<[1], [0], [0], [1], [0, 0, 1, 1], [], []>} : vector<4x4xf32>, vector<4x4xf32>, vector<4x4xf32> -> vector<4x4xf32>
    %cst_270 = arith.constant 2.500000e-01 : f32
    %568 = vector.broadcast %cst_270 : f32 to vector<4x4xf32>
    %569 = arith.mulf %567, %568 : vector<4x4xf32>
    %cst_271 = arith.constant dense<0.000000e+00> : vector<12x4xf32>
    %570 = tpu.matmul %453, %569, %cst_271 {dimension_numbers = #tpu.dot_dimension_numbers<[1], [0], [0], [1], [0, 0, 1, 1], [], []>} : vector<12x4xf32>, vector<4x4xf32>, vector<12x4xf32> -> vector<12x4xf32>
    %cst_272 = arith.constant dense<0.000000e+00> : vector<12x8xf32>
    %571 = tpu.matmul %570, %476, %cst_272 {dimension_numbers = #tpu.dot_dimension_numbers<[1], [0], [0], [1], [0, 0, 1, 1], [], []>} : vector<12x4xf32>, vector<4x8xf32>, vector<12x8xf32> -> vector<12x8xf32>
    %c0_273 = arith.constant 0 : index
    %c24 = arith.constant 24 : index
    %572 = vector.load %arg14[%c0_273, %c24] : memref<12x32xf32, #tpu.memory_space<vmem>>, vector<12x8xf32>
    tpu.vector_store %arg14[%c0_273, %c24], %571 {strides = array<i32>} : memref<12x32xf32, #tpu.memory_space<vmem>>, vector<12x8xf32>,
    %c0_274 = arith.constant 0 : index
    %c0_275 = arith.constant 0 : index
    %573 = vector.load %arg14[%c0_274, %c0_275] : memref<12x32xf32, #tpu.memory_space<vmem>>, vector<12x32xf32>
    %574 = arith.truncf %573 : vector<12x32xf32> to vector<12x32xbf16>
    %cst_276 = arith.constant dense<0.000000e+00> : vector<12x32xf32>
    %575 = tpu.matmul %574, %5, %cst_276 {dimension_numbers = #tpu.dot_dimension_numbers<[1], [0], [0], [1], [0, 0, 1, 1], [], []>} : vector<12x32xbf16>, vector<32x32xbf16>, vector<12x32xf32> -> vector<12x32xf32>
    %576 = vector.broadcast %9 : vector<1x32xf32> to vector<12x32xf32>
    %577 = arith.addf %575, %576 : vector<12x32xf32>
    %c0_277 = arith.constant 0 : index
    %c0_278 = arith.constant 0 : index
    %c0_279 = arith.constant 0 : index
    %578 = vector.load %arg13[%c0_277, %c0_278, %c0_279] : memref<1x12x32xf32, #tpu.memory_space<vmem>>, vector<1x12x32xf32>
    %579 = vector.shape_cast %578 : vector<1x12x32xf32> to vector<12x32xf32>
    %580 = vector.shape_cast %577 : vector<12x32xf32> to vector<1x12x32xf32>
    tpu.vector_store %arg13[%c0_277, %c0_278, %c0_279], %580 {strides = array<i32>} : memref<1x12x32xf32, #tpu.memory_space<vmem>>, vector<1x12x32xf32>,
    return
  }
  func.func @transform_0(%arg0: i32, %arg1: memref<1xf32, #tpu.memory_space<smem>>) -> (i32, i32, i32) {
    %c0_i32 = arith.constant 0 : i32
    %c0_i32_0 = arith.constant 0 : i32
    %c0_i32_1 = arith.constant 0 : i32
    return %arg0, %c0_i32, %c0_i32_0 : i32, i32, i32
  }
  func.func @transform_1(%arg0: i32, %arg1: memref<1xf32, #tpu.memory_space<smem>>) -> (i32, i32, i32) {
    %c0_i32 = arith.constant 0 : i32
    %c0_i32_0 = arith.constant 0 : i32
    %c0_i32_1 = arith.constant 0 : i32
    return %arg0, %c0_i32, %c0_i32_0 : i32, i32, i32
  }
  func.func @transform_2(%arg0: i32, %arg1: memref<1xf32, #tpu.memory_space<smem>>) -> (i32, i32, i32) {
    %c0_i32 = arith.constant 0 : i32
    %c0_i32_0 = arith.constant 0 : i32
    %c0_i32_1 = arith.constant 0 : i32
    return %arg0, %c0_i32, %c0_i32_0 : i32, i32, i32
  }
  func.func @transform_3(%arg0: i32, %arg1: memref<1xf32, #tpu.memory_space<smem>>) -> (i32, i32) {
    %c0_i32 = arith.constant 0 : i32
    %c0_i32_0 = arith.constant 0 : i32
    %c0_i32_1 = arith.constant 0 : i32
    return %c0_i32, %c0_i32_0 : i32, i32
  }
  func.func @transform_4(%arg0: i32, %arg1: memref<1xf32, #tpu.memory_space<smem>>) -> (i32, i32) {
    %c0_i32 = arith.constant 0 : i32
    %c0_i32_0 = arith.constant 0 : i32
    %c0_i32_1 = arith.constant 0 : i32
    return %c0_i32, %c0_i32_0 : i32, i32
  }
  func.func @transform_5(%arg0: i32, %arg1: memref<1xf32, #tpu.memory_space<smem>>) -> (i32, i32) {
    %c0_i32 = arith.constant 0 : i32
    %c0_i32_0 = arith.constant 0 : i32
    %c0_i32_1 = arith.constant 0 : i32
    return %c0_i32, %c0_i32_0 : i32, i32
  }
  func.func @transform_6(%arg0: i32, %arg1: memref<1xf32, #tpu.memory_space<smem>>) -> (i32, i32) {
    %c0_i32 = arith.constant 0 : i32
    %c0_i32_0 = arith.constant 0 : i32
    %c0_i32_1 = arith.constant 0 : i32
    return %c0_i32, %c0_i32_0 : i32, i32
  }
  func.func @transform_7(%arg0: i32, %arg1: memref<1xf32, #tpu.memory_space<smem>>) -> (i32, i32) {
    %c0_i32 = arith.constant 0 : i32
    %c0_i32_0 = arith.constant 0 : i32
    %c0_i32_1 = arith.constant 0 : i32
    return %c0_i32, %c0_i32_0 : i32, i32
  }
  func.func @transform_8(%arg0: i32, %arg1: memref<1xf32, #tpu.memory_space<smem>>) -> (i32, i32) {
    %c0_i32 = arith.constant 0 : i32
    %c0_i32_0 = arith.constant 0 : i32
    %c0_i32_1 = arith.constant 0 : i32
    return %c0_i32, %c0_i32_0 : i32, i32
  }
  func.func @transform_9(%arg0: i32, %arg1: memref<1xf32, #tpu.memory_space<smem>>) -> (i32, i32) {
    %c0_i32 = arith.constant 0 : i32
    %c0_i32_0 = arith.constant 0 : i32
    %c0_i32_1 = arith.constant 0 : i32
    return %c0_i32, %c0_i32_0 : i32, i32
  }
  func.func @transform_10(%arg0: i32, %arg1: memref<1xf32, #tpu.memory_space<smem>>) -> (i32, i32) {
    %c0_i32 = arith.constant 0 : i32
    %c0_i32_0 = arith.constant 0 : i32
    %c0_i32_1 = arith.constant 0 : i32
    return %c0_i32, %c0_i32_0 : i32, i32
  }
  func.func @transform_11(%arg0: i32, %arg1: memref<1xf32, #tpu.memory_space<smem>>) -> (i32, i32, i32) {
    %c0_i32 = arith.constant 0 : i32
    %c0_i32_0 = arith.constant 0 : i32
    %c0_i32_1 = arith.constant 0 : i32
    return %arg0, %c0_i32, %c0_i32_0 : i32, i32, i32
  }
}

</mosaic_0001>

<bundles_post_ra>
// kernel: tpu_custom_call.1
= control target key start
LH: loop header
LB: loop body
LE: loop exit
PB: predicated region body
PF: predicated region fallthrough
CT: control target
= control target key end

     0   :  { %s5772_s0 = inlined_call_operand.<no memory space> [shape: f32[1], index: 0, kind: input, shape index: {}]   ;;  %s5773_s1 = inlined_call_operand.vmem [shape: bf16[2,12,32], index: 1, kind: input, shape index: {}]   ;;  %s5774_s2 = inlined_call_operand.hbm [shape: f32[2,4,32], index: 2, kind: input, shape index: {}]   ;;  %s5775_s3 = inlined_call_operand.hbm [shape: f32[2,4,32], index: 3, kind: input, shape index: {}]   ;;  %s5776_s4 = inlined_call_operand.vmem [shape: bf16[32,32], index: 4, kind: input, shape index: {}]   ;;  %s5777_s5 = inlined_call_operand.vmem [shape: f32[1,32], index: 5, kind: input, shape index: {}]   ;;  %s5778_s6 = inlined_call_operand.vmem [shape: bf16[32,32], index: 6, kind: input, shape index: {}]   ;;  %s5779_s7 = inlined_call_operand.vmem [shape: f32[1,32], index: 7, kind: input, shape index: {}]   ;;  %s5780_s8 = inlined_call_operand.hbm [shape: bf16[32,32], index: 8, kind: input, shape index: {}]   ;;  %s5781_s9 = inlined_call_operand.vmem [shape: f32[1,32], index: 9, kind: input, shape index: {}]   ;;  %s5782_s10 = inlined_call_operand.hbm [shape: bf16[32,32], index: 10, kind: input, shape index: {}]   ;;  %s5783_s11 = inlined_call_operand.vmem [shape: f32[1,32], index: 11, kind: input, shape index: {}]   ;;  %s5784_s12 = inlined_call_operand.vmem [shape: f32[2,12,32], index: 12, kind: output, shape index: {}]  }
   0x1   :  { %5788 = sst [smem:[#allocation19_spill]] %s5780_s8 }
   0x2   :  { %5789 = sst [smem:[#allocation20_spill]] %s5782_s10 }
   0x3   :  { %5790 = sst [smem:[#allocation21_spill]] %s5784_s12 }
   0x4   :  { %17 = sst [smem:[#allocation4]] %s5772_s0 }
   0x5   :  { %18 = vsyncpa [#allocation6], 0 }
   0x6   :  { %20 = vsyncpa [#allocation6 + $0x1], 0 }
   0x7   :  { %21 = vsyncpa [#allocation8], 0 }
   0x8   :  { %23 = vsyncpa [#allocation8 + $0x1], 0 }
   0x9   :  { %24 = vsyncpa [#allocation11], 0  ;;  %s5018_s23 = smov 0   ;;  %s5020_s24 = smov 0  }
   0xa   :  { %s5022_s25 = smov 0   ;;  %s5024_s26 = smov 0  }
   0xb LB: > { %5791 = sst [smem:[#allocation16_spill]] %s4933_s25  ;;  %s5042_s29 = sadd.s32 4294967295, %s4937_s26   ;;  %s4937_s26 = sphi %s5024_s26, %s5800_s26   ;;  %s4933_s25 = sphi %s5022_s25, %s5802_s25   ;;  %s4929_s24 = sphi %s5020_s24, %s5804_s24   ;;  %s4925_s23 = sphi %s5018_s23, %s5803_s23  }
   0xc   : > { %s5792_s8 = sld [smem:[#allocation19_spill]]  ;;  %p4301_p0 = scmp.ge.s32.totalorder %s4937_s26, 1 }
   0xd   : > { %p77_p1 = scmp.eq.s32.totalorder %s5042_s29, 0  ;;  %p307_p2 = scmp.lt.s32.totalorder %s4937_s26, 3 }
   0xe   : > { %s4939_s13 = smov [#allocation9]   ;;  %s5794_s10 = sld [smem:[#allocation20_spill]] }
   0xf   : > { %p5047_p3 = pnand %p4301_p0, %p307_p2  ;;  %s332_s14 = sshll.u32 %s4939_s13, 4  ;;  %s333_s14 = int_to_ptr.vmem [resolvable:$true] %s332_s14 }
  0x10   : > { %s4940_s18 = smov [#allocation10]   ;;  %s4941_s20 = smov 64  }
  0x11   : > { %p4641_p4 = pneg %p5047_p3  ;;  %s349_s19 = sshll.u32 %s4940_s18, 4  ;;  %s350_s19 = int_to_ptr.vmem [resolvable:$true] %s349_s19 }
  0x12   : > { %s330_s28 = sshll.u32 %s5792_s8, 4  ;;  %s4942_s21 = smov 4   ;;  %s331_s28 = int_to_ptr.hbm [resolvable:$true] %s330_s28 }
  0x13   : > { %p4642_p5 = pnand %p4641_p4, %p77_p1  ;;  %s5059_s22 = sadd.s32 1, %s4937_s26  }
  0x14   : > { %s347_s17 = sshll.u32 %s5794_s10, 4  ;;  %5795 = sst [smem:[#allocation17_spill]] %s5059_s22  ;;  %s348_s17 = int_to_ptr.hbm [resolvable:$true] %s347_s17 }
  0x15   : > { %4644 = dma.hbm_to_vmem [thread:$0]  (!%p4642_p5), %s331_s28, 256, %s333_s14, [#allocation8], %s4941_s20, %s4941_s20, %s4942_s21  }
  0x16   : > { %4647 = dma.hbm_to_vmem [thread:$0]  (!%p4642_p5), %s348_s17, 256, %s350_s19, [#allocation11], %s4941_s20, %s4941_s20, %s4942_s21  }
  0x17   : > { %s63_s0 = sadd.s32 1, %s4933_s25  ;;  %s60_s27 = ssub.s32 %s4937_s26, %s5059_s22 }
  0x18   : > { %p70_p6 = scmp.ne.s32.totalorder %s4933_s25, %s4929_s24  ;;  %p61_p7 = scmp.eq.s32.totalorder %s60_s27, 0 }
  0x19   : > { %p71_p8 = scmp.eq.s32.totalorder %s4937_s26, 0  ;;  %p76_p9 = scmp.ne.s32.totalorder %s4929_s24, %s4925_s23 }
  0x1a   : > { %p4657_p10 = scmp.lt.s32.totalorder %s4937_s26, 2  ;;  %s374_s14 = sand.u32 1, %s4933_s25  }
  0x1b   : > { %s5071_s13 = scalar_select %p61_p7, %s4933_s25, %s63_s0  }
  0x1c   : > { %p72_p11 = por %p71_p8, %p70_p6  ;;  %p5075_p12 = por %p77_p1, %p76_p9 }
  0x1d   : > { %5796 = sst [smem:[#allocation18_spill]] %s5071_s13  ;;  %s4306_s15 = sshll.u32 %s4937_s26, 2 }
  0x1e   : > { %s4305_s16 = sshll.u32 %s374_s14, 2  ;;  %s382_s19 = scalar_lea.hbm %s5774_s2, %s4306_s15 }
  0x1f   : > { %s384_s20 = sshll.u32 %s382_s19, 4  ;;  %s378_s21 = scalar_lea.vmem [#allocation5], %s4305_s16  ;;  %s385_s20 = int_to_ptr.hbm [resolvable:$true] %s384_s20 }
  0x20   : > { %s386_s23 = sshll.u32 %s378_s21, 4  ;;  %p5086_p13 = pnand %p4657_p10, %p72_p11  ;;  %s387_s23 = int_to_ptr.vmem [resolvable:$true] %s386_s23 }
  0x21   : > { %s401_s10 = scalar_lea.hbm %s5775_s3, %s4306_s15  ;;  %s393_s13 = sand.u32 1, %s4937_s26  }
  0x22   : > { %s375_s25 = scalar_lea.sflag [#allocation6], %s374_s14  ;;  %s4831_s17 = sshra.s32 %s385_s20, 4  ;;  %s4832_s17 = int_to_ptr.hbm [resolvable:$true] %s4831_s17 }
  0x23   : > { %s4833_s18 = scalar_lea.hbm %s4832_s17, 4  ;;  %p4835_p2 = pneg %p5086_p13 }
  0x24   : > { %p4834_p0 = scmp.ne.s32.totalorder %s4832_s17, %s4833_s18  ;;  %s4838_s22 = scalar_lea.hbm %s5774_s2, 8 }
  0x25   : > { %p4839_p6 = scmp.lt.s32.totalorder %s4832_s17, %s5774_s2  ;;  %p4840_p7 = scmp.lt.s32.totalorder %s4838_s22, %s4833_s18 }
  0x26   : > { %p4836_p4 = pnand %p4835_p2, %p4834_p0 }
  0x27   : > { %p4841_p8 = por %p4840_p7, %p4839_p6 }
  0x28   : > { %p4837_p5 = pneg %p4836_p4 }
  0x2a   : > { %p4842_p9 = pnand %p4841_p8, %p4837_p5 }
  0x2c   : > { %4845 = shalt.err (!%p4842_p9)
}
  0x2d   : > { %4651 = dma.hbm_to_vmem [thread:$0]  (!%p5086_p13), %s385_s20, 64, %s387_s23, %s375_s25  }
  0x2e   : > { %s403_s26 = sshll.u32 %s401_s10, 4  ;;  %s397_s14 = scalar_lea.vmem [#allocation7], %s4305_s16  ;;  %s404_s26 = int_to_ptr.hbm [resolvable:$true] %s403_s26 }
  0x2f   : > { %s405_s15 = sshll.u32 %s397_s14, 4  ;;  %s394_s12 = scalar_lea.sflag [#allocation8], %s393_s13  ;;  %s406_s15 = int_to_ptr.vmem [resolvable:$true] %s405_s15 }
  0x30   : > { %s4861_s19 = sshra.s32 %s404_s26, 4  ;;  %s4868_s18 = scalar_lea.hbm %s5775_s3, 8  ;;  %s4862_s19 = int_to_ptr.hbm [resolvable:$true] %s4861_s19 }
  0x31   : > { %s4863_s21 = scalar_lea.hbm %s4862_s19, 4  ;;  %p4869_p4 = scmp.lt.s32.totalorder %s4862_s19, %s5775_s3 }
  0x32   : > { %p4864_p10 = scmp.ne.s32.totalorder %s4862_s19, %s4863_s21  ;;  %p4870_p5 = scmp.lt.s32.totalorder %s4868_s18, %s4863_s21 }
  0x34   : > { %p4866_p11 = pnand %p4864_p10, %p4835_p2  ;;  %p4871_p6 = por %p4870_p5, %p4869_p4 }
  0x36   : > { %p4867_p0 = pneg %p4866_p11 }
  0x38   : > { %p4872_p7 = pnand %p4871_p6, %p4867_p0 }
  0x3a   : > { %4875 = shalt.err (!%p4872_p7)
}
  0x3b   : > { %4654 = dma.hbm_to_vmem [thread:$0]  (!%p5086_p13), %s404_s26, 64, %s406_s15, %s394_s12  }
  0x3c   : > { %414 = sbr.rel (%p5047_p3) target bundleno = 15246 (0x3b8e), region = 64  ;;  %s416_s10 = sand.u32 (!%p5047_p3), 1, %s4929_s24  }
  0x3d   : > { %s5121_s13 = sshll.u32 (!%p5047_p3), %s416_s10, 2  ;;  %s417_s16 = scalar_lea.sflag (!%p5047_p3), [#allocation6], %s416_s10 }
  0x3e   : > { %s420_s20 = scalar_lea.vmem (!%p5047_p3), [#allocation5], %s5121_s13 }
  0x41   : > { %4908 = dma.done.wait (%p5075_p12), %s417_s16, 64  }
  0x42   : > { %4910 = vsyncadd (%p5075_p12), %s417_s16, 4294967232  ;;  %s426_s12 = sand.u32 1, %s5042_s29   ;;  %s430_s30 = scalar_lea.vmem [#allocation7], %s5121_s13 }
  0x43   : > { %s427_s23 = scalar_lea.sflag [#allocation8], %s426_s12 }
  0x44   : > { %4912 = dma.done.wait (%p5075_p12), %s427_s23, 64  }
  0x45   : > { %4914 = vsyncadd (%p5075_p12), %s427_s23, 4294967232 }
  0x46   : > { %4916 = dma.done.wait (%p77_p1), [#allocation8], 256  }
  0x47   : > { %4918 = vsyncadd (%p77_p1), [#allocation8], 4294967040 }
  0x48   : > { %4920 = dma.done.wait (%p77_p1), [#allocation11], 256  }
  0x49   : > { %4922 = vsyncadd (%p77_p1), [#allocation11], 4294967040  ;;  %p490_p3 = scmp.lt.s32.totalorder %s5042_s29, 1  ;;  %v4621_v0 = vld [vmem:[%s5776_s4 + $0x8] sm:$0xff]  ;;  %v4620_v1 = vld [vmem:[%s5776_s4] sm:$0xff]  ;;  %vm543_vm0 = vcmask 261120   ;;  %v625_v59 = vlaneseq }
  0x4a   : > { %553 = vmatpush.bf16.msra.mxu0 %v4621_v0  ;;  %v5160_v5 = vld [vmem:[%s430_s30] sm:$0xf]  ;;  %vm633_vm1 = vcmask 64512   ;;  %v4703_v6 = vld [vmem:[%s5777_s5] ss:$0 sm:$0xff]  ;;  %v4623_v14 = vld [vmem:[%s5778_s6 + $0x8] sm:$0xff] }
  0x4b   : > { %s5806_s29 = smov (!%p490_p3, %s5042_s29), 1  ;;  %4628 = vmatpush.xpose.msk.msra.mxu3 %vm633_vm1, %v5160_v5  ;;  %v5181_v13 = vld [vmem:[%s420_s20] sm:$0xf]  ;;  %584 = vmatpush.bf16.msra.mxu1 %v4623_v14  ;;  %v4622_v15 = vld [vmem:[%s5778_s6] sm:$0xff]  ;;  %vm670_vm2 = vcmask 27648   ;;  %s4943_s13 = smov 120  }
  0x4c   : > { %s4617_s28 = sshll.u32 %s5806_s29, 3  ;;  %v4704_v25 = vld [vmem:[%s5779_s7] ss:$0 sm:$0xff]  ;;  %v4625_v42 = vld [vmem:[#allocation9 + $0x8] sm:$0xff]  ;;  %vm750_vm3 = vcmask 93184   ;;  %s632_s12 = sld [smem:[#allocation4]] }
  0x4d   : > { %s494_s26 = scalar_lea.vmem %s5773_s1, %s4617_s28  ;;  %615 = vmatpush.bf16.msra.mxu2 %v4625_v42  ;;  %v4624_v44 = vld [vmem:[#allocation9] sm:$0xff]  ;;  %vm766_vm4 = vcmask 1043456   ;;  %vm666_vm5 = vcmask 31744   ;;  %v626_v60 = vshrl.u32 %v625_v59, 7  ;;  %v628_v61 = vand.u32 127, %v625_v59  ;;  %s4945_s28 = smov 112  }
  0x4e   : > { %v4320_v2 = vld [vmem:[%s494_s26] sm:$0xf]  ;;  %v4619_v3 = vld [vmem:[%s494_s26] sm:$0x30]  ;;  %554 = vmatpush.bf16.msra.mxu0 %v4620_v1  ;;  %v4944_v63 = vmov 0.0   ;;  %vm762_vm7 = vcmask 97280  }
  0x4f   : > { %v5156_v4 = vor.u32 %v4619_v3, %v4320_v2  ;;  %4353 = vmatpush.xpose.msk.msrb.mxu3 %vm633_vm1, %v5160_v5  ;;  %585 = vmatpush.bf16.msra.mxu1 %v4622_v15  ;;  %v4705_v55 = vld [vmem:[%s5781_s9] ss:$0 sm:$0xff]  ;;  %vm629_vm6 = vcmp.eq.s32.totalorder %v626_v60, %v628_v61  ;;  %vm1501_vm8 = vcmask 60416   ;;  %s4946_s0 = smov 104   ;;  %s4947_s27 = smov 8   ;;  %vm2379_vm9 = vcmask 130112  }
  0x50   : > { %v4349_v0 = vsel %vm629_vm6, 1.0, %v4944_v63  ;;  %s4948_s26 = smov 16   ;;  %vm3258_vm10 = vcmask 195712   ;;  %vm2381_vm11 = vcmask 126016   ;;  %vm3260_vm12 = vcmask 191616   ;;  %s4949_s14 = smov 24  }
  0x51   : > { %4330 = vmatmul.msk.bf16.vlgmr.msra.gmra.mxu0 %vm543_vm0, %v5156_v4  ;;  %616 = vmatpush.bf16.msra.mxu2 %v4624_v44  ;;  %v5245_v1 = vmul.f32 7.0, %v4349_v0  ;;  %vm4137_vm13 = vcmask 261312   ;;  %vm4139_vm14 = vcmask 257216   ;;  %s4618_s15 = sshll.u32 %s5806_s29, 4  ;;  %s5799_s18 = sld [smem:[#allocation21_spill]]  ;;  %vm4177_vm15 = vcmask 257024  }
  0x52   : > { %4350 = vmatpush.xpose.msk.msrb.mxu0 %vm633_vm1, %v5160_v5  ;;  %4339 = vmatmul.msk.bf16.vlgmr.msra.gmra.mxu1 %vm543_vm0, %v5156_v4  ;;  %v5225_v46 = vstv %s632_s12 }
  0x54   : > { %4348 = vmatmul.msk.bf16.vlgmr.msra.gmra.mxu2 %vm543_vm0, %v5156_v4 }
  0x57   : > { %s499_s8 = scalar_lea.vmem %s5799_s18, %s4618_s15 }
  0xce   : > { %v556_v7 = vpop.f32.mrf.mxu0 }
  0xcf   : > { %v557_v8 = vadd.f32 %v4703_v6, %v556_v7  ;;  %v587_v24 = vpop.f32.mrf.mxu1 }
  0xd0   : > { %v588_v27 = vadd.f32 %v4704_v25, %v587_v24 }
  0xd1   : > { %v5171_v9 = vmul.f32 0.59460354, %v557_v8 }
  0xd2   : > { %v5202_v30 = vmul.f32 0.59460354, %v588_v27 }
  0xd3   : > { %4351 = vmatmul.msk.f32.vlgmr.msrb.gmra.mxu0 %vm633_vm1, %v5171_v9 }
  0xd6   : > { %v558_v10 = vpop.f32.mrf.mxu0 }
  0xd7   : > { %v559_v11 = vadd.f32 %v4703_v6, %v558_v10  ;;  %v589_v26 = vpop.f32.mrf.mxu1  ;;  %v618_v54 = vpop.f32.mrf.mxu2 }
  0xd8   : > { %v590_v28 = vadd.f32 %v4704_v25, %v589_v26  ;;  %v5235_v57 = vadd.f32 %v4705_v55, %v618_v54 }
  0xd9   : > { %v5175_v12 = vmul.f32 0.59460354, %v559_v11 }
  0xda   : > { %v5200_v29 = vmul.f32 0.59460354, %v590_v28 }
  0xdb   : > { %4352 = vmatmul.msk.f32.vlgmr.msra.gmra.mxu3 %vm633_vm1, %v5175_v12 }
  0xdc   : > { %4355 = vmatpush.xpose.msk.msra.mxu0 %vm633_vm1, %v5200_v29 }
  0xdf   : > { %v620_v56 = vpop.f32.mrf.mxu2 }
  0xe0   : > { %4356 = vmatpush.xpose.msk.msra.mxu0 %vm633_vm1, %v5202_v30  ;;  %v5237_v58 = vadd.f32 %v4705_v55, %v620_v56 }
  0xe2   : > { %4358 = vmatpush.msk.msrb.mxu1 %vm766_vm4, %v5237_v58 }
  0xe3   : > { %4354 = vmatmul.msk.f32.vlgmr.msrb.gmra.mxu3 %vm633_vm1, %v5181_v13  ;;  %4357 = vmatmul.msk.f32.vlgmr.msra.gmra.mxu0 %vm633_vm1, %v5181_v13 }
  0xe4   : > { %785 = vmatpush.msrb.mxu1 %v5235_v57 }
 0x150   : > { %v660_v41 = vpop.f32.mrf.mxu0 }
 0x151   : > { %v667_v62 = vsel %vm666_vm5, %v660_v41, -inf }
 0x15e   : > { %v663_v16 = vpop.f32.mrf.mxu3 }
 0x15f   : > { %v671_v31 = vsel %vm670_vm2, %v663_v16, -inf }
 0x160   : > { %v747_v43 = vpop.f32.mrf.mxu0 }
 0x161   : > { %v751_v45 = vsel %vm750_vm3, %v747_v43, -inf }
 0x166   : > { %v710_v17 = vpop.f32.mrf.mxu3 }
 0x167   : > { %v713_v18 = vsel %vm670_vm2, %v710_v17, -inf }
 0x168   : > { %714 = vmax.xlane.f32.xlu0 %v713_v18 }
 0x1db   : > { %v715_v19 = vpop.xlane.xlu0 %714 }
 0x1dc   : > { %v716_v20 = vsub.f32 %v710_v17, %v715_v19  ;;  %v5257_v17 = vmul.f32 15.0, %v4349_v0 }
 0x1de   : > { %v717_v21 = vmul.f32 1.442695, %v716_v20  ;;  %v5262_v20 = vmul.f32 13.0, %v4349_v0 }
 0x1e0   : > { %4707 = vpow2.f32 %v717_v21 }
 0x1e6   : > { %v4708_v22 = vpop.eup %4707 }
 0x1e7   : > { %v719_v23 = vsel %vm670_vm2, %v4708_v22, 0.0 }
 0x1e8   : > { %720 = vadd.xlane.f32.xlu0 %v719_v23 }
 0x1fc   : > { %1560 = vrot.lane.b32.xlu0 %v5181_v13, %s4943_s13 }
 0x226   : > { %672 = vmax.xlane.f32.xlu0 %v671_v31 }
 0x25b   : > { %v721_v32 = vpop.xlane.xlu0 %720 }
 0x25c   : > { %4709 = vrcp.f32 %v721_v32 }
 0x262   : > { %v4710_v33 = vpop.eup %4709 }
 0x263   : > { %v5211_v34 = vmul.f32 %v4710_v33, %v4708_v22 }
 0x265   : > { %790 = vxpose.xlu1.b32.start.end [1/1] (short) (narrow) %v5211_v34, 8 }
 0x26e   : > { %v5214_v35 = vpop.permute.xlu0 %1560 }
 0x299   : > { %v673_v36 = vpop.xlane.xlu0 %672 }
 0x29a   : > { %v675_v37 = vsub.f32 %v663_v16, %v673_v36 }
 0x29c   : > { %v678_v38 = vmul.f32 1.442695, %v675_v37 }
 0x29e   : > { %4711 = vpow2.f32 %v678_v38 }
 0x2a4   : > { %v5216_v39 = vpop.eup %4711 }
 0x2a5   : > { %v683_v40 = vsel %vm670_vm2, %v5216_v39, 0.0 }
 0x2a6   : > { %684 = vadd.xlane.f32.xlu0 %v683_v40 }
 0x2c5   : > { %752 = vmax.xlane.f32.xlu1 %v751_v45 }
 0x2de   : > { %1505 = vrot.lane.b32.xlu1 %v5175_v12, %s4943_s13 }
 0x309   : > { %v806_v47 = vpop.trf.xlu1 }
 0x30a   : > { %v823_v48 = vmul.f32 %v5225_v46, %v806_v47 }
 0x30c   : > { %4360 = vmatpush.msk.msrb.mxu2 %vm766_vm4, %v823_v48 }
 0x30d   : > { %4361 = vmatmul.msk.f32.vlgmr.msrb.gmra.mxu2 %vm666_vm5, %v5211_v34 }
 0x338   : > { %v753_v49 = vpop.xlane.xlu1 %752 }
 0x339   : > { %v754_v50 = vsub.f32 %v747_v43, %v753_v49 }
 0x33b   : > { %v755_v51 = vmul.f32 1.442695, %v754_v50 }
 0x33d   : > { %4713 = vpow2.f32 %v755_v51 }
 0x343   : > { %v4714_v52 = vpop.eup %4713 }
 0x344   : > { %v757_v53 = vsel %vm750_vm3, %v4714_v52, 0.0 }
 0x345   : > { %758 = vadd.xlane.f32.xlu2 %v757_v53 }
 0x35d   : > { %1507 = vrot.lane.b32.xlu2 %v5160_v5, %s4943_s13 }
 0x386   : > { %668 = vmax.xlane.f32.xlu2 %v667_v62 }
 0x390   : > { %v847_v2 = vpop.f32.mrf.mxu2 }
 0x391   : > { %v851_v3 = vsub.f32 %v5245_v1, %v847_v2 }
 0x393   : > { %4362 = vmatpush.msk.msra.mxu3 %vm766_vm4, %v851_v3 }
 0x394   : > { %4363 = vmatmul.msk.f32.vlgmr.msra.gmra.mxu3 %vm666_vm5, %v847_v2 }
 0x3b8   : > { %v759_v4 = vpop.xlane.xlu2 %758 }
 0x3b9   : > { %4715 = vrcp.f32 %v759_v4 }
 0x3bf   : > { %v4716_v6 = vpop.eup %4715 }
 0x3c0   : > { %v761_v7 = vmul.f32 %v4716_v6, %v4714_v52  ;;  %v5251_v8 = vpop.permute.xlu2 %1507 }
 0x3c2   : > { %4359 = vmatmul.msk.f32.vlgmr.msrb.gmra.mxu1 %vm762_vm7, %v761_v7 }
 0x3f9   : > { %v669_v10 = vpop.xlane.xlu2 %668 }
 0x3fa   : > { %v674_v11 = vsub.f32 %v660_v41, %v669_v10 }
 0x3fc   : > { %v676_v14 = vmul.f32 1.442695, %v674_v11 }
 0x3fe   : > { %4717 = vpow2.f32 %v676_v14  ;;  %v685_v14 = vpop.xlane.xlu0 %684 }
 0x404   : > { %v5253_v15 = vpop.eup %4717 }
 0x405   : > { %v680_v16 = vsel %vm666_vm5, %v5253_v15, 0.0 }
 0x406   : > { %681 = vadd.xlane.f32.xlu2 %v680_v16 }
 0x417   : > { %v876_v18 = vpop.f32.mrf.mxu3 }
 0x418   : > { %v879_v19 = vsub.f32 %v5257_v17, %v876_v18 }
 0x41a   : > { %4364 = vmatpush.msk.msrb.mxu0 %vm766_vm4, %v879_v19 }
 0x41b   : > { %4365 = vmatmul.msk.f32.vlgmr.msrb.gmra.mxu0 %vm666_vm5, %v847_v2 }
 0x43f   : > { %v5267_v23 = vpop.f32.mrf.mxu1 }
 0x479   : > { %v682_v11 = vpop.xlane.xlu2 %681 }
 0x47a   : > { %4719 = vrcp.f32 %v682_v11 }
 0x47b   : > { %4721 = vrcp.f32 %v685_v14 }
 0x480   : > { %v4720_v16 = vpop.eup %4719 }
 0x498   : > { %v901_v21 = vpop.f32.mrf.mxu0 }
 0x499   : > { %v904_v22 = vsub.f32 %v5262_v20, %v901_v21  ;;  %v688_v21 = vmul.f32 %v4720_v16, %v5253_v15 }
 0x49b   : > { %4366 = vmatpush.msk.msra.mxu1 %vm766_vm4, %v904_v22  ;;  %v4722_v22 = vpop.eup %4721 }
 0x49c   : > { %4367 = vmatmul.msk.f32.vlgmr.msra.gmra.mxu1 %vm666_vm5, %v823_v48 }
 0x519   : > { %v927_v24 = vpop.f32.mrf.mxu1 }
 0x51a   : > { %v930_v25 = vmul.f32 0.25, %v927_v24  ;;  %v689_v24 = vmul.f32 %v4722_v22, %v5216_v39 }
 0x51c   : > { %4368 = vmatpush.msk.msra.mxu2 %vm766_vm4, %v930_v25 }
 0x51d   : > { %4369 = vmatmul.msk.f32.vlgmr.msra.gmra.mxu2 %vm666_vm5, %v5211_v34 }
 0x5a0   : > { %v951_v26 = vpop.f32.mrf.mxu2 }
 0x5a1   : > { %v954_v27 = vsub.f32 %v5245_v1, %v951_v26 }
 0x5a3   : > { %4370 = vmatpush.msk.msrb.mxu3 %vm766_vm4, %v954_v27 }
 0x5a4   : > { %4371 = vmatmul.msk.f32.vlgmr.msrb.gmra.mxu3 %vm666_vm5, %v951_v26 }
 0x627   : > { %v978_v28 = vpop.f32.mrf.mxu3 }
 0x628   : > { %v981_v31 = vsub.f32 %v5257_v17, %v978_v28 }
 0x62a   : > { %4372 = vmatpush.msk.msra.mxu0 %vm766_vm4, %v981_v31 }
 0x62b   : > { %4373 = vmatmul.msk.f32.vlgmr.msra.gmra.mxu0 %vm666_vm5, %v951_v26 }
 0x6a8   : > { %v1002_v32 = vpop.f32.mrf.mxu0 }
 0x6a9   : > { %v1005_v33 = vsub.f32 %v5262_v20, %v1002_v32 }
 0x6ab   : > { %4374 = vmatpush.msk.msrb.mxu1 %vm766_vm4, %v1005_v33 }
 0x6ac   : > { %4375 = vmatmul.msk.f32.vlgmr.msrb.gmra.mxu1 %vm666_vm5, %v930_v25 }
 0x729   : > { %v1028_v36 = vpop.f32.mrf.mxu1 }
 0x72a   : > { %v1031_v37 = vmul.f32 0.25, %v1028_v36 }
 0x72c   : > { %4376 = vmatpush.msk.msrb.mxu2 %vm766_vm4, %v1031_v37 }
 0x72d   : > { %4377 = vmatmul.msk.f32.vlgmr.msrb.gmra.mxu2 %vm666_vm5, %v5211_v34 }
 0x7b0   : > { %v1052_v38 = vpop.f32.mrf.mxu2 }
 0x7b1   : > { %v1055_v40 = vsub.f32 %v5245_v1, %v1052_v38 }
 0x7b3   : > { %4378 = vmatpush.msk.msra.mxu3 %vm766_vm4, %v1055_v40 }
 0x7b4   : > { %4379 = vmatmul.msk.f32.vlgmr.msra.gmra.mxu3 %vm666_vm5, %v1052_v38 }
 0x837   : > { %v1079_v41 = vpop.f32.mrf.mxu3 }
 0x838   : > { %v1082_v42 = vsub.f32 %v5257_v17, %v1079_v41  ;;  %v1506_v41 = vpop.permute.xlu1 %1505 }
 0x83a   : > { %4380 = vmatpush.msk.msrb.mxu0 %vm766_vm4, %v1082_v42 }
 0x83b   : > { %4381 = vmatmul.msk.f32.vlgmr.msrb.gmra.mxu0 %vm666_vm5, %v1052_v38 }
 0x8b8   : > { %v1103_v43 = vpop.f32.mrf.mxu0 }
 0x8b9   : > { %v1106_v44 = vsub.f32 %v5262_v20, %v1103_v43 }
 0x8bb   : > { %4382 = vmatpush.msk.msra.mxu1 %vm766_vm4, %v1106_v44 }
 0x8bc   : > { %4383 = vmatmul.msk.f32.vlgmr.msra.gmra.mxu1 %vm666_vm5, %v1031_v37 }
 0x939   : > { %v1129_v45 = vpop.f32.mrf.mxu1 }
 0x93a   : > { %v1132_v47 = vmul.f32 0.25, %v1129_v45 }
 0x93c   : > { %4384 = vmatpush.msk.msra.mxu2 %vm766_vm4, %v1132_v47 }
 0x93d   : > { %4385 = vmatmul.msk.f32.vlgmr.msra.gmra.mxu2 %vm666_vm5, %v5211_v34 }
 0x9c0   : > { %v1153_v48 = vpop.f32.mrf.mxu2 }
 0x9c1   : > { %v1156_v49 = vsub.f32 %v5245_v1, %v1153_v48 }
 0x9c3   : > { %4386 = vmatpush.msk.msrb.mxu3 %vm766_vm4, %v1156_v49 }
 0x9c4   : > { %4387 = vmatmul.msk.f32.vlgmr.msrb.gmra.mxu3 %vm666_vm5, %v1153_v48 }
 0xa47   : > { %v1180_v50 = vpop.f32.mrf.mxu3 }
 0xa48   : > { %v1183_v51 = vsub.f32 %v5257_v17, %v1180_v50 }
 0xa4a   : > { %4388 = vmatpush.msk.msra.mxu0 %vm766_vm4, %v1183_v51 }
 0xa4b   : > { %4389 = vmatmul.msk.f32.vlgmr.msra.gmra.mxu0 %vm666_vm5, %v1153_v48 }
 0xac8   : > { %v1204_v52 = vpop.f32.mrf.mxu0 }
 0xac9   : > { %v1207_v53 = vsub.f32 %v5262_v20, %v1204_v52 }
 0xacb   : > { %4390 = vmatpush.msk.msrb.mxu1 %vm766_vm4, %v1207_v53 }
 0xacc   : > { %4391 = vmatmul.msk.f32.vlgmr.msrb.gmra.mxu1 %vm666_vm5, %v1132_v47 }
 0xb49   : > { %v1230_v54 = vpop.f32.mrf.mxu1 }
 0xb4a   : > { %v1233_v55 = vmul.f32 0.25, %v1230_v54 }
 0xb4c   : > { %4392 = vmatpush.msk.msrb.mxu2 %vm766_vm4, %v1233_v55 }
 0xb4d   : > { %4393 = vmatmul.msk.f32.vlgmr.msrb.gmra.mxu2 %vm666_vm5, %v5211_v34 }
 0xbd0   : > { %v1254_v56 = vpop.f32.mrf.mxu2 }
 0xbd1   : > { %v1257_v59 = vsub.f32 %v5245_v1, %v1254_v56 }
 0xbd3   : > { %4394 = vmatpush.msk.msra.mxu3 %vm766_vm4, %v1257_v59 }
 0xbd4   : > { %4395 = vmatmul.msk.f32.vlgmr.msra.gmra.mxu3 %vm666_vm5, %v1254_v56 }
 0xc57   : > { %v1281_v60 = vpop.f32.mrf.mxu3 }
 0xc58   : > { %v1284_v61 = vsub.f32 %v5257_v17, %v1281_v60 }
 0xc5a   : > { %4396 = vmatpush.msk.msrb.mxu0 %vm766_vm4, %v1284_v61 }
 0xc5b   : > { %4397 = vmatmul.msk.f32.vlgmr.msrb.gmra.mxu0 %vm666_vm5, %v1254_v56 }
 0xcd8   : > { %v1305_v62 = vpop.f32.mrf.mxu0 }
 0xcd9   : > { %v1308_v63 = vsub.f32 %v5262_v20, %v1305_v62 }
 0xcdb   : > { %4398 = vmatpush.msk.msra.mxu1 %vm766_vm4, %v1308_v63 }
 0xcdc   : > { %4399 = vmatmul.msk.f32.vlgmr.msra.gmra.mxu1 %vm666_vm5, %v1233_v55 }
 0xd59   : > { %v1331_v0 = vpop.f32.mrf.mxu1 }
 0xd5a   : > { %v1334_v2 = vmul.f32 0.25, %v1331_v0 }
 0xd5c   : > { %4400 = vmatpush.msk.msra.mxu2 %vm766_vm4, %v1334_v2 }
 0xd5d   : > { %4401 = vmatmul.msk.f32.vlgmr.msra.gmra.mxu2 %vm666_vm5, %v5211_v34 }
 0xde0   : > { %v1355_v3 = vpop.f32.mrf.mxu2 }
 0xde1   : > { %v1358_v4 = vsub.f32 %v5245_v1, %v1355_v3 }
 0xde3   : > { %4402 = vmatpush.msk.msrb.mxu3 %vm766_vm4, %v1358_v4 }
 0xde4   : > { %4403 = vmatmul.msk.f32.vlgmr.msrb.gmra.mxu3 %vm666_vm5, %v1355_v3 }
 0xde5   : > { %4411 = vmatpush.msk.msra.mxu3 %vm766_vm4, %v5267_v23 }
 0xe67   : > { %v1382_v6 = vpop.f32.mrf.mxu3 }
 0xe68   : > { %v1385_v7 = vsub.f32 %v5257_v17, %v1382_v6 }
 0xe6a   : > { %4404 = vmatpush.msk.msra.mxu0 %vm766_vm4, %v1385_v7 }
 0xe6b   : > { %4405 = vmatmul.msk.f32.vlgmr.msra.gmra.mxu0 %vm666_vm5, %v1355_v3 }
 0xe6c   : > { %4414 = vmatpush.xpose.msk.msrb.mxu0 %vm633_vm1, %v5251_v8 }
 0xee8   : > { %v1406_v34 = vpop.f32.mrf.mxu0 }
 0xee9   : > { %v1409_v10 = vsub.f32 %v5262_v20, %v1406_v34 }
 0xeeb   : > { %4406 = vmatpush.msk.msrb.mxu1 %vm766_vm4, %v1409_v10 }
 0xeec   : > { %4407 = vmatmul.msk.f32.vlgmr.msrb.gmra.mxu1 %vm666_vm5, %v1334_v2 }
 0xeed   : > { %4417 = vmatpush.xpose.msk.msra.mxu1 %vm633_vm1, %v5251_v8 }
 0xef4   : > { %4418 = vmatmul.msk.f32.vlgmr.msra.gmra.mxu1 %vm633_vm1, %v5214_v35 }
 0xf69   : > { %v1432_v18 = vpop.f32.mrf.mxu1 }
 0xf6a   : > { %v1435_v19 = vmul.f32 0.25, %v1432_v18 }
 0xf6c   : > { %4408 = vmatpush.msk.msrb.mxu2 %vm766_vm4, %v1435_v19 }
 0xf6d   : > { %4409 = vmatmul.msk.f32.vlgmr.msrb.gmra.mxu2 %vm666_vm5, %v688_v21 }
 0xf71   : > { %v1581_v23 = vpop.f32.mrf.mxu1 }
 0xf72   : > { %v1584_v8 = vsel %vm670_vm2, %v1581_v23, -inf }
 0xf73   : > { %1585 = vmax.xlane.f32.xlu2 %v1584_v8 }
 0xf75   : > { %4410 = vmatmul.msk.f32.gmra.mxu2 %vm666_vm5, %v689_v24 }
 0xfe6   : > { %v1586_v25 = vpop.xlane.xlu2 %1585 }
 0xfe7   : > { %v1587_v26 = vsub.f32 %v1581_v23, %v1586_v25 }
 0xfe9   : > { %v1588_v27 = vmul.f32 1.442695, %v1587_v26 }
 0xfeb   : > { %4723 = vpow2.f32 %v1588_v27 }
 0xff0   : > { %v1462_v28 = vpop.f32.mrf.mxu2 }
 0xff1   : > { %v4724_v31 = vpop.eup %4723  ;;  %4412 = vmatmul.msk.f32.vlgmr.msra.gmra.mxu3 %vm666_vm5, %v1462_v28 }
 0xff2   : > { %v1590_v15 = vsel %vm670_vm2, %v4724_v31, 0.0 }
 0xff3   : > { %1591 = vadd.xlane.f32.xlu0 %v1590_v15 }
 0xff8   : > { %v1465_v32 = vpop.f32.mrf.mxu2 }
 0xff9   : > { %4413 = vmatmul.msk.f32.gmra.mxu3 %vm666_vm5, %v1465_v32 }
0x1007   : > { %1503 = vrot.lane.b32.xlu0 %v5171_v9, %s4943_s13 }
0x100f   : > { %1597 = vrot.lane.b32.xlu0 %v5200_v29, %s4943_s13 }
0x1017   : > { %1595 = vrot.lane.b32.xlu0 %v5202_v30, %s4943_s13 }
0x1066   : > { %v1592_v39 = vpop.xlane.xlu0 %1591 }
0x1067   : > { %4725 = vrcp.f32 %v1592_v39 }
0x106d   : > { %v4726_v33 = vpop.eup %4725 }
0x106e   : > { %v5352_v36 = vmul.f32 %v4726_v33, %v4724_v31 }
0x1070   : > { %1665 = vxpose.xlu2.b32.start.end [1/1] (short) (narrow) %v5352_v36, 8 }
0x1074   : > { %v1494_v37 = vpop.f32.mrf.mxu3 }
0x1075   : > { %1500 = vst.msk [vmem:[#allocation2] sm:$0xff] %vm633_vm1, %v1494_v37 }
0x1079   : > { %v1504_v38 = vpop.permute.xlu0 %1503 }
0x107a   : > { %4415 = vmatmul.msk.f32.vlgmr.msrb.gmra.mxu0 %vm633_vm1, %v1504_v38 }
0x107c   : > { %v1497_v40 = vpop.f32.mrf.mxu3 }
0x107d   : > { %1502 = vst.msk [vmem:[#allocation2 + $0x8] sm:$0xf] %vm1501_vm8, %v1497_v40 }
0x1081   : > { %v1598_v42 = vpop.permute.xlu0 %1597 }
0x1082   : > { %4416 = vmatmul.msk.f32.gmra.mxu0 %vm633_vm1, %v1506_v41  ;;  %4419 = vmatpush.xpose.msk.msrb.mxu1 %vm633_vm1, %v1598_v42 }
0x1089   : > { %v1596_v43 = vpop.permute.xlu0 %1595 }
0x108a   : > { %4420 = vmatpush.xpose.msk.msrb.mxu1 %vm633_vm1, %v1596_v43 }
0x108d   : > { %4421 = vmatmul.msk.f32.vlgmr.msrb.gmra.mxu1 %vm633_vm1, %v5214_v35 }
0x10d9   : > { %1637 = vrot.lane.b32.xlu2 %v5237_v58, %s4943_s13 }
0x10f7   : > { %v1532_v35 = vpop.f32.mrf.mxu0 }
0x10f8   : > { %v1538_v50 = vsel %vm666_vm5, %v1532_v35, -inf }
0x10ff   : > { %v1535_v2 = vpop.f32.mrf.mxu0 }
0x1100   : > { %v1541_v4 = vsel %vm670_vm2, %v1535_v2, -inf }
0x1109   : > { %v1681_v44 = vpop.trf.xlu2 }
0x110a   : > { %v1697_v45 = vmul.f32 %v1681_v44, %v5225_v46  ;;  %v1620_v47 = vpop.f32.mrf.mxu1 }
0x110b   : > { %v1623_v48 = vsel %vm750_vm3, %v1620_v47, -inf }
0x110c   : > { %4424 = vmatpush.msk.msrb.mxu3 %vm766_vm4, %v1697_v45  ;;  %1624 = vmax.xlane.f32.xlu1 %v1623_v48 }
0x110d   : > { %4425 = vmatmul.msk.f32.vlgmr.msrb.gmra.mxu3 %vm666_vm5, %v5352_v36 }
0x1125   : > { %1635 = vrot.lane.b32.xlu1 %v5235_v57, %s4943_s13 }
0x1133   : > { %v1638_v49 = vpop.permute.xlu2 %1637 }
0x1134   : > { %4422 = vmatpush.msk.msra.mxu2 %vm766_vm4, %v1638_v49 }
0x114f   : > { %1539 = vmax.xlane.f32.xlu1 %v1538_v50 }
0x117f   : > { %v1625_v51 = vpop.xlane.xlu1 %1624 }
0x1180   : > { %v1626_v52 = vsub.f32 %v1620_v47, %v1625_v51 }
0x1182   : > { %v1627_v53 = vmul.f32 1.442695, %v1626_v52 }
0x1184   : > { %4727 = vpow2.f32 %v1627_v53 }
0x118a   : > { %v4728_v54 = vpop.eup %4727 }
0x118b   : > { %v1629_v55 = vsel %vm750_vm3, %v4728_v54, 0.0 }
0x118c   : > { %1630 = vadd.xlane.f32.xlu0 %v1629_v55 }
0x1190   : > { %v1721_v56 = vpop.f32.mrf.mxu3 }
0x1191   : > { %v1724_v59 = vsub.f32 %v5245_v1, %v1721_v56 }
0x1193   : > { %4426 = vmatpush.msk.msra.mxu0 %vm766_vm4, %v1724_v59 }
0x1194   : > { %4427 = vmatmul.msk.f32.vlgmr.msra.gmra.mxu0 %vm666_vm5, %v1721_v56 }
0x1197   : > { %v1636_v60 = vpop.permute.xlu1 %1635 }
0x1198   : > { %1660 = vmatpush.msra.mxu2 %v1636_v60 }
0x11a0   : > { %2387 = vrot.lane.b32.xlu0 %v5160_v5, %s4945_s28 }
0x11a8   : > { %2440 = vrot.lane.b32.xlu0 %v5181_v13, %s4945_s28 }
0x11c2   : > { %v1540_v61 = vpop.xlane.xlu1 %1539 }
0x11c3   : > { %v1544_v62 = vsub.f32 %v1532_v35, %v1540_v61 }
0x11c5   : > { %v1546_v63 = vmul.f32 1.442695, %v1544_v62 }
0x11c7   : > { %4729 = vpow2.f32 %v1546_v63 }
0x11cd   : > { %v5381_v0 = vpop.eup %4729 }
0x11ce   : > { %v1550_v3 = vsel %vm666_vm5, %v5381_v0, 0.0 }
0x11cf   : > { %1551 = vadd.xlane.f32.xlu2 %v1550_v3 }
0x11d2   : > { %1542 = vmax.xlane.f32.xlu0 %v1541_v4 }
0x11e7   : > { %2385 = vrot.lane.b32.xlu2 %v5175_v12, %s4945_s28 }
0x11ef   : > { %2516 = vrot.lane.b32.xlu2 %v5237_v58, %s4945_s28 }
0x11f7   : > { %2514 = vrot.lane.b32.xlu2 %v5235_v57, %s4945_s28 }
0x11ff   : > { %v1631_v6 = vpop.xlane.xlu0 %1630  ;;  %3266 = vrot.lane.b32.xlu2 %v5160_v5, %s4946_s0 }
0x1200   : > { %4731 = vrcp.f32 %v1631_v6 }
0x1206   : > { %v4732_v7 = vpop.eup %4731 }
0x1207   : > { %v1633_v34 = vmul.f32 %v4732_v7, %v4728_v54  ;;  %3319 = vrot.lane.b32.xlu2 %v5181_v13, %s4946_s0 }
0x1209   : > { %4423 = vmatmul.msk.f32.vlgmr.msra.gmra.mxu2 %vm762_vm7, %v1633_v34 }
0x1211   : > { %v1748_v10 = vpop.f32.mrf.mxu0 }
0x1212   : > { %v1751_v11 = vsub.f32 %v5257_v17, %v1748_v10  ;;  %v5396_v14 = vpop.permute.xlu0 %2387 }
0x1214   : > { %4428 = vmatpush.msk.msra.mxu1 %vm766_vm4, %v1751_v11 }
0x1215   : > { %4429 = vmatmul.msk.f32.vlgmr.msra.gmra.mxu1 %vm666_vm5, %v1721_v56 }
0x121a   : > { %v5398_v16 = vpop.permute.xlu0 %2440 }
0x1242   : > { %v1552_v11 = vpop.xlane.xlu2 %1551 }
0x1245   : > { %v1543_v18 = vpop.xlane.xlu0 %1542 }
0x1246   : > { %v1545_v19 = vsub.f32 %v1535_v2, %v1543_v18 }
0x1248   : > { %v1548_v21 = vmul.f32 1.442695, %v1545_v19 }
0x124a   : > { %4733 = vpow2.f32 %v1548_v21  ;;  %v2386_v18 = vpop.permute.xlu2 %2385 }
0x124b   : > { %4735 = vrcp.f32 %v1552_v11 }
0x1250   : > { %v5400_v22 = vpop.eup %4733 }
0x1251   : > { %v1553_v23 = vsel %vm670_vm2, %v5400_v22, 0.0 }
0x1252   : > { %1554 = vadd.xlane.f32.xlu1 %v1553_v23  ;;  %v2517_v19 = vpop.permute.xlu2 %2516  ;;  %v4736_v23 = vpop.eup %4735 }
0x128c   : > { %v5407_v25 = vpop.f32.mrf.mxu2 }
0x1292   : > { %v1772_v8 = vpop.f32.mrf.mxu1 }
0x1293   : > { %v1775_v24 = vsub.f32 %v5262_v20, %v1772_v8 }
0x1295   : > { %4430 = vmatpush.msk.msrb.mxu2 %vm766_vm4, %v1775_v24 }
0x1296   : > { %4431 = vmatmul.msk.f32.vlgmr.msrb.gmra.mxu2 %vm666_vm5, %v1697_v45 }
0x12c5   : > { %v1555_v21 = vpop.xlane.xlu1 %1554 }
0x12c6   : > { %4737 = vrcp.f32 %v1555_v21 }
0x1319   : > { %v1798_v26 = vpop.f32.mrf.mxu2 }
0x131a   : > { %v1801_v27 = vmul.f32 0.25, %v1798_v26  ;;  %v4738_v26 = vpop.eup %4737 }
0x131c   : > { %4432 = vmatpush.msk.msra.mxu3 %vm766_vm4, %v1801_v27 }
0x131d   : > { %4433 = vmatmul.msk.f32.vlgmr.msra.gmra.mxu3 %vm666_vm5, %v5352_v36 }
0x13a0   : > { %v1822_v28 = vpop.f32.mrf.mxu3 }
0x13a1   : > { %v1825_v31 = vsub.f32 %v5245_v1, %v1822_v28 }
0x13a3   : > { %4434 = vmatpush.msk.msrb.mxu0 %vm766_vm4, %v1825_v31  ;;  %v1559_v31 = vmul.f32 %v4738_v26, %v5400_v22 }
0x13a4   : > { %4435 = vmatmul.msk.f32.vlgmr.msrb.gmra.mxu0 %vm666_vm5, %v1822_v28 }
0x1421   : > { %v1849_v15 = vpop.f32.mrf.mxu0 }
0x1422   : > { %v1852_v32 = vsub.f32 %v5257_v17, %v1849_v15 }
0x1424   : > { %4436 = vmatpush.msk.msrb.mxu1 %vm766_vm4, %v1852_v32 }
0x1425   : > { %4437 = vmatmul.msk.f32.vlgmr.msrb.gmra.mxu1 %vm666_vm5, %v1822_v28 }
0x14a2   : > { %v1873_v39 = vpop.f32.mrf.mxu1 }
0x14a3   : > { %v1876_v33 = vsub.f32 %v5262_v20, %v1873_v39 }
0x14a5   : > { %4438 = vmatpush.msk.msra.mxu2 %vm766_vm4, %v1876_v33 }
0x14a6   : > { %4439 = vmatmul.msk.f32.vlgmr.msra.gmra.mxu2 %vm666_vm5, %v1801_v27 }
0x1529   : > { %v1899_v37 = vpop.f32.mrf.mxu2 }
0x152a   : > { %v1902_v38 = vmul.f32 0.25, %v1899_v37 }
0x152c   : > { %4440 = vmatpush.msk.msrb.mxu3 %vm766_vm4, %v1902_v38 }
0x152d   : > { %4441 = vmatmul.msk.f32.vlgmr.msrb.gmra.mxu3 %vm666_vm5, %v5352_v36 }
0x15b0   : > { %v1923_v40 = vpop.f32.mrf.mxu3 }
0x15b1   : > { %v1926_v41 = vsub.f32 %v5245_v1, %v1923_v40 }
0x15b3   : > { %4442 = vmatpush.msk.msra.mxu0 %vm766_vm4, %v1926_v41 }
0x15b4   : > { %4443 = vmatmul.msk.f32.vlgmr.msra.gmra.mxu0 %vm666_vm5, %v1923_v40 }
0x1631   : > { %v1950_v42 = vpop.f32.mrf.mxu0 }
0x1632   : > { %v1953_v43 = vsub.f32 %v5257_v17, %v1950_v42 }
0x1634   : > { %4444 = vmatpush.msk.msra.mxu1 %vm766_vm4, %v1953_v43 }
0x1635   : > { %4445 = vmatmul.msk.f32.vlgmr.msra.gmra.mxu1 %vm666_vm5, %v1923_v40 }
0x16b2   : > { %v1974_v44 = vpop.f32.mrf.mxu1 }
0x16b3   : > { %v1977_v45 = vsub.f32 %v5262_v20, %v1974_v44 }
0x16b5   : > { %4446 = vmatpush.msk.msrb.mxu2 %vm766_vm4, %v1977_v45 }
0x16b6   : > { %4447 = vmatmul.msk.f32.vlgmr.msrb.gmra.mxu2 %vm666_vm5, %v1902_v38 }
0x1739   : > { %v2000_v47 = vpop.f32.mrf.mxu2 }
0x173a   : > { %v2003_v48 = vmul.f32 0.25, %v2000_v47 }
0x173c   : > { %4448 = vmatpush.msk.msra.mxu3 %vm766_vm4, %v2003_v48 }
0x173d   : > { %4449 = vmatmul.msk.f32.vlgmr.msra.gmra.mxu3 %vm666_vm5, %v5352_v36 }
0x17c0   : > { %v2024_v49 = vpop.f32.mrf.mxu3 }
0x17c1   : > { %v2027_v35 = vsub.f32 %v5245_v1, %v2024_v49 }
0x17c3   : > { %4450 = vmatpush.msk.msrb.mxu0 %vm766_vm4, %v2027_v35 }
0x17c4   : > { %4451 = vmatmul.msk.f32.vlgmr.msrb.gmra.mxu0 %vm666_vm5, %v2024_v49 }
0x1841   : > { %v2051_v50 = vpop.f32.mrf.mxu0 }
0x1842   : > { %v2054_v51 = vsub.f32 %v5257_v17, %v2051_v50 }
0x1844   : > { %4452 = vmatpush.msk.msrb.mxu1 %vm766_vm4, %v2054_v51 }
0x1845   : > { %4453 = vmatmul.msk.f32.vlgmr.msrb.gmra.mxu1 %vm666_vm5, %v2024_v49 }
0x18c2   : > { %v2075_v52 = vpop.f32.mrf.mxu1 }
0x18c3   : > { %v2078_v53 = vsub.f32 %v5262_v20, %v2075_v52 }
0x18c5   : > { %4454 = vmatpush.msk.msra.mxu2 %vm766_vm4, %v2078_v53 }
0x18c6   : > { %4455 = vmatmul.msk.f32.vlgmr.msra.gmra.mxu2 %vm666_vm5, %v2003_v48 }
0x1949   : > { %v2101_v54 = vpop.f32.mrf.mxu2 }
0x194a   : > { %v2104_v55 = vmul.f32 0.25, %v2101_v54 }
0x194c   : > { %4456 = vmatpush.msk.msrb.mxu3 %vm766_vm4, %v2104_v55 }
0x194d   : > { %4457 = vmatmul.msk.f32.vlgmr.msrb.gmra.mxu3 %vm666_vm5, %v5352_v36 }
0x19d0   : > { %v2125_v56 = vpop.f32.mrf.mxu3 }
0x19d1   : > { %v2128_v59 = vsub.f32 %v5245_v1, %v2125_v56 }
0x19d3   : > { %4458 = vmatpush.msk.msra.mxu0 %vm766_vm4, %v2128_v59 }
0x19d4   : > { %4459 = vmatmul.msk.f32.vlgmr.msra.gmra.mxu0 %vm666_vm5, %v2125_v56 }
0x1a51   : > { %v2152_v60 = vpop.f32.mrf.mxu0 }
0x1a52   : > { %v2155_v61 = vsub.f32 %v5257_v17, %v2152_v60 }
0x1a54   : > { %4460 = vmatpush.msk.msra.mxu1 %vm766_vm4, %v2155_v61 }
0x1a55   : > { %4461 = vmatmul.msk.f32.vlgmr.msra.gmra.mxu1 %vm666_vm5, %v2125_v56 }
0x1ad2   : > { %v2176_v62 = vpop.f32.mrf.mxu1 }
0x1ad3   : > { %v2179_v63 = vsub.f32 %v5262_v20, %v2176_v62 }
0x1ad5   : > { %4462 = vmatpush.msk.msrb.mxu2 %vm766_vm4, %v2179_v63 }
0x1ad6   : > { %4463 = vmatmul.msk.f32.vlgmr.msrb.gmra.mxu2 %vm666_vm5, %v2104_v55 }
0x1b59   : > { %v2202_v2 = vpop.f32.mrf.mxu2 }
0x1b5a   : > { %v2205_v3 = vmul.f32 0.25, %v2202_v2 }
0x1b5c   : > { %4464 = vmatpush.msk.msra.mxu3 %vm766_vm4, %v2205_v3 }
0x1b5d   : > { %4465 = vmatmul.msk.f32.vlgmr.msra.gmra.mxu3 %vm666_vm5, %v5352_v36 }
0x1be0   : > { %v2226_v4 = vpop.f32.mrf.mxu3 }
0x1be1   : > { %v2229_v6 = vsub.f32 %v5245_v1, %v2226_v4 }
0x1be3   : > { %4466 = vmatpush.msk.msrb.mxu0 %vm766_vm4, %v2229_v6 }
0x1be4   : > { %4467 = vmatmul.msk.f32.vlgmr.msrb.gmra.mxu0 %vm666_vm5, %v2226_v4 }
0x1be5   : > { %4475 = vmatpush.msk.msra.mxu0 %vm766_vm4, %v5407_v25  ;;  %v1558_v25 = vmul.f32 %v4736_v23, %v5381_v0 }
0x1c61   : > { %v2253_v7 = vpop.f32.mrf.mxu0 }
0x1c62   : > { %v2256_v34 = vsub.f32 %v5257_v17, %v2253_v7 }
0x1c64   : > { %4468 = vmatpush.msk.msrb.mxu1 %vm766_vm4, %v2256_v34 }
0x1c65   : > { %4469 = vmatmul.msk.f32.vlgmr.msrb.gmra.mxu1 %vm666_vm5, %v2226_v4 }
0x1c66   : > { %4478 = vmatpush.xpose.msk.msra.mxu1 %vm633_vm1, %v5396_v14 }
0x1ce2   : > { %v2277_v36 = vpop.f32.mrf.mxu1 }
0x1ce3   : > { %v2280_v10 = vsub.f32 %v5262_v20, %v2277_v36 }
0x1ce5   : > { %4470 = vmatpush.msk.msra.mxu2 %vm766_vm4, %v2280_v10 }
0x1ce6   : > { %4471 = vmatmul.msk.f32.vlgmr.msra.gmra.mxu2 %vm666_vm5, %v2205_v3 }
0x1ce7   : > { %4481 = vmatpush.xpose.msk.msrb.mxu2 %vm633_vm1, %v5396_v14  ;;  %v2515_v14 = vpop.permute.xlu2 %2514 }
0x1cee   : > { %4482 = vmatmul.msk.f32.vlgmr.msrb.gmra.mxu2 %vm633_vm1, %v5398_v16 }
0x1d69   : > { %v2303_v8 = vpop.f32.mrf.mxu2 }
0x1d6a   : > { %v2306_v24 = vmul.f32 0.25, %v2303_v8 }
0x1d6c   : > { %4472 = vmatpush.msk.msrb.mxu3 %vm766_vm4, %v2306_v24 }
0x1d6d   : > { %4473 = vmatmul.msk.f32.vlgmr.msrb.gmra.mxu3 %vm666_vm5, %v1558_v25 }
0x1d6e   : > { %4486 = vmatpush.msk.msra.mxu3 %vm766_vm4, %v2517_v19 }
0x1d70   : > { %2539 = vmatpush.msra.mxu3 %v2515_v14 }
0x1d71   : > { %v2461_v27 = vpop.f32.mrf.mxu2 }
0x1d72   : > { %v2464_v28 = vsel %vm670_vm2, %v2461_v27, -inf }
0x1d73   : > { %2465 = vmax.xlane.f32.xlu0 %v2464_v28 }
0x1d75   : > { %4474 = vmatmul.msk.f32.gmra.mxu3 %vm666_vm5, %v1559_v31 }
0x1de6   : > { %v2466_v15 = vpop.xlane.xlu0 %2465 }
0x1de7   : > { %v2467_v32 = vsub.f32 %v2461_v27, %v2466_v15 }
0x1de9   : > { %v2468_v0 = vmul.f32 1.442695, %v2467_v32 }
0x1deb   : > { %4739 = vpow2.f32 %v2468_v0 }
0x1df0   : > { %v2333_v39 = vpop.f32.mrf.mxu3 }
0x1df1   : > { %v4740_v33 = vpop.eup %4739  ;;  %4476 = vmatmul.msk.f32.vlgmr.msra.gmra.mxu0 %vm666_vm5, %v2333_v39 }
0x1df2   : > { %v2470_v37 = vsel %vm670_vm2, %v4740_v33, 0.0 }
0x1df3   : > { %2471 = vadd.xlane.f32.xlu1 %v2470_v37 }
0x1df8   : > { %v2336_v38 = vpop.f32.mrf.mxu3 }
0x1df9   : > { %4477 = vmatmul.msk.f32.gmra.mxu0 %vm666_vm5, %v2336_v38 }
0x1e0c   : > { %2383 = vrot.lane.b32.xlu1 %v5171_v9, %s4945_s28 }
0x1e14   : > { %2477 = vrot.lane.b32.xlu1 %v5200_v29, %s4945_s28 }
0x1e1c   : > { %2475 = vrot.lane.b32.xlu1 %v5202_v30, %s4945_s28 }
0x1e66   : > { %v2472_v22 = vpop.xlane.xlu1 %2471 }
0x1e67   : > { %4741 = vrcp.f32 %v2472_v22 }
0x1e6d   : > { %v4742_v40 = vpop.eup %4741 }
0x1e6e   : > { %v5497_v41 = vmul.f32 %v4742_v40, %v4740_v33  ;;  %v5520_v35 = vpop.f32.mrf.mxu0 }
0x1e70   : > { %2544 = vxpose.xlu0.b32.start.end [1/1] (short) (narrow) %v5497_v41, 8 }
0x1e76   : > { %v5524_v53 = vpop.f32.mrf.mxu0 }
0x1e7e   : > { %v2384_v42 = vpop.permute.xlu1 %2383 }
0x1e7f   : > { %4479 = vmatmul.msk.f32.vlgmr.msra.gmra.mxu1 %vm633_vm1, %v2384_v42 }
0x1e86   : > { %v2478_v5 = vpop.permute.xlu1 %2477 }
0x1e87   : > { %4480 = vmatmul.msk.f32.gmra.mxu1 %vm633_vm1, %v2386_v18  ;;  %4483 = vmatpush.xpose.msk.msra.mxu2 %vm633_vm1, %v2478_v5 }
0x1e8e   : > { %v2476_v43 = vpop.permute.xlu1 %2475 }
0x1e8f   : > { %4484 = vmatpush.xpose.msk.msra.mxu2 %vm633_vm1, %v2476_v43 }
0x1e92   : > { %4485 = vmatmul.msk.f32.vlgmr.msra.gmra.mxu2 %vm633_vm1, %v5398_v16  ;;  %v5518_v16 = vpop.permute.xlu2 %3266 }
0x1e9a   : > { %v5522_v50 = vpop.permute.xlu2 %3319 }
0x1efc   : > { %v2412_v13 = vpop.f32.mrf.mxu1 }
0x1efd   : > { %v2418_v44 = vsel %vm666_vm5, %v2412_v13, -inf }
0x1efe   : > { %2419 = vmax.xlane.f32.xlu2 %v2418_v44 }
0x1f04   : > { %v2415_v61 = vpop.f32.mrf.mxu1 }
0x1f05   : > { %v2421_v62 = vsel %vm670_vm2, %v2415_v61, -inf }
0x1f14   : > { %v2560_v45 = vpop.trf.xlu0 }
0x1f15   : > { %v2576_v47 = vmul.f32 %v2560_v45, %v5225_v46  ;;  %v2500_v48 = vpop.f32.mrf.mxu2 }
0x1f16   : > { %v2503_v49 = vsel %vm750_vm3, %v2500_v48, -inf }
0x1f17   : > { %4488 = vmatpush.msk.msrb.mxu0 %vm766_vm4, %v2576_v47  ;;  %2504 = vmax.xlane.f32.xlu0 %v2503_v49 }
0x1f18   : > { %4489 = vmatmul.msk.f32.vlgmr.msrb.gmra.mxu0 %vm666_vm5, %v5497_v41 }
0x1f2b   : > { %3356 = vrot.lane.b32.xlu0 %v5200_v29, %s4946_s0 }
0x1f33   : > { %3395 = vrot.lane.b32.xlu0 %v5237_v58, %s4946_s0 }
0x1f3b   : > { %3393 = vrot.lane.b32.xlu0 %v5235_v57, %s4946_s0 }
0x1f71   : > { %v2420_v55 = vpop.xlane.xlu2 %2419 }
0x1f72   : > { %v2424_v56 = vsub.f32 %v2412_v13, %v2420_v55 }
0x1f74   : > { %v2426_v60 = vmul.f32 1.442695, %v2424_v56 }
0x1f8a   : > { %v2505_v51 = vpop.xlane.xlu0 %2504 }
0x1f8b   : > { %v2506_v52 = vsub.f32 %v2500_v48, %v2505_v51 }
0x1f8d   : > { %v2507_v54 = vmul.f32 1.442695, %v2506_v52 }
0x1f8f   : > { %4743 = vpow2.f32 %v2507_v54 }
0x1f90   : > { %4745 = vpow2.f32 %v2426_v60 }
0x1f95   : > { %v4744_v29 = vpop.eup %4743  ;;  %v2600_v59 = vpop.f32.mrf.mxu0 }
0x1f96   : > { %v2603_v58 = vsub.f32 %v5245_v1, %v2600_v59  ;;  %v2509_v57 = vsel %vm750_vm3, %v4744_v29, 0.0  ;;  %v5531_v63 = vpop.eup %4745 }
0x1f97   : > { %2510 = vadd.xlane.f32.xlu1 %v2509_v57  ;;  %v2430_v2 = vsel %vm666_vm5, %v5531_v63, 0.0 }
0x1f98   : > { %4490 = vmatpush.msk.msrb.mxu1 %vm766_vm4, %v2603_v58 }
0x1f99   : > { %4491 = vmatmul.msk.f32.vlgmr.msrb.gmra.mxu1 %vm666_vm5, %v2600_v59 }
0x1f9f   : > { %2422 = vmax.xlane.f32.xlu1 %v2421_v62 }
0x1fa7   : > { %2431 = vadd.xlane.f32.xlu1 %v2430_v2 }
0x200a   : > { %v2511_v3 = vpop.xlane.xlu1 %2510 }
0x200b   : > { %4747 = vrcp.f32 %v2511_v3 }
0x2011   : > { %v4748_v4 = vpop.eup %4747 }
0x2012   : > { %v2513_v6 = vmul.f32 %v4748_v4, %v4744_v29  ;;  %v2423_v7 = vpop.xlane.xlu1 %2422  ;;  %v3357_v4 = vpop.permute.xlu0 %3356 }
0x2013   : > { %v2425_v34 = vsub.f32 %v2415_v61, %v2423_v7 }
0x2014   : > { %4487 = vmatmul.msk.f32.vlgmr.msra.gmra.mxu3 %vm762_vm7, %v2513_v6 }
0x2015   : > { %v2428_v36 = vmul.f32 1.442695, %v2425_v34 }
0x2016   : > { %v2627_v10 = vpop.f32.mrf.mxu1 }
0x2017   : > { %4749 = vpow2.f32 %v2428_v36  ;;  %v2630_v11 = vsub.f32 %v5257_v17, %v2627_v10 }
0x2019   : > { %4492 = vmatpush.msk.msrb.mxu2 %vm766_vm4, %v2630_v11 }
0x201a   : > { %4493 = vmatmul.msk.f32.vlgmr.msrb.gmra.mxu2 %vm666_vm5, %v2600_v59  ;;  %v2432_v6 = vpop.xlane.xlu1 %2431  ;;  %v3396_v7 = vpop.permute.xlu0 %3395 }
0x201b   : > { %4751 = vrcp.f32 %v2432_v6 }
0x201d   : > { %v5539_v18 = vpop.eup %4749 }
0x201e   : > { %v2433_v19 = vsel %vm670_vm2, %v5539_v18, 0.0 }
0x201f   : > { %2434 = vadd.xlane.f32.xlu1 %v2433_v19 }
0x2021   : > { %v4752_v36 = vpop.eup %4751 }
0x2022   : > { %v2438_v19 = vmul.f32 %v4752_v36, %v5531_v63 }
0x2092   : > { %v2435_v34 = vpop.xlane.xlu1 %2434 }
0x2093   : > { %4753 = vrcp.f32 %v2435_v34 }
0x2097   : > { %v5546_v8 = vpop.f32.mrf.mxu3 }
0x209d   : > { %v2651_v21 = vpop.f32.mrf.mxu2 }
0x209e   : > { %v2654_v23 = vsub.f32 %v5262_v20, %v2651_v21  ;;  %v4754_v21 = vpop.eup %4753 }
0x20a0   : > { %4494 = vmatpush.msk.msrb.mxu3 %vm766_vm4, %v2654_v23 }
0x20a1   : > { %4495 = vmatmul.msk.f32.vlgmr.msrb.gmra.mxu3 %vm666_vm5, %v2576_v47 }
0x2124   : > { %v2677_v24 = vpop.f32.mrf.mxu3 }
0x2125   : > { %v2680_v25 = vmul.f32 0.25, %v2677_v24  ;;  %v2439_v24 = vmul.f32 %v4754_v21, %v5539_v18 }
0x2127   : > { %4496 = vmatpush.msk.msra.mxu0 %vm766_vm4, %v2680_v25 }
0x2128   : > { %4497 = vmatmul.msk.f32.vlgmr.msra.gmra.mxu0 %vm666_vm5, %v5497_v41 }
0x21a5   : > { %v2701_v14 = vpop.f32.mrf.mxu0 }
0x21a6   : > { %v2704_v26 = vsub.f32 %v5245_v1, %v2701_v14 }
0x21a8   : > { %4498 = vmatpush.msk.msra.mxu1 %vm766_vm4, %v2704_v26 }
0x21a9   : > { %4499 = vmatmul.msk.f32.vlgmr.msra.gmra.mxu1 %vm666_vm5, %v2701_v14 }
0x2226   : > { %v2728_v27 = vpop.f32.mrf.mxu1 }
0x2227   : > { %v2731_v28 = vsub.f32 %v5257_v17, %v2728_v27 }
0x2229   : > { %4500 = vmatpush.msk.msra.mxu2 %vm766_vm4, %v2731_v28 }
0x222a   : > { %4501 = vmatmul.msk.f32.vlgmr.msra.gmra.mxu2 %vm666_vm5, %v2701_v14 }
0x22ad   : > { %v2752_v31 = vpop.f32.mrf.mxu2 }
0x22ae   : > { %v2755_v15 = vsub.f32 %v5262_v20, %v2752_v31 }
0x22b0   : > { %4502 = vmatpush.msk.msra.mxu3 %vm766_vm4, %v2755_v15 }
0x22b1   : > { %4503 = vmatmul.msk.f32.vlgmr.msra.gmra.mxu3 %vm666_vm5, %v2680_v25 }
0x2334   : > { %v2778_v32 = vpop.f32.mrf.mxu3 }
0x2335   : > { %v2781_v0 = vmul.f32 0.25, %v2778_v32 }
0x2337   : > { %4504 = vmatpush.msk.msrb.mxu0 %vm766_vm4, %v2781_v0 }
0x2338   : > { %4505 = vmatmul.msk.f32.vlgmr.msrb.gmra.mxu0 %vm666_vm5, %v5497_v41 }
0x23b5   : > { %v2802_v39 = vpop.f32.mrf.mxu0 }
0x23b6   : > { %v2805_v33 = vsub.f32 %v5245_v1, %v2802_v39 }
0x23b8   : > { %4506 = vmatpush.msk.msrb.mxu1 %vm766_vm4, %v2805_v33 }
0x23b9   : > { %4507 = vmatmul.msk.f32.vlgmr.msrb.gmra.mxu1 %vm666_vm5, %v2802_v39 }
0x2436   : > { %v2829_v37 = vpop.f32.mrf.mxu1 }
0x2437   : > { %v2832_v38 = vsub.f32 %v5257_v17, %v2829_v37 }
0x2439   : > { %4508 = vmatpush.msk.msrb.mxu2 %vm766_vm4, %v2832_v38 }
0x243a   : > { %4509 = vmatmul.msk.f32.vlgmr.msrb.gmra.mxu2 %vm666_vm5, %v2802_v39 }
0x24bd   : > { %v2853_v22 = vpop.f32.mrf.mxu2 }
0x24be   : > { %v2856_v40 = vsub.f32 %v5262_v20, %v2853_v22 }
0x24c0   : > { %4510 = vmatpush.msk.msrb.mxu3 %vm766_vm4, %v2856_v40 }
0x24c1   : > { %4511 = vmatmul.msk.f32.vlgmr.msrb.gmra.mxu3 %vm666_vm5, %v2781_v0 }
0x2544   : > { %v2879_v42 = vpop.f32.mrf.mxu3 }
0x2545   : > { %v2882_v5 = vmul.f32 0.25, %v2879_v42 }
0x2547   : > { %4512 = vmatpush.msk.msra.mxu0 %vm766_vm4, %v2882_v5 }
0x2548   : > { %4513 = vmatmul.msk.f32.vlgmr.msra.gmra.mxu0 %vm666_vm5, %v5497_v41 }
0x25c5   : > { %v2903_v43 = vpop.f32.mrf.mxu0 }
0x25c6   : > { %v2906_v13 = vsub.f32 %v5245_v1, %v2903_v43 }
0x25c8   : > { %4514 = vmatpush.msk.msra.mxu1 %vm766_vm4, %v2906_v13 }
0x25c9   : > { %4515 = vmatmul.msk.f32.vlgmr.msra.gmra.mxu1 %vm666_vm5, %v2903_v43 }
0x2646   : > { %v2930_v44 = vpop.f32.mrf.mxu1 }
0x2647   : > { %v2933_v45 = vsub.f32 %v5257_v17, %v2930_v44 }
0x2649   : > { %4516 = vmatpush.msk.msra.mxu2 %vm766_vm4, %v2933_v45 }
0x264a   : > { %4517 = vmatmul.msk.f32.vlgmr.msra.gmra.mxu2 %vm666_vm5, %v2903_v43 }
0x26cd   : > { %v2954_v47 = vpop.f32.mrf.mxu2 }
0x26ce   : > { %v2957_v48 = vsub.f32 %v5262_v20, %v2954_v47 }
0x26d0   : > { %4518 = vmatpush.msk.msra.mxu3 %vm766_vm4, %v2957_v48 }
0x26d1   : > { %4519 = vmatmul.msk.f32.vlgmr.msra.gmra.mxu3 %vm666_vm5, %v2882_v5 }
0x2754   : > { %v2980_v49 = vpop.f32.mrf.mxu3 }
0x2755   : > { %v2983_v51 = vmul.f32 0.25, %v2980_v49 }
0x2757   : > { %4520 = vmatpush.msk.msrb.mxu0 %vm766_vm4, %v2983_v51 }
0x2758   : > { %4521 = vmatmul.msk.f32.vlgmr.msrb.gmra.mxu0 %vm666_vm5, %v5497_v41 }
0x27d5   : > { %v3004_v52 = vpop.f32.mrf.mxu0 }
0x27d6   : > { %v3007_v54 = vsub.f32 %v5245_v1, %v3004_v52 }
0x27d8   : > { %4522 = vmatpush.msk.msrb.mxu1 %vm766_vm4, %v3007_v54 }
0x27d9   : > { %4523 = vmatmul.msk.f32.vlgmr.msrb.gmra.mxu1 %vm666_vm5, %v3004_v52 }
0x2856   : > { %v3031_v55 = vpop.f32.mrf.mxu1 }
0x2857   : > { %v3034_v29 = vsub.f32 %v5257_v17, %v3031_v55 }
0x2859   : > { %4524 = vmatpush.msk.msrb.mxu2 %vm766_vm4, %v3034_v29 }
0x285a   : > { %4525 = vmatmul.msk.f32.vlgmr.msrb.gmra.mxu2 %vm666_vm5, %v3004_v52 }
0x28dd   : > { %v3055_v56 = vpop.f32.mrf.mxu2 }
0x28de   : > { %v3058_v59 = vsub.f32 %v5262_v20, %v3055_v56 }
0x28e0   : > { %4526 = vmatpush.msk.msrb.mxu3 %vm766_vm4, %v3058_v59 }
0x28e1   : > { %4527 = vmatmul.msk.f32.vlgmr.msrb.gmra.mxu3 %vm666_vm5, %v2983_v51 }
0x2964   : > { %v3081_v58 = vpop.f32.mrf.mxu3 }
0x2965   : > { %v3084_v57 = vmul.f32 0.25, %v3081_v58 }
0x2967   : > { %4528 = vmatpush.msk.msra.mxu0 %vm766_vm4, %v3084_v57 }
0x2968   : > { %4529 = vmatmul.msk.f32.vlgmr.msra.gmra.mxu0 %vm666_vm5, %v5497_v41 }
0x29e5   : > { %v3105_v60 = vpop.f32.mrf.mxu0 }
0x29e6   : > { %v3108_v61 = vsub.f32 %v5245_v1, %v3105_v60 }
0x29e8   : > { %4530 = vmatpush.msk.msra.mxu1 %vm766_vm4, %v3108_v61 }
0x29e9   : > { %4531 = vmatmul.msk.f32.vlgmr.msra.gmra.mxu1 %vm666_vm5, %v3105_v60 }
0x29ea   : > { %4539 = vmatpush.msk.msrb.mxu1 %vm766_vm4, %v5546_v8 }
0x2a66   : > { %v3132_v62 = vpop.f32.mrf.mxu1 }
0x2a67   : > { %v3135_v2 = vsub.f32 %v5257_v17, %v3132_v62 }
0x2a69   : > { %4532 = vmatpush.msk.msra.mxu2 %vm766_vm4, %v3135_v2 }
0x2a6a   : > { %4533 = vmatmul.msk.f32.vlgmr.msra.gmra.mxu2 %vm666_vm5, %v3105_v60 }
0x2a6b   : > { %4542 = vmatpush.xpose.msk.msrb.mxu2 %vm633_vm1, %v5518_v16 }
0x2aed   : > { %v3156_v41 = vpop.f32.mrf.mxu2 }
0x2aee   : > { %v3159_v3 = vsub.f32 %v5262_v20, %v3156_v41 }
0x2af0   : > { %4534 = vmatpush.msk.msra.mxu3 %vm766_vm4, %v3159_v3 }
0x2af1   : > { %4535 = vmatmul.msk.f32.vlgmr.msra.gmra.mxu3 %vm666_vm5, %v3084_v57 }
0x2af2   : > { %4545 = vmatpush.xpose.msk.msrb.mxu3 %vm633_vm1, %v5518_v16  ;;  %v3394_v16 = vpop.permute.xlu0 %3393 }
0x2af6   : > { %4547 = vmatpush.xpose.msk.msra.mxu3 %vm633_vm1, %v3357_v4 }
0x2af9   : > { %4546 = vmatmul.msk.f32.vlgmr.msrb.gmra.mxu3 %vm633_vm1, %v5522_v50 }
0x2b74   : > { %v3182_v10 = vpop.f32.mrf.mxu3 }
0x2b75   : > { %v3185_v11 = vmul.f32 0.25, %v3182_v10 }
0x2b77   : > { %4536 = vmatpush.msk.msrb.mxu0 %vm766_vm4, %v3185_v11 }
0x2b78   : > { %4537 = vmatmul.msk.f32.vlgmr.msrb.gmra.mxu0 %vm666_vm5, %v2438_v19 }
0x2b79   : > { %4550 = vmatpush.msk.msra.mxu0 %vm766_vm4, %v3396_v7 }
0x2b7b   : > { %3418 = vmatpush.msra.mxu0 %v3394_v16 }
0x2b7c   : > { %v3340_v23 = vpop.f32.mrf.mxu3 }
0x2b7d   : > { %v3343_v8 = vsel %vm670_vm2, %v3340_v23, -inf }
0x2b7e   : > { %3344 = vmax.xlane.f32.xlu1 %v3343_v8 }
0x2b80   : > { %4538 = vmatmul.msk.f32.gmra.mxu0 %vm666_vm5, %v2439_v24 }
0x2bf1   : > { %v3345_v25 = vpop.xlane.xlu1 %3344 }
0x2bf2   : > { %v3346_v14 = vsub.f32 %v3340_v23, %v3345_v25 }
0x2bf4   : > { %v3347_v63 = vmul.f32 1.442695, %v3346_v14 }
0x2bf5   : > { %v3212_v26 = vpop.f32.mrf.mxu0 }
0x2bf6   : > { %4755 = vpow2.f32 %v3347_v63  ;;  %4540 = vmatmul.msk.f32.vlgmr.msrb.gmra.mxu1 %vm666_vm5, %v3212_v26 }
0x2bfc   : > { %v4756_v27 = vpop.eup %4755 }
0x2bfd   : > { %v3215_v28 = vpop.f32.mrf.mxu0  ;;  %v3349_v31 = vsel %vm670_vm2, %v4756_v27, 0.0 }
0x2bfe   : > { %4541 = vmatmul.msk.f32.gmra.mxu1 %vm666_vm5, %v3215_v28  ;;  %3350 = vadd.xlane.f32.xlu1 %v3349_v31 }
0x2c17   : > { %3262 = vrot.lane.b32.xlu1 %v5171_v9, %s4946_s0 }
0x2c1f   : > { %3264 = vrot.lane.b32.xlu1 %v5175_v12, %s4946_s0 }
0x2c27   : > { %3354 = vrot.lane.b32.xlu1 %v5202_v30, %s4946_s0 }
0x2c71   : > { %v3351_v18 = vpop.xlane.xlu1 %3350 }
0x2c72   : > { %4757 = vrcp.f32 %v3351_v18 }
0x2c78   : > { %v4758_v15 = vpop.eup %4757 }
0x2c79   : > { %v5633_v32 = vmul.f32 %v4758_v15, %v4756_v27 }
0x2c7b   : > { %3423 = vxpose.xlu2.b32.start.end [1/1] (short) (narrow) %v5633_v32, 8 }
0x2c89   : > { %v3263_v0 = vpop.permute.xlu1 %3262 }
0x2c8a   : > { %4543 = vmatmul.msk.f32.vlgmr.msrb.gmra.mxu2 %vm633_vm1, %v3263_v0 }
0x2c91   : > { %v3265_v39 = vpop.permute.xlu1 %3264 }
0x2c92   : > { %4544 = vmatmul.msk.f32.gmra.mxu2 %vm633_vm1, %v3265_v39 }
0x2c99   : > { %v3355_v9 = vpop.permute.xlu1 %3354 }
0x2c9a   : > { %4548 = vmatpush.xpose.msk.msra.mxu3 %vm633_vm1, %v3355_v9 }
0x2c9d   : > { %4549 = vmatmul.msk.f32.vlgmr.msra.gmra.mxu3 %vm633_vm1, %v5522_v50  ;;  %v3244_v50 = vpop.f32.mrf.mxu1 }
0x2ca5   : > { %v3247_v40 = vpop.f32.mrf.mxu1 }
0x2d0d   : > { %v3291_v12 = vpop.f32.mrf.mxu2 }
0x2d0e   : > { %v3297_v30 = vsel %vm666_vm5, %v3291_v12, -inf }
0x2d0f   : > { %3298 = vmax.xlane.f32.xlu0 %v3297_v30 }
0x2d14   : > { %v3439_v33 = vpop.trf.xlu2 }
0x2d15   : > { %v3455_v37 = vmul.f32 %v3439_v33, %v5225_v46  ;;  %v3294_v52 = vpop.f32.mrf.mxu2 }
0x2d16   : > { %v3300_v54 = vsel %vm670_vm2, %v3294_v52, -inf }
0x2d17   : > { %4552 = vmatpush.msk.msra.mxu1 %vm766_vm4, %v3455_v37 }
0x2d18   : > { %4553 = vmatmul.msk.f32.vlgmr.msra.gmra.mxu1 %vm666_vm5, %v5633_v32 }
0x2d20   : > { %v3379_v38 = vpop.f32.mrf.mxu3 }
0x2d21   : > { %v3382_v22 = vsel %vm750_vm3, %v3379_v38, -inf }
0x2d22   : > { %3383 = vmax.xlane.f32.xlu2 %v3382_v22 }
0x2d23   : > { %2373 = vrot.lane.b32.xlu0 %v5520_v35, %s4947_s27 }
0x2d2b   : > { %3252 = vrot.lane.b32.xlu0 %v3244_v50, %s4948_s26 }
0x2d82   : > { %v3299_v42 = vpop.xlane.xlu0 %3298 }
0x2d83   : > { %v3303_v48 = vsub.f32 %v3291_v12, %v3299_v42 }
0x2d85   : > { %v3305_v51 = vmul.f32 1.442695, %v3303_v48 }
0x2d95   : > { %v3479_v46 = vpop.f32.mrf.mxu1  ;;  %v3384_v5 = vpop.xlane.xlu2 %3383 }
0x2d96   : > { %v3482_v43 = vsub.f32 %v5245_v1, %v3479_v46  ;;  %v3385_v13 = vsub.f32 %v3379_v38, %v3384_v5  ;;  %v2374_v44 = vpop.permute.xlu0 %2373 }
0x2d97   : > { %2380 = vst.msk [vmem:[#allocation2] sm:$0xff] %vm2379_vm9, %v2374_v44 }
0x2d98   : > { %v3386_v45 = vmul.f32 1.442695, %v3385_v13  ;;  %4554 = vmatpush.msk.msra.mxu2 %vm766_vm4, %v3482_v43 }
0x2d99   : > { %4555 = vmatmul.msk.f32.vlgmr.msra.gmra.mxu2 %vm666_vm5, %v3479_v46 }
0x2d9a   : > { %4759 = vpow2.f32 %v3386_v45 }
0x2d9b   : > { %4761 = vpow2.f32 %v3305_v51 }
0x2d9e   : > { %v3253_v35 = vpop.permute.xlu0 %3252 }
0x2d9f   : > { %3259 = vst.msk [vmem:[#allocation2] sm:$0xff] %vm3258_vm10, %v3253_v35 }
0x2da0   : > { %v4760_v47 = vpop.eup %4759 }
0x2da1   : > { %v3388_v49 = vsel %vm750_vm3, %v4760_v47, 0.0  ;;  %v5655_v55 = vpop.eup %4761 }
0x2da2   : > { %3389 = vadd.xlane.f32.xlu1 %v3388_v49  ;;  %v3309_v29 = vsel %vm666_vm5, %v5655_v55, 0.0 }
0x2daa   : > { %3301 = vmax.xlane.f32.xlu1 %v3300_v54 }
0x2db2   : > { %3310 = vadd.xlane.f32.xlu1 %v3309_v29 }
0x2e15   : > { %v3390_v56 = vpop.xlane.xlu1 %3389 }
0x2e16   : > { %4763 = vrcp.f32 %v3390_v56 }
0x2e1c   : > { %v4764_v59 = vpop.eup %4763  ;;  %v3506_v58 = vpop.f32.mrf.mxu2 }
0x2e1d   : > { %v3392_v57 = vmul.f32 %v4764_v59, %v4760_v47  ;;  %v3509_v60 = vsub.f32 %v5257_v17, %v3506_v58  ;;  %v3302_v61 = vpop.xlane.xlu1 %3301 }
0x2e1e   : > { %v3304_v62 = vsub.f32 %v3294_v52, %v3302_v61 }
0x2e1f   : > { %4551 = vmatmul.msk.f32.vlgmr.msra.gmra.mxu0 %vm762_vm7, %v3392_v57  ;;  %4556 = vmatpush.msk.msrb.mxu3 %vm766_vm4, %v3509_v60  ;;  %v4626_v60 = vld [vmem:[#allocation10] sm:$0xff] }
0x2e20   : > { %v3307_v2 = vmul.f32 1.442695, %v3304_v62  ;;  %4557 = vmatmul.msk.f32.vlgmr.msrb.gmra.mxu3 %vm666_vm5, %v3479_v46 }
0x2e22   : > { %4765 = vpow2.f32 %v3307_v2 }
0x2e25   : > { %v5671_v7 = vpop.xlane.xlu1 %3310 }
0x2e26   : > { %4767 = vrcp.f32 %v5671_v7 }
0x2e28   : > { %v5663_v41 = vpop.eup %4765 }
0x2e29   : > { %v3312_v3 = vsel %vm670_vm2, %v5663_v41, 0.0 }
0x2e2a   : > { %3313 = vadd.xlane.f32.xlu1 %v3312_v3 }
0x2e43   : > { %2375 = vrot.lane.b32.xlu1 %v5524_v53, %s4947_s27 }
0x2e4b   : > { %3254 = vrot.lane.b32.xlu1 %v3247_v40, %s4948_s26 }
0x2e9c   : > { %v5677_v53 = vpop.f32.mrf.mxu0 }
0x2e9d   : > { %v5675_v34 = vpop.xlane.xlu1 %3313 }
0x2e9e   : > { %4769 = vrcp.f32 %v5675_v34 }
0x2ea3   : > { %v3530_v4 = vpop.f32.mrf.mxu3 }
0x2ea4   : > { %v3533_v6 = vsub.f32 %v5262_v20, %v3530_v4  ;;  %v4706_v4 = vld [vmem:[%s5783_s11] ss:$0 sm:$0xff] }
0x2ea6   : > { %4558 = vmatpush.msk.msrb.mxu0 %vm766_vm4, %v3533_v6 }
0x2ea7   : > { %4559 = vmatmul.msk.f32.vlgmr.msrb.gmra.mxu0 %vm666_vm5, %v3455_v37 }
0x2eb5   : > { %v2376_v36 = vpop.permute.xlu1 %2375 }
0x2eb6   : > { %2382 = vst.msk [vmem:[#allocation2 + $0x8] sm:$0xf] %vm2381_vm11, %v2376_v36 }
0x2ebd   : > { %v3255_v10 = vpop.permute.xlu1 %3254 }
0x2ebe   : > { %3261 = vst.msk [vmem:[#allocation2 + $0x8] sm:$0xf] %vm3260_vm12, %v3255_v10 }
0x2f24   : > { %v3556_v11 = vpop.f32.mrf.mxu0 }
0x2f25   : > { %v3559_v19 = vmul.f32 0.25, %v3556_v11 }
0x2f27   : > { %4560 = vmatpush.msk.msrb.mxu1 %vm766_vm4, %v3559_v19 }
0x2f28   : > { %4561 = vmatmul.msk.f32.vlgmr.msrb.gmra.mxu1 %vm666_vm5, %v5633_v32 }
0x2fa5   : > { %v3580_v16 = vpop.f32.mrf.mxu1 }
0x2fa6   : > { %v3583_v21 = vsub.f32 %v5245_v1, %v3580_v16 }
0x2fa8   : > { %4562 = vmatpush.msk.msrb.mxu2 %vm766_vm4, %v3583_v21 }
0x2fa9   : > { %4563 = vmatmul.msk.f32.vlgmr.msrb.gmra.mxu2 %vm666_vm5, %v3580_v16 }
0x302c   : > { %v3607_v23 = vpop.f32.mrf.mxu2 }
0x302d   : > { %v3610_v8 = vsub.f32 %v5257_v17, %v3607_v23 }
0x302f   : > { %4564 = vmatpush.msk.msra.mxu3 %vm766_vm4, %v3610_v8 }
0x3030   : > { %4565 = vmatmul.msk.f32.vlgmr.msra.gmra.mxu3 %vm666_vm5, %v3580_v16 }
0x30b3   : > { %v3631_v24 = vpop.f32.mrf.mxu3 }
0x30b4   : > { %v3634_v25 = vsub.f32 %v5262_v20, %v3631_v24 }
0x30b6   : > { %4566 = vmatpush.msk.msra.mxu0 %vm766_vm4, %v3634_v25 }
0x30b7   : > { %4567 = vmatmul.msk.f32.vlgmr.msra.gmra.mxu0 %vm666_vm5, %v3559_v19 }
0x3134   : > { %v3657_v14 = vpop.f32.mrf.mxu0 }
0x3135   : > { %v3660_v63 = vmul.f32 0.25, %v3657_v14 }
0x3137   : > { %4568 = vmatpush.msk.msra.mxu1 %vm766_vm4, %v3660_v63 }
0x3138   : > { %4569 = vmatmul.msk.f32.vlgmr.msra.gmra.mxu1 %vm666_vm5, %v5633_v32 }
0x31b5   : > { %v3681_v26 = vpop.f32.mrf.mxu1 }
0x31b6   : > { %v3684_v27 = vsub.f32 %v5245_v1, %v3681_v26 }
0x31b8   : > { %4570 = vmatpush.msk.msra.mxu2 %vm766_vm4, %v3684_v27 }
0x31b9   : > { %4571 = vmatmul.msk.f32.vlgmr.msra.gmra.mxu2 %vm666_vm5, %v3681_v26 }
0x323c   : > { %v3708_v28 = vpop.f32.mrf.mxu2 }
0x323d   : > { %v3711_v31 = vsub.f32 %v5257_v17, %v3708_v28 }
0x323f   : > { %4572 = vmatpush.msk.msrb.mxu3 %vm766_vm4, %v3711_v31 }
0x3240   : > { %4573 = vmatmul.msk.f32.vlgmr.msrb.gmra.mxu3 %vm666_vm5, %v3681_v26 }
0x32c3   : > { %v3732_v18 = vpop.f32.mrf.mxu3 }
0x32c4   : > { %v3735_v15 = vsub.f32 %v5262_v20, %v3732_v18 }
0x32c6   : > { %4574 = vmatpush.msk.msrb.mxu0 %vm766_vm4, %v3735_v15 }
0x32c7   : > { %4575 = vmatmul.msk.f32.vlgmr.msrb.gmra.mxu0 %vm666_vm5, %v3660_v63 }
0x3344   : > { %v3758_v0 = vpop.f32.mrf.mxu0 }
0x3345   : > { %v3761_v39 = vmul.f32 0.25, %v3758_v0 }
0x3347   : > { %4576 = vmatpush.msk.msrb.mxu1 %vm766_vm4, %v3761_v39 }
0x3348   : > { %4577 = vmatmul.msk.f32.vlgmr.msrb.gmra.mxu1 %vm666_vm5, %v5633_v32 }
0x33c5   : > { %v3782_v9 = vpop.f32.mrf.mxu1 }
0x33c6   : > { %v3785_v12 = vsub.f32 %v5245_v1, %v3782_v9 }
0x33c8   : > { %4578 = vmatpush.msk.msrb.mxu2 %vm766_vm4, %v3785_v12 }
0x33c9   : > { %4579 = vmatmul.msk.f32.vlgmr.msrb.gmra.mxu2 %vm666_vm5, %v3782_v9 }
0x344c   : > { %v3809_v30 = vpop.f32.mrf.mxu2 }
0x344d   : > { %v3812_v33 = vsub.f32 %v5257_v17, %v3809_v30 }
0x344f   : > { %4580 = vmatpush.msk.msra.mxu3 %vm766_vm4, %v3812_v33 }
0x3450   : > { %4581 = vmatmul.msk.f32.vlgmr.msra.gmra.mxu3 %vm666_vm5, %v3782_v9 }
0x34d3   : > { %v3833_v37 = vpop.f32.mrf.mxu3 }
0x34d4   : > { %v3836_v38 = vsub.f32 %v5262_v20, %v3833_v37 }
0x34d6   : > { %4582 = vmatpush.msk.msra.mxu0 %vm766_vm4, %v3836_v38 }
0x34d7   : > { %4583 = vmatmul.msk.f32.vlgmr.msra.gmra.mxu0 %vm666_vm5, %v3761_v39 }
0x3554   : > { %v3859_v22 = vpop.f32.mrf.mxu0 }
0x3555   : > { %v3862_v50 = vmul.f32 0.25, %v3859_v22 }
0x3557   : > { %4584 = vmatpush.msk.msra.mxu1 %vm766_vm4, %v3862_v50 }
0x3558   : > { %4585 = vmatmul.msk.f32.vlgmr.msra.gmra.mxu1 %vm666_vm5, %v5633_v32 }
0x35d5   : > { %v3883_v40 = vpop.f32.mrf.mxu1 }
0x35d6   : > { %v3886_v42 = vsub.f32 %v5245_v1, %v3883_v40 }
0x35d8   : > { %4586 = vmatpush.msk.msra.mxu2 %vm766_vm4, %v3886_v42 }
0x35d9   : > { %4587 = vmatmul.msk.f32.vlgmr.msra.gmra.mxu2 %vm666_vm5, %v3883_v40 }
0x365c   : > { %v3910_v46 = vpop.f32.mrf.mxu2 }
0x365d   : > { %v3913_v5 = vsub.f32 %v5257_v17, %v3910_v46 }
0x365f   : > { %4588 = vmatpush.msk.msrb.mxu3 %vm766_vm4, %v3913_v5 }
0x3660   : > { %4589 = vmatmul.msk.f32.vlgmr.msrb.gmra.mxu3 %vm666_vm5, %v3883_v40 }
0x36e3   : > { %v3934_v43 = vpop.f32.mrf.mxu3 }
0x36e4   : > { %v3937_v13 = vsub.f32 %v5262_v20, %v3934_v43 }
0x36e6   : > { %4590 = vmatpush.msk.msrb.mxu0 %vm766_vm4, %v3937_v13 }
0x36e7   : > { %4591 = vmatmul.msk.f32.vlgmr.msrb.gmra.mxu0 %vm666_vm5, %v3862_v50 }
0x3764   : > { %v3960_v44 = vpop.f32.mrf.mxu0 }
0x3765   : > { %v3963_v45 = vmul.f32 0.25, %v3960_v44 }
0x3767   : > { %4592 = vmatpush.msk.msrb.mxu1 %vm766_vm4, %v3963_v45 }
0x3768   : > { %4593 = vmatmul.msk.f32.vlgmr.msrb.gmra.mxu1 %vm666_vm5, %v5633_v32 }
0x37e5   : > { %v3984_v35 = vpop.f32.mrf.mxu1 }
0x37e6   : > { %v3987_v47 = vsub.f32 %v5245_v1, %v3984_v35  ;;  %v4768_v1 = vpop.eup %4767 }
0x37e7   : > { %v4770_v29 = vpop.eup %4769 }
0x37e8   : > { %4594 = vmatpush.msk.msrb.mxu2 %vm766_vm4, %v3987_v47 }
0x37e9   : > { %4595 = vmatmul.msk.f32.vlgmr.msrb.gmra.mxu2 %vm666_vm5, %v3984_v35 }
0x37ea   : > { %4603 = vmatpush.msk.msra.mxu2 %vm766_vm4, %v5677_v53 }
0x386c   : > { %v4011_v48 = vpop.f32.mrf.mxu2 }
0x386d   : > { %v4014_v49 = vsub.f32 %v5257_v17, %v4011_v48  ;;  %v3317_v17 = vmul.f32 %v4768_v1, %v5655_v55  ;;  %v4627_v55 = vld [vmem:[#allocation10 + $0x8] sm:$0xff] }
0x386f   : > { %4596 = vmatpush.msk.msra.mxu3 %vm766_vm4, %v4014_v49 }
0x3870   : > { %4597 = vmatmul.msk.f32.vlgmr.msra.gmra.mxu3 %vm666_vm5, %v3984_v35 }
0x3871   : > { %4168 = vmatpush.bf16.msrb.mxu3 %v4627_v55 }
0x3875   : > { %4169 = vmatpush.bf16.msrb.mxu3 %v4626_v60 }
0x38f3   : > { %v4035_v51 = vpop.f32.mrf.mxu3 }
0x38f4   : > { %v4038_v32 = vsub.f32 %v5262_v20, %v4035_v51  ;;  %v3318_v20 = vmul.f32 %v4770_v29, %v5663_v41 }
0x38f6   : > { %4598 = vmatpush.msk.msra.mxu0 %vm766_vm4, %v4038_v32 }
0x38f7   : > { %4599 = vmatmul.msk.f32.vlgmr.msra.gmra.mxu0 %vm666_vm5, %v3963_v45 }
0x3974   : > { %v4061_v52 = vpop.f32.mrf.mxu0 }
0x3975   : > { %v4064_v54 = vmul.f32 0.25, %v4061_v52 }
0x3977   : > { %4600 = vmatpush.msk.msra.mxu1 %vm766_vm4, %v4064_v54 }
0x3978   : > { %4601 = vmatmul.msk.f32.vlgmr.msra.gmra.mxu1 %vm666_vm5, %v3317_v17 }
0x3980   : > { %4602 = vmatmul.msk.f32.gmra.mxu1 %vm666_vm5, %v3318_v20 }
0x39f5   : > { %v4091_v56 = vpop.f32.mrf.mxu1 }
0x39f6   : > { %4604 = vmatmul.msk.f32.vlgmr.msra.gmra.mxu2 %vm666_vm5, %v4091_v56 }
0x39fd   : > { %v4094_v59 = vpop.f32.mrf.mxu1 }
0x39fe   : > { %4605 = vmatmul.msk.f32.gmra.mxu2 %vm666_vm5, %v4094_v59 }
0x3a79   : > { %v4123_v58 = vpop.f32.mrf.mxu2 }
0x3a7a   : > { %4131 = vrot.lane.b32.xlu0 %v4123_v58, %s4949_s14 }
0x3a81   : > { %v4126_v57 = vpop.f32.mrf.mxu2 }
0x3a82   : > { %4133 = vrot.lane.b32.xlu1 %v4126_v57, %s4949_s14 }
0x3aec   : > { %v4132_v61 = vpop.permute.xlu0 %4131 }
0x3aed   : > { %4138 = vst.msk [vmem:[#allocation2] sm:$0xff] %vm4137_vm13, %v4132_v61 }
0x3af4   : > { %v4134_v62 = vpop.permute.xlu1 %4133  ;;  %v4141_v2 = vld [vmem:[#allocation2] sm:$0xff] }
0x3af5   : > { %4140 = vst.msk [vmem:[#allocation2 + $0x8] sm:$0xf] %vm4139_vm14, %v4134_v62 }
0x3afc   : > { %v4142_v41 = vld [vmem:[#allocation2 + $0x8] sm:$0xf] }
0x3afd   : > { %v4143_v3 = vpack.c.bf16 %v4142_v41, %v4141_v2 }
0x3aff   : > { %4614 = vmatmul.msk.bf16.vlgmr.msrb.gmra.mxu3 %vm543_vm0, %v4143_v3 }
0x3b82   : > { %v4171_v6 = vpop.f32.mrf.mxu3 }
0x3b83   : > { %v4172_v7 = vadd.f32 %v4706_v4, %v4171_v6 }
0x3b85   : > { %4176 = vst.msk [vmem:[%s499_s8] sm:$0xff] %vm543_vm0, %v4172_v7 }
0x3b8a   : > { %v4173_v34 = vpop.f32.mrf.mxu3 }
0x3b8b   : > { %v4174_v36 = vadd.f32 %v4706_v4, %v4173_v34 }
0x3b8d   : > { %4178 = vst.msk [vmem:[%s499_s8 + $0x8] sm:$0xf] %vm4177_vm15, %v4174_v36 }
0x3b8e PF: > { %s5800_s26 = sld [smem:[#allocation17_spill]]  ;;  %s5803_s23 = smov %s4929_s24 }
0x3b8f   : > { %s5801_s29 = sld [smem:[#allocation16_spill]] }
0x3b90   : > { %s5802_s25 = sld [smem:[#allocation18_spill]] }
0x3b94   : > { %p27_p1 = scmp.ge.s32.totalorder %s5800_s26, 4  }
0x3b95   : > { %s5804_s24 = smov %s5801_s29 }
0x3b96   :  { %29 = sbr.rel (!%p27_p1) target bundleno = 11 (0xb), region = 128 }
0x3b9b   :  { %4200 = vsyncpa [#allocation6], 1 }
0x3b9c   :  { %4202 = vsyncpa [#allocation6 + $0x1], 1 }
0x3b9d   :  { %4203 = vsyncpa [#allocation8], 1 }
0x3b9e   :  { %4205 = vsyncpa [#allocation8 + $0x1], 1 }
0x3b9f   :  { %4206 = vsyncpa [#allocation11], 1 }

</bundles_post_ra>
